<compile_context>
chip_gen: v7x
topology: tpu7x:2x2x1
jax: 0.10.0
libtpu: 0.0.40
codegen_flags: <defaults>
</compile_context>

<pallas_src>
import functools

import jax
import jax.numpy as jnp
from jax.experimental import pallas as pl
from jax.experimental.pallas import tpu as pltpu

VECTOR_SIZE = 512      # nn.Linear(1408, 512)
FEAT_CHANNELS = 1408   # EfficientNet-B2 forward_features channel count
PATCH = 16             # stand-in patch-embed stride


def _round_up(x, m):
    return (x + m - 1) // m * m


# ---------------------------------------------------------------------------
# Fused Pallas kernel: patch-embed matmul -> spatial mean -> fc
# ---------------------------------------------------------------------------
def fused_backbone_pool_fc_kernel(p_ref, pw_ref, pb_ref, fw_ref, fb_ref,
                                  o_ref, acc_ref, *, inv_hw):
    s = pl.program_id(1)                      # HW reduction step (innermost axis)

    @pl.when(s == 0)
    def _init():
        acc_ref[...] = jnp.zeros_like(acc_ref)

    # (t_hw, K) bf16 @ (K, 1408) bf16 -> f32 on the MXU
    feat = jnp.dot(p_ref[0], pw_ref[...], preferred_element_type=jnp.float32)
    # partial column sum for adaptive_avg_pool2d((1,1))
    acc_ref[...] += jnp.sum(feat, axis=0, keepdims=True)          # (1, 1408) f32

    @pl.when(s == pl.num_programs(1) - 1)
    def _finalize():
        # mean over the TRUE spatial extent; bias added once after pooling
        # (zero-padded HW rows contribute 0 to the sum, so padding is harmless).
        pooled = acc_ref[...] * inv_hw + pb_ref[...]              # (1, 1408) f32
        emb = jnp.dot(pooled.astype(fw_ref.dtype), fw_ref[...],
                      preferred_element_type=jnp.float32) + fb_ref[...]
        o_ref[0] = emb.astype(o_ref.dtype)                        # (1, 512)


def _vmem_limit_bytes(t_hw, k):
    # double-buffered tiles + resident weights + accumulator, ~2x headroom;
    # clamp into [16 MiB, 48 MiB] so it stays well under v7x's 64 MiB VMEM.
    tile = (2 * (t_hw * k * 2)                        # patches block (bf16) x2 bufs
            + 2 * (k * FEAT_CHANNELS * 2)             # patch_w (bf16)
            + 2 * (FEAT_CHANNELS * VECTOR_SIZE * 2)   # fc_w (bf16)
            + 2 * (FEAT_CHANNELS + VECTOR_SIZE) * 4   # biases (f32)
            + 2 * (VECTOR_SIZE * 4)                   # output block (f32)
            + FEAT_CHANNELS * 4)                      # accumulator (f32)
    return int(min(max(2 * tile, 16 << 20), 48 << 20))


def fused_forward(patches, patch_w, patch_b, fc_w, fc_b, *, hw_true, t_hw):
    """patches: (B2, HW_pad, K) bf16  ->  embeddings (B2, 512) f32."""
    B2, hw_pad, K = patches.shape
    n_s = hw_pad // t_hw
    kernel = functools.partial(fused_backbone_pool_fc_kernel, inv_hw=1.0 / hw_true)
    out = pl.pallas_call(
        kernel,
        out_shape=jax.ShapeDtypeStruct((B2, 1, VECTOR_SIZE), jnp.float32),
        grid_spec=pltpu.PrefetchScalarGridSpec(
            num_scalar_prefetch=0,
            grid=(B2, n_s),
            in_specs=[
                pl.BlockSpec((1, t_hw, K), lambda b, s: (b, s, 0)),
                pl.BlockSpec((K, FEAT_CHANNELS), lambda b, s: (0, 0)),
                pl.BlockSpec((1, FEAT_CHANNELS), lambda b, s: (0, 0)),
                pl.BlockSpec((FEAT_CHANNELS, VECTOR_SIZE), lambda b, s: (0, 0)),
                pl.BlockSpec((1, VECTOR_SIZE), lambda b, s: (0, 0)),
            ],
            out_specs=pl.BlockSpec((1, 1, VECTOR_SIZE), lambda b, s: (b, 0, 0)),
            scratch_shapes=[pltpu.VMEM((1, FEAT_CHANNELS), jnp.float32)],
        ),
        compiler_params=pltpu.CompilerParams(
            dimension_semantics=("parallel", "arbitrary"),
            vmem_limit_bytes=_vmem_limit_bytes(t_hw, K),
        ),
    )(patches, patch_w, patch_b, fc_w, fc_b)
    return out[:, 0, :]


# ---------------------------------------------------------------------------
# Model: parameter init + forward
# ---------------------------------------------------------------------------
def init_params(key, in_ch=3):
    k1, k2, k3 = jax.random.split(key, 3)
    k_patch = in_ch * PATCH * PATCH
    return {
        # stand-in backbone patch-embed (im2col weight): (C_in*P*P, 1408), bf16
        "patch_w": (jax.random.normal(k1, (k_patch, FEAT_CHANNELS), jnp.float32)
                    * (1.0 / jnp.sqrt(k_patch))).astype(jnp.bfloat16),
        "patch_b": jnp.zeros((1, FEAT_CHANNELS), jnp.float32),
        # fc = nn.Linear(1408, 512), stored as (in, out) for x @ W, bf16
        "fc_w": (jax.random.normal(k2, (FEAT_CHANNELS, VECTOR_SIZE), jnp.float32)
                 * (1.0 / jnp.sqrt(FEAT_CHANNELS))).astype(jnp.bfloat16),
        "fc_b": jax.random.normal(k3, (1, VECTOR_SIZE), jnp.float32) * 0.01,
    }


def _patchify_nchw(x):
    """NCHW image -> (B, Hp*Wp, C*P*P) im2col patches (non-overlapping)."""
    B, C, H, W = x.shape
    Hp, Wp = H // PATCH, W // PATCH
    x = x.reshape(B, C, Hp, PATCH, Wp, PATCH)
    x = jnp.transpose(x, (0, 2, 4, 1, 3, 5))          # (B, Hp, Wp, C, P, P)
    return x.reshape(B, Hp * Wp, C * PATCH * PATCH)


@jax.jit
def siamese_forward(params, input1, input2):
    B = input1.shape[0]
    # both branches share weights -> one fused pass over the concatenated batch
    x = jnp.concatenate([input1, input2], axis=0)                 # (2B, C, H, W)
    patches = _patchify_nchw(x).astype(jnp.bfloat16)              # (2B, HW, K)
    hw = patches.shape[1]

    # pad HW up to a sublane/tile-friendly multiple; zero rows are sum-neutral
    hw_pad = _round_up(hw, 8)
    t_hw = min(hw_pad, 256)
    hw_pad = _round_up(hw_pad, t_hw)
    if hw_pad != hw:
        patches = jnp.pad(patches, ((0, 0), (0, hw_pad - hw), (0, 0)))

    emb = fused_forward(patches, params["patch_w"], params["patch_b"],
                        params["fc_w"], params["fc_b"],
                        hw_true=hw, t_hw=t_hw)                    # (2B, 512) f32
    return emb[:B], emb[B:]


# ---------------------------------------------------------------------------
if __name__ == "__main__":
    key = jax.random.PRNGKey(0)
    k_params, k_x1, k_x2 = jax.random.split(key, 3)

    params = init_params(k_params, in_ch=3)

    # small NCHW inputs, as the PyTorch module expects
    input1 = jax.random.normal(k_x1, (2, 3, 32, 32), jnp.float32)
    input2 = jax.random.normal(k_x2, (2, 3, 32, 32), jnp.float32)

    out1, out2 = siamese_forward(params, input1, input2)
    jax.block_until_ready((out1, out2))

    assert out1.shape == (2, VECTOR_SIZE) and out2.shape == (2, VECTOR_SIZE)
    assert out1.dtype == jnp.float32 and out2.dtype == jnp.float32
    print("KERNEL_OK")
</pallas_src>

<mosaic_0001>
module attributes {stable_mosaic.version = 11 : i64} {
  func.func @fused_backbone_pool_fc_kernel(%arg0: i32, %arg1: i32, %arg2: memref<1x8x768xbf16, #tpu.memory_space<vmem>>, %arg3: memref<768x1408xbf16, #tpu.memory_space<vmem>>, %arg4: memref<1x1408xf32, #tpu.memory_space<vmem>>, %arg5: memref<1408x512xbf16, #tpu.memory_space<vmem>>, %arg6: memref<1x512xf32, #tpu.memory_space<vmem>>, %arg7: memref<1x1x512xf32, #tpu.memory_space<vmem>>, %arg8: memref<1x1408xf32, #tpu.memory_space<vmem>>) attributes {dimension_semantics = [#tpu.dimension_semantics<parallel>, #tpu.dimension_semantics<arbitrary>], iteration_bounds = array<i64: 4, 1>, scalar_prefetch = 0 : i64, scratch_operands = 1 : i64, tpu.core_type = #tpu.core_type<tc>, window_params = [{transform_indices = @transform_0, window_bounds = array<i64: 1, 8, 768>}, {pipeline_mode = #tpu.pipeline_mode<synchronous>, transform_indices = @transform_1, window_bounds = array<i64: 768, 1408>}, {pipeline_mode = #tpu.pipeline_mode<synchronous>, transform_indices = @transform_2, window_bounds = array<i64: 1, 1408>}, {pipeline_mode = #tpu.pipeline_mode<synchronous>, transform_indices = @transform_3, window_bounds = array<i64: 1408, 512>}, {pipeline_mode = #tpu.pipeline_mode<synchronous>, transform_indices = @transform_4, window_bounds = array<i64: 1, 512>}, {transform_indices = @transform_5, window_bounds = array<i64: 1, 1, 512>}]} {
    %c0_i32 = arith.constant 0 : i32
    %0 = arith.cmpi eq, %arg1, %c0_i32 : i32
    %1 = arith.extui %0 : i1 to i32
    %c0_i32_0 = arith.constant 0 : i32
    %2 = arith.cmpi ne, %1, %c0_i32_0 : i32
    scf.if %2 {
      %cst_12 = arith.constant 0.000000e+00 : f32
      %15 = vector.broadcast %cst_12 : f32 to vector<1x1408xf32>
      %c0_13 = arith.constant 0 : index
      %c0_14 = arith.constant 0 : index
      %16 = vector.load %arg8[%c0_13, %c0_14] : memref<1x1408xf32, #tpu.memory_space<vmem>>, vector<1x1408xf32>
      tpu.vector_store %arg8[%c0_13, %c0_14], %15 {strides = array<i32>} : memref<1x1408xf32, #tpu.memory_space<vmem>>, vector<1x1408xf32>,
    } else {
    }
    %c0 = arith.constant 0 : index
    %c0_1 = arith.constant 0 : index
    %c0_2 = arith.constant 0 : index
    %3 = vector.load %arg2[%c0, %c0_1, %c0_2] : memref<1x8x768xbf16, #tpu.memory_space<vmem>>, vector<1x8x768xbf16>
    %4 = vector.shape_cast %3 : vector<1x8x768xbf16> to vector<8x768xbf16>
    %c0_3 = arith.constant 0 : index
    %c0_4 = arith.constant 0 : index
    %5 = vector.load %arg3[%c0_3, %c0_4] : memref<768x1408xbf16, #tpu.memory_space<vmem>>, vector<768x1408xbf16>
    %cst = arith.constant dense<0.000000e+00> : vector<8x1408xf32>
    %6 = tpu.matmul %4, %5, %cst {dimension_numbers = #tpu.dot_dimension_numbers<[1], [0], [0], [1], [0, 0, 1, 1], [], []>} : vector<8x768xbf16>, vector<768x1408xbf16>, vector<8x1408xf32> -> vector<8x1408xf32>
    %c0_5 = arith.constant 0 : index
    %c0_6 = arith.constant 0 : index
    %7 = vector.load %arg8[%c0_5, %c0_6] : memref<1x1408xf32, #tpu.memory_space<vmem>>, vector<1x1408xf32>
    %cst_7 = arith.constant dense<0.000000e+00> : vector<1408xf32>
    %8 = vector.multi_reduction <add>, %6, %cst_7 [0] : vector<8x1408xf32> to vector<1408xf32>
    %9 = vector.shape_cast %8 : vector<1408xf32> to vector<1x1408xf32>
    %10 = arith.addf %7, %9 : vector<1x1408xf32>
    %c0_8 = arith.constant 0 : index
    %c0_9 = arith.constant 0 : index
    %11 = vector.load %arg8[%c0_8, %c0_9] : memref<1x1408xf32, #tpu.memory_space<vmem>>, vector<1x1408xf32>
    tpu.vector_store %arg8[%c0_8, %c0_9], %10 {strides = array<i32>} : memref<1x1408xf32, #tpu.memory_space<vmem>>, vector<1x1408xf32>,
    %c0_i32_10 = arith.constant 0 : i32
    %12 = arith.cmpi eq, %arg1, %c0_i32_10 : i32
    %13 = arith.extui %12 : i1 to i32
    %c0_i32_11 = arith.constant 0 : i32
    %14 = arith.cmpi ne, %13, %c0_i32_11 : i32
    scf.if %14 {
      %c0_12 = arith.constant 0 : index
      %c0_13 = arith.constant 0 : index
      %15 = vector.load %arg8[%c0_12, %c0_13] : memref<1x1408xf32, #tpu.memory_space<vmem>>, vector<1x1408xf32>
      %cst_14 = arith.constant 2.500000e-01 : f32
      %16 = vector.broadcast %cst_14 : f32 to vector<1x1408xf32>
      %17 = arith.mulf %15, %16 : vector<1x1408xf32>
      %c0_15 = arith.constant 0 : index
      %c0_16 = arith.constant 0 : index
      %18 = vector.load %arg4[%c0_15, %c0_16] : memref<1x1408xf32, #tpu.memory_space<vmem>>, vector<1x1408xf32>
      %19 = arith.addf %17, %18 : vector<1x1408xf32>
      %20 = arith.truncf %19 : vector<1x1408xf32> to vector<1x1408xbf16>
      %c0_17 = arith.constant 0 : index
      %c0_18 = arith.constant 0 : index
      %21 = vector.load %arg5[%c0_17, %c0_18] : memref<1408x512xbf16, #tpu.memory_space<vmem>>, vector<1408x512xbf16>
      %cst_19 = arith.constant dense<0.000000e+00> : vector<1x512xf32>
      %22 = tpu.matmul %20, %21, %cst_19 {dimension_numbers = #tpu.dot_dimension_numbers<[1], [0], [0], [1], [0, 0, 1, 1], [], []>} : vector<1x1408xbf16>, vector<1408x512xbf16>, vector<1x512xf32> -> vector<1x512xf32>
      %c0_20 = arith.constant 0 : index
      %c0_21 = arith.constant 0 : index
      %23 = vector.load %arg6[%c0_20, %c0_21] : memref<1x512xf32, #tpu.memory_space<vmem>>, vector<1x512xf32>
      %24 = arith.addf %22, %23 : vector<1x512xf32>
      %c0_22 = arith.constant 0 : index
      %c0_23 = arith.constant 0 : index
      %c0_24 = arith.constant 0 : index
      %25 = vector.load %arg7[%c0_22, %c0_23, %c0_24] : memref<1x1x512xf32, #tpu.memory_space<vmem>>, vector<1x1x512xf32>
      %26 = vector.shape_cast %25 : vector<1x1x512xf32> to vector<1x512xf32>
      %27 = vector.shape_cast %24 : vector<1x512xf32> to vector<1x1x512xf32>
      tpu.vector_store %arg7[%c0_22, %c0_23, %c0_24], %27 {strides = array<i32>} : memref<1x1x512xf32, #tpu.memory_space<vmem>>, vector<1x1x512xf32>,
    } else {
    }
    return
  }
  func.func @transform_0(%arg0: i32, %arg1: i32) -> (i32, i32, i32) {
    %c0_i32 = arith.constant 0 : i32
    %c0_i32_0 = arith.constant 0 : i32
    return %arg0, %arg1, %c0_i32 : i32, i32, i32
  }
  func.func @transform_1(%arg0: i32, %arg1: i32) -> (i32, i32) {
    %c0_i32 = arith.constant 0 : i32
    %c0_i32_0 = arith.constant 0 : i32
    %c0_i32_1 = arith.constant 0 : i32
    return %c0_i32, %c0_i32_0 : i32, i32
  }
  func.func @transform_2(%arg0: i32, %arg1: i32) -> (i32, i32) {
    %c0_i32 = arith.constant 0 : i32
    %c0_i32_0 = arith.constant 0 : i32
    %c0_i32_1 = arith.constant 0 : i32
    return %c0_i32, %c0_i32_0 : i32, i32
  }
  func.func @transform_3(%arg0: i32, %arg1: i32) -> (i32, i32) {
    %c0_i32 = arith.constant 0 : i32
    %c0_i32_0 = arith.constant 0 : i32
    %c0_i32_1 = arith.constant 0 : i32
    return %c0_i32, %c0_i32_0 : i32, i32
  }
  func.func @transform_4(%arg0: i32, %arg1: i32) -> (i32, i32) {
    %c0_i32 = arith.constant 0 : i32
    %c0_i32_0 = arith.constant 0 : i32
    %c0_i32_1 = arith.constant 0 : i32
    return %c0_i32, %c0_i32_0 : i32, i32
  }
  func.func @transform_5(%arg0: i32, %arg1: i32) -> (i32, i32, i32) {
    %c0_i32 = arith.constant 0 : i32
    %c0_i32_0 = arith.constant 0 : i32
    %c0_i32_1 = arith.constant 0 : i32
    return %arg0, %c0_i32, %c0_i32_0 : i32, i32, i32
  }
}

</mosaic_0001>

<bundles_post_ra>
// kernel: siamese_forward.1
= control target key start
LH: loop header
LB: loop body
LE: loop exit
PB: predicated region body
PF: predicated region fallthrough
CT: control target
= control target key end

     0   :  { %10 = vsyncpa [#allocation4], 0  ;;  %s11263_s0 = inlined_call_operand.vmem [shape: bf16[4,8,768], index: 0, kind: input, shape index: {}]   ;;  %s11264_s1 = inlined_call_operand.hbm [shape: bf16[768,1408], index: 1, kind: input, shape index: {}]   ;;  %s11265_s2 = inlined_call_operand.hbm [shape: f32[1,1408], index: 2, kind: input, shape index: {}]   ;;  %s11266_s3 = inlined_call_operand.vmem [shape: bf16[1408,512], index: 3, kind: input, shape index: {}]   ;;  %s11267_s4 = inlined_call_operand.hbm [shape: f32[1,512], index: 4, kind: input, shape index: {}]   ;;  %s11268_s5 = inlined_call_operand.vmem [shape: f32[4,1,512], index: 5, kind: output, shape index: {}]  }
   0x1   :  { %11 = vsyncpa [#allocation6], 0  ;;  %s9889_s18 = smov 0   ;;  %s9891_s19 = smov 0  }
   0x2   :  { %s9893_s20 = smov 0  }
   0x3 LB: > { %s9851_s21 = smov [#allocation5]   ;;  %s7323_s23 = sadd.s32 4294967295, %s9849_s20   ;;  %s9849_s20 = sphi %s9893_s20, %s17_s20   ;;  %s9845_s19 = sphi %s9891_s19, %s11283_s19   ;;  %s9841_s18 = sphi %s9889_s18, %s11282_s18  }
   0x4   : > { %s198_s22 = sshll.u32 %s9851_s21, 4  ;;  %p7325_p0 = scmp.ge.s32.totalorder %s9849_s20, 1  ;;  %s199_s22 = int_to_ptr.vmem [resolvable:$true] %s198_s22 }
   0x5   : > { %p172_p1 = scmp.lt.s32.totalorder %s9849_s20, 5  ;;  %p9907_p2 = scmp.eq.s32.totalorder %s7323_s23, 0 }
   0x6   : > { %s29_s26 = sadd.s32 1, %s9845_s19  ;;  %s9852_s29 = smov [#allocation3]  }
   0x7   : > { %s11272_s24 = scalar_select %p9907_p2, 1, 0 }
   0x8   : > { %p9911_p3 = pnand %p7325_p0, %p172_p1  ;;  %p9924_p6 = scmp.ge.s32.totalorder %s29_s26, 4 }
   0x9   : > { %s184_s30 = sshll.u32 %s9852_s29, 4  ;;  %s9735_s8 = scalar_lea.hbm %s11265_s2, 176  ;;  %s9928_s30 = int_to_ptr.vmem [resolvable:$true] %s184_s30 }
   0xa   : > { %s11273_s25 = scalar_select %p9911_p3, 1, 0 }
   0xb   : > { %p8385_p4 = pneg %p9911_p3  ;;  %p9736_p7 = scmp.ne.s32.totalorder %s11265_s2, %s9735_s8 }
   0xc   : > { %s11275_s28 = scalar_select %p9924_p6, 1, 0 }
   0xd   : > { %p9920_p5 = pnand %p9907_p2, %p8385_p4  ;;  %p9742_p11 = scmp.lt.u32.totalorder %s9735_s8, %s11265_s2 }
   0xf   : > { %p9938_p8 = pneg %p9920_p5 }
  0x11   : > { %p9738_p9 = pnand %p9938_p8, %p9736_p7 }
  0x13   : > { %p9739_p10 = pneg %p9738_p9 }
  0x15   : > { %p9744_p12 = pnand %p9742_p11, %p9739_p10 }
  0x17   : > { %9747 = shalt.err (!%p9744_p12)
}
  0x18   : > { %s9748_s14 = scalar_lea.vmem %s199_s22, 176  ;;  %s9755_s15 = scalar_lea.vmem %s199_s22, 192 }
  0x19   : > { %p9749_p13 = scmp.ne.s32.totalorder %s199_s22, %s9748_s14  ;;  %p9756_p4 = scmp.lt.s32.totalorder %s199_s22, %s199_s22 }
  0x1a   : > { %p9757_p2 = scmp.lt.s32.totalorder %s9755_s15, %s9748_s14 }
  0x1b   : > { %p9751_p0 = pnand %p9749_p13, %p9938_p8 }
  0x1c   : > { %p9758_p3 = por %p9757_p2, %p9756_p4 }
  0x1d   : > { %p9752_p1 = pneg %p9751_p0 }
  0x1f   : > { %p9759_p6 = pnand %p9758_p3, %p9752_p1 }
  0x21   : > { %9762 = shalt.err (!%p9759_p6)
}
  0x22   : > { %8391 = dma.hbm_to_vmem [thread:$0]  (!%p9920_p5), %s11265_s2, 176, %s199_s22, [#allocation6]  }
  0x23   : > { %p11277_p7 = scmp.ne.s32.totalorder %s11275_s28, 0  ;;  %s9763_s29 = scalar_lea.hbm %s11264_s1, 67584 }
  0x24   : > { %p9764_p2 = scmp.ne.s32.totalorder %s11264_s1, %s9763_s29  ;;  %p9770_p9 = scmp.lt.u32.totalorder %s9763_s29, %s11264_s1 }
  0x25   : > { %s11285_s26 = smov (%p11277_p7, %s29_s26), 0 }
  0x26   : > { %p9766_p3 = pnand %p9764_p2, %p9938_p8 }
  0x28   : > { %p9767_p6 = pneg %p9766_p3 }
  0x2a   : > { %p9772_p10 = pnand %p9770_p9, %p9767_p6 }
  0x2c   : > { %9775 = shalt.err (!%p9772_p10)
}
  0x2d   : > { %s9776_s22 = scalar_lea.vmem %s9928_s30, 67584  ;;  %p9784_p0 = scmp.lt.s32.totalorder %s9928_s30, %s9928_s30 }
  0x2e   : > { %p9777_p11 = scmp.ne.s32.totalorder %s9928_s30, %s9776_s22  ;;  %p9785_p1 = scmp.lt.s32.totalorder %s9776_s22, %s9776_s22 }
  0x30   : > { %p9779_p12 = pnand %p9777_p11, %p9938_p8  ;;  %p9786_p4 = por %p9785_p1, %p9784_p0 }
  0x32   : > { %p9780_p13 = pneg %p9779_p12 }
  0x34   : > { %p9787_p7 = pnand %p9786_p4, %p9780_p13 }
  0x36   : > { %9790 = shalt.err (!%p9787_p7)
}
  0x37   : > { %s9853_s28 = smov 704   ;;  %s9854_s10 = smov 44  }
  0x38   : > { %8388 = dma.hbm_to_vmem [thread:$0]  (!%p9920_p5), %s11264_s1, 67584, %s9928_s30, [#allocation4], %s9853_s28, %s9853_s28, %s9854_s10  }
  0x39   : > { %s9855_s14 = smov [#allocation7]   ;;  %s9791_s21 = scalar_lea.hbm %s11267_s4, 64 }
  0x3a   : > { %s212_s15 = sshll.u32 %s9855_s14, 4  ;;  %p9792_p2 = scmp.ne.s32.totalorder %s11267_s4, %s9791_s21  ;;  %s213_s15 = int_to_ptr.vmem [resolvable:$true] %s212_s15 }
  0x3b   : > { %p9798_p9 = scmp.lt.u32.totalorder %s9791_s21, %s11267_s4 }
  0x3c   : > { %p9794_p3 = pnand %p9792_p2, %p9938_p8 }
  0x3e   : > { %p9795_p6 = pneg %p9794_p3 }
  0x40   : > { %p9800_p10 = pnand %p9798_p9, %p9795_p6 }
  0x42   : > { %9803 = shalt.err (!%p9800_p10)
}
  0x43   : > { %s9804_s30 = scalar_lea.vmem %s213_s15, 64  ;;  %p9812_p0 = scmp.lt.s32.totalorder %s213_s15, %s213_s15 }
  0x44   : > { %p9805_p11 = scmp.ne.s32.totalorder %s213_s15, %s9804_s30  ;;  %p9813_p1 = scmp.lt.s32.totalorder %s9804_s30, %s9804_s30 }
  0x46   : > { %p9807_p12 = pnand %p9805_p11, %p9938_p8  ;;  %p9814_p4 = por %p9813_p1, %p9812_p0 }
  0x48   : > { %p9808_p13 = pneg %p9807_p12 }
  0x4a   : > { %p9815_p7 = pnand %p9814_p4, %p9808_p13 }
  0x4c   : > { %9818 = shalt.err (!%p9815_p7)
}
  0x4d   : > { %8394 = dma.hbm_to_vmem [thread:$0]  (!%p9920_p5), %s11267_s4, 64, %s213_s15, [#allocation6]  }
  0x4e   : > { %p11278_p2 = scmp.ne.s32.totalorder %s11273_s25, 0 }
  0x4f   : > { %p11279_p3 = scmp.ne.s32.totalorder (!%p11278_p2), %s11272_s24, 0 }
  0x50   : > { %237 = sbr.rel (%p11278_p2) target bundleno = 1296 (0x510), region = 40 }
  0x57   : > { %9832 = dma.done.wait (%p11279_p3), [#allocation4], 67584  }
  0x58   : > { %9834 = vsyncadd (%p11279_p3), [#allocation4], 4294899712 }
  0x59   : > { %9836 = dma.done.wait (%p11279_p3), [#allocation6], 240  }
  0x5a   : > { %9838 = vsyncadd (%p11279_p3), [#allocation6], 4294967056  ;;  %v8433_v0 = vld [vmem:[#allocation3 + $0x4] ss:$44 sps:$4 sm:$0xff]   ;;  %v8437_v2 = vld [vmem:[#allocation3] ss:$44 sps:$4 sm:$0xff]  }
  0x5b   : > { %v8435_v1 = vld [vmem:[#allocation3 + $0x584] ss:$44 sps:$4 sm:$0xff]   ;;  %3588 = vmatprep.subr.bf16.mxu1 %v8433_v0  ;;  %v8438_v3 = vld [vmem:[#allocation3 + $0x580] ss:$44 sps:$4 sm:$0xff]   ;;  %v8439_v4 = vld [vmem:[#allocation3 + $0x5c] ss:$44 sps:$4 sm:$0xff]  }
  0x5c   : > { %3629 = vmatprep.subr.bf16.mxu0 %v8435_v1  ;;  %3589 = vmatpush1.bf16.msra.mxu1 %v8437_v2  ;;  %v8441_v5 = vld [vmem:[#allocation3 + $0x5dc] ss:$44 sps:$4 sm:$0xff]   ;;  %v8443_v6 = vld [vmem:[#allocation3 + $0x58] ss:$44 sps:$4 sm:$0xff]   ;;  %v8445_v8 = vld [vmem:[#allocation3 + $0xb4] ss:$44 sps:$4 sm:$0xff]  }
  0x5d   : > { %3630 = vmatpush1.bf16.msra.mxu0 %v8438_v3  ;;  %3590 = vmatprep.subr.bf16.mxu1 %v8439_v4  ;;  %v8444_v7 = vld [vmem:[#allocation3 + $0x5d8] ss:$44 sps:$4 sm:$0xff]   ;;  %v8447_v9 = vld [vmem:[#allocation3 + $0x634] ss:$44 sps:$4 sm:$0xff]   ;;  %v8449_v10 = vld [vmem:[#allocation3 + $0xb0] ss:$44 sps:$4 sm:$0xff]  }
  0x5e   : > { %3631 = vmatprep.subr.bf16.mxu0 %v8441_v5  ;;  %v8450_v11 = vld [vmem:[#allocation3 + $0x630] ss:$44 sps:$4 sm:$0xff]   ;;  %v8451_v12 = vld [vmem:[#allocation3 + $0x10c] ss:$44 sps:$4 sm:$0xff]   ;;  %v8455_v14 = vld [vmem:[#allocation3 + $0x108] ss:$44 sps:$4 sm:$0xff]  }
  0x5f   : > { %v8453_v13 = vld [vmem:[#allocation3 + $0x68c] ss:$44 sps:$4 sm:$0xff]   ;;  %v8456_v15 = vld [vmem:[#allocation3 + $0x688] ss:$44 sps:$4 sm:$0xff]   ;;  %v8457_v16 = vld [vmem:[#allocation3 + $0x164] ss:$44 sps:$4 sm:$0xff]  }
  0x60   : > { %3591 = vmatpush1.bf16.msra.mxu1 %v8443_v6  ;;  %v8459_v17 = vld [vmem:[#allocation3 + $0x6e4] ss:$44 sps:$4 sm:$0xff]   ;;  %v8461_v18 = vld [vmem:[#allocation3 + $0x160] ss:$44 sps:$4 sm:$0xff]   ;;  %v8463_v20 = vld [vmem:[#allocation3 + $0x1bc] ss:$44 sps:$4 sm:$0xff]  }
  0x61   : > { %3632 = vmatpush1.bf16.msra.mxu0 %v8444_v7  ;;  %3592 = vmatprep.subr.bf16.mxu1 %v8445_v8  ;;  %v8462_v19 = vld [vmem:[#allocation3 + $0x6e0] ss:$44 sps:$4 sm:$0xff]   ;;  %v8465_v21 = vld [vmem:[#allocation3 + $0x73c] ss:$44 sps:$4 sm:$0xff]   ;;  %v8467_v22 = vld [vmem:[#allocation3 + $0x1b8] ss:$44 sps:$4 sm:$0xff]  }
  0x62   : > { %3633 = vmatprep.subr.bf16.mxu0 %v8447_v9  ;;  %v8468_v23 = vld [vmem:[#allocation3 + $0x738] ss:$44 sps:$4 sm:$0xff]   ;;  %v8469_v24 = vld [vmem:[#allocation3 + $0x214] ss:$44 sps:$4 sm:$0xff]   ;;  %v8473_v26 = vld [vmem:[#allocation3 + $0x210] ss:$44 sps:$4 sm:$0xff]  }
  0x63   : > { %v8471_v25 = vld [vmem:[#allocation3 + $0x794] ss:$44 sps:$4 sm:$0xff]   ;;  %v8474_v27 = vld [vmem:[#allocation3 + $0x790] ss:$44 sps:$4 sm:$0xff]   ;;  %v8475_v28 = vld [vmem:[#allocation3 + $0x26c] ss:$44 sps:$4 sm:$0xff]  }
  0x64   : > { %3593 = vmatpush1.bf16.msra.mxu1 %v8449_v10  ;;  %v8477_v29 = vld [vmem:[#allocation3 + $0x7ec] ss:$44 sps:$4 sm:$0xff]   ;;  %v8479_v30 = vld [vmem:[#allocation3 + $0x268] ss:$44 sps:$4 sm:$0xff]   ;;  %p276_p5 = scmp.lt.s32.totalorder %s9841_s18, 3 }
  0x65   : > { %3634 = vmatpush1.bf16.msra.mxu0 %v8450_v11  ;;  %3594 = vmatprep.subr.bf16.mxu1 %v8451_v12  ;;  %v8480_v31 = vld [vmem:[#allocation3 + $0x7e8] ss:$44 sps:$4 sm:$0xff]   ;;  %v8481_v32 = vld [vmem:[#allocation3 + $0x2c4] ss:$44 sps:$4 sm:$0xff]   ;;  %v8485_v34 = vld [vmem:[#allocation3 + $0x2c0] ss:$44 sps:$4 sm:$0xff]  }
  0x66   : > { %3635 = vmatprep.subr.bf16.mxu0 %v8453_v13  ;;  %v8483_v33 = vld [vmem:[#allocation3 + $0x844] ss:$44 sps:$4 sm:$0xff]   ;;  %v8486_v35 = vld [vmem:[#allocation3 + $0x840] ss:$44 sps:$4 sm:$0xff]   ;;  %s11287_s18 = smov (!%p276_p5, %s9841_s18), 3 }
  0x67   : > { %v8487_v36 = vld [vmem:[#allocation3 + $0x31c] ss:$44 sps:$4 sm:$0xff]   ;;  %v8491_v38 = vld [vmem:[#allocation3 + $0x318] ss:$44 sps:$4 sm:$0xff]   ;;  %s8372_s24 = smul.u32 24, %s11287_s18  ;;  %s7335_s29 = sshll.u32 %s11287_s18, 2 }
  0x68   : > { %3595 = vmatpush1.bf16.msra.mxu1 %v8455_v14  ;;  %v8489_v37 = vld [vmem:[#allocation3 + $0x89c] ss:$44 sps:$4 sm:$0xff]   ;;  %v8492_v39 = vld [vmem:[#allocation3 + $0x898] ss:$44 sps:$4 sm:$0xff]   ;;  %v8493_v40 = vld [vmem:[#allocation3 + $0x374] ss:$44 sps:$4 sm:$0xff]   ;;  %s288_s30 = scalar_lea.vmem %s11268_s5, %s7335_s29 }
  0x69   : > { %3636 = vmatpush1.bf16.msra.mxu0 %v8456_v15  ;;  %3596 = vmatprep.subr.bf16.mxu1 %v8457_v16  ;;  %v8495_v41 = vld [vmem:[#allocation3 + $0x8f4] ss:$44 sps:$4 sm:$0xff]   ;;  %v8497_v42 = vld [vmem:[#allocation3 + $0x370] ss:$44 sps:$4 sm:$0xff]   ;;  %s10017_s11 = scalar_lea.vmem %s11263_s0, %s8372_s24  ;;  %v8499_v44 = vld [vmem:[#allocation3 + $0x3cc] ss:$44 sps:$4 sm:$0xff]  }
  0x6a   : > { %3637 = vmatprep.subr.bf16.mxu0 %v8459_v17  ;;  %v8498_v43 = vld [vmem:[#allocation3 + $0x8f0] ss:$44 sps:$4 sm:$0xff]   ;;  %v8501_v45 = vld [vmem:[#allocation3 + $0x94c] ss:$44 sps:$4 sm:$0xff]   ;;  %v8503_v49 = vld [vmem:[#allocation3 + $0x3c8] ss:$44 sps:$4 sm:$0xff]  }
  0x6b   : > { %v300_v46 = vld [vmem:[%s10017_s11] sm:$0xff]  ;;  %v301_v48 = vld [vmem:[%s10017_s11 + $0x8] sm:$0xff] }
  0x6c   : > { %3597 = vmatpush1.bf16.msra.mxu1 %v8461_v18  ;;  %v10020_v47 = vcombine.high %v300_v46, %v300_v46  ;;  %v8504_v50 = vld [vmem:[#allocation3 + $0x948] ss:$44 sps:$4 sm:$0xff]   ;;  %v10023_v51 = vcombine.high %v301_v48, %v301_v48  ;;  %v8505_v52 = vld [vmem:[#allocation3 + $0x424] ss:$44 sps:$4 sm:$0xff]   ;;  %v8509_v54 = vld [vmem:[#allocation3 + $0x420] ss:$44 sps:$4 sm:$0xff]   ;;  %v10027_v6 = vcombine.low %v300_v46, %v300_v46  ;;  %v10029_v7 = vcombine.low %v301_v48, %v301_v48 }
  0x6d   : > { %3638 = vmatpush1.bf16.msra.mxu0 %v8462_v19  ;;  %3598 = vmatprep.subr.bf16.mxu1 %v8463_v20  ;;  %v8507_v53 = vld [vmem:[#allocation3 + $0x9a4] ss:$44 sps:$4 sm:$0xff]   ;;  %v8510_v55 = vld [vmem:[#allocation3 + $0x9a0] ss:$44 sps:$4 sm:$0xff]   ;;  %v8511_v56 = vld [vmem:[#allocation3 + $0x47c] ss:$44 sps:$4 sm:$0xff]  }
  0x6e   : > { %3639 = vmatprep.subr.bf16.mxu0 %v8465_v21  ;;  %3620 = vmatprep.mubr.bf16.mxu1 %v10020_v47  ;;  %v8513_v57 = vld [vmem:[#allocation3 + $0x9fc] ss:$44 sps:$4 sm:$0xff]   ;;  %v8515_v58 = vld [vmem:[#allocation3 + $0x478] ss:$44 sps:$4 sm:$0xff]   ;;  %v8517_v60 = vld [vmem:[#allocation3 + $0x4d4] ss:$44 sps:$4 sm:$0xff]  }
  0x6f   : > { %3661 = vmatprep.mubr.bf16.mxu0 %v10023_v51  ;;  %v8516_v59 = vld [vmem:[#allocation3 + $0x9f8] ss:$44 sps:$4 sm:$0xff]   ;;  %v8519_v61 = vld [vmem:[#allocation3 + $0xa54] ss:$44 sps:$4 sm:$0xff]   ;;  %v8521_v62 = vld [vmem:[#allocation3 + $0x4d0] ss:$44 sps:$4 sm:$0xff]  }
  0x70   : > { %3599 = vmatpush1.bf16.msra.mxu1 %v8467_v22  ;;  %v8522_v63 = vld [vmem:[#allocation3 + $0xa50] ss:$44 sps:$4 sm:$0xff]   ;;  %v8523_v0 = vld [vmem:[#allocation3 + $0x52c] ss:$44 sps:$4 sm:$0xff]   ;;  %v8527_v2 = vld [vmem:[#allocation3 + $0x528] ss:$44 sps:$4 sm:$0xff]  }
  0x71   : > { %3640 = vmatpush1.bf16.msra.mxu0 %v8468_v23  ;;  %3600 = vmatprep.subr.bf16.mxu1 %v8469_v24  ;;  %v8525_v1 = vld [vmem:[#allocation3 + $0xaac] ss:$44 sps:$4 sm:$0xff]   ;;  %v8528_v3 = vld [vmem:[#allocation3 + $0xaa8] ss:$44 sps:$4 sm:$0xff]   ;;  %v8534_v4 = vld [vmem:[#allocation3 + $0xb04] ss:$44 sps:$4 sm:$0xff]  }
  0x72   : > { %3641 = vmatprep.subr.bf16.mxu0 %v8471_v25  ;;  %v8537_v5 = vld [vmem:[#allocation3 + $0xc] ss:$44 sps:$4 sm:$0xff]   ;;  %v8535_v9 = vld [vmem:[#allocation3 + $0x8] ss:$44 sps:$4 sm:$0xff]   ;;  %v8544_v11 = vld [vmem:[#allocation3 + $0x64] ss:$44 sps:$4 sm:$0xff]  }
  0x73   : > { %v8532_v8 = vld [vmem:[#allocation3 + $0xb00] ss:$44 sps:$4 sm:$0xff]   ;;  %v8541_v10 = vld [vmem:[#allocation3 + $0xb5c] ss:$44 sps:$4 sm:$0xff]   ;;  %v8539_v12 = vld [vmem:[#allocation3 + $0xb58] ss:$44 sps:$4 sm:$0xff]  }
  0x74   : > { %3601 = vmatpush1.bf16.msra.mxu1 %v8473_v26  ;;  %v8542_v13 = vld [vmem:[#allocation3 + $0x60] ss:$44 sps:$4 sm:$0xff]   ;;  %v8550_v15 = vld [vmem:[#allocation3 + $0xbc] ss:$44 sps:$4 sm:$0xff]   ;;  %v8548_v17 = vld [vmem:[#allocation3 + $0xb8] ss:$44 sps:$4 sm:$0xff]  }
  0x75   : > { %3642 = vmatpush1.bf16.msra.mxu0 %v8474_v27  ;;  %3602 = vmatprep.subr.bf16.mxu1 %v8475_v28  ;;  %v8547_v14 = vld [vmem:[#allocation3 + $0xbb4] ss:$44 sps:$4 sm:$0xff]   ;;  %v8545_v16 = vld [vmem:[#allocation3 + $0xbb0] ss:$44 sps:$4 sm:$0xff]   ;;  %v8553_v18 = vld [vmem:[#allocation3 + $0xc0c] ss:$44 sps:$4 sm:$0xff]  }
  0x76   : > { %3643 = vmatprep.subr.bf16.mxu0 %v8477_v29  ;;  %v8556_v19 = vld [vmem:[#allocation3 + $0x114] ss:$44 sps:$4 sm:$0xff]   ;;  %v8554_v21 = vld [vmem:[#allocation3 + $0x110] ss:$44 sps:$4 sm:$0xff]   ;;  %v8562_v23 = vld [vmem:[#allocation3 + $0x16c] ss:$44 sps:$4 sm:$0xff]  }
  0x77   : > { %v8551_v20 = vld [vmem:[#allocation3 + $0xc08] ss:$44 sps:$4 sm:$0xff]   ;;  %v8559_v22 = vld [vmem:[#allocation3 + $0xc64] ss:$44 sps:$4 sm:$0xff]   ;;  %v8557_v24 = vld [vmem:[#allocation3 + $0xc60] ss:$44 sps:$4 sm:$0xff]  }
  0x78   : > { %3603 = vmatpush1.bf16.msra.mxu1 %v8479_v30  ;;  %v8560_v25 = vld [vmem:[#allocation3 + $0x168] ss:$44 sps:$4 sm:$0xff]   ;;  %v8568_v27 = vld [vmem:[#allocation3 + $0x1c4] ss:$44 sps:$4 sm:$0xff]   ;;  %v8566_v29 = vld [vmem:[#allocation3 + $0x1c0] ss:$44 sps:$4 sm:$0xff]  }
  0x79   : > { %3644 = vmatpush1.bf16.msra.mxu0 %v8480_v31  ;;  %3604 = vmatprep.subr.bf16.mxu1 %v8481_v32  ;;  %v8565_v26 = vld [vmem:[#allocation3 + $0xcbc] ss:$44 sps:$4 sm:$0xff]   ;;  %v8563_v28 = vld [vmem:[#allocation3 + $0xcb8] ss:$44 sps:$4 sm:$0xff]   ;;  %v8571_v30 = vld [vmem:[#allocation3 + $0xd14] ss:$44 sps:$4 sm:$0xff]  }
  0x7a   : > { %3645 = vmatprep.subr.bf16.mxu0 %v8483_v33  ;;  %v8574_v31 = vld [vmem:[#allocation3 + $0x21c] ss:$44 sps:$4 sm:$0xff]   ;;  %v8587_v46 = vld [vmem:[#allocation3 + $0xe18] ss:$44 sps:$4 sm:$0xff]   ;;  %v8590_v48 = vld [vmem:[#allocation3 + $0x320] ss:$44 sps:$4 sm:$0xff]  }
  0x7b   : > { %v10035_v32 = vld [vmem:[%s10017_s11 + $0x10] sm:$0xff]  ;;  %v8569_v33 = vld [vmem:[#allocation3 + $0xd10] ss:$44 sps:$4 sm:$0xff]  }
  0x7c   : > { %3605 = vmatpush1.bf16.msra.mxu1 %v8485_v34  ;;  %v10039_v34 = vcombine.high %v10035_v32, %v10035_v32 }
  0x7d   : > { %3646 = vmatpush1.bf16.msra.mxu0 %v8486_v35  ;;  %3606 = vmatprep.subr.bf16.mxu1 %v8487_v36  ;;  %v8572_v35 = vld [vmem:[#allocation3 + $0x218] ss:$44 sps:$4 sm:$0xff]  }
  0x7e   : > { %3647 = vmatprep.subr.bf16.mxu0 %v8489_v37  ;;  %v8577_v36 = vld [vmem:[#allocation3 + $0xd6c] ss:$44 sps:$4 sm:$0xff]   ;;  %v8580_v37 = vld [vmem:[#allocation3 + $0x274] ss:$44 sps:$4 sm:$0xff]  }
  0x80   : > { %3607 = vmatpush1.bf16.msra.mxu1 %v8491_v38  ;;  %v8575_v38 = vld [vmem:[#allocation3 + $0xd68] ss:$44 sps:$4 sm:$0xff]  }
  0x81   : > { %3648 = vmatpush1.bf16.msra.mxu0 %v8492_v39  ;;  %3608 = vmatprep.subr.bf16.mxu1 %v8493_v40  ;;  %v8578_v39 = vld [vmem:[#allocation3 + $0x270] ss:$44 sps:$4 sm:$0xff]  }
  0x82   : > { %3649 = vmatprep.subr.bf16.mxu0 %v8495_v41  ;;  %v8583_v40 = vld [vmem:[#allocation3 + $0xdc4] ss:$44 sps:$4 sm:$0xff]   ;;  %v8586_v41 = vld [vmem:[#allocation3 + $0x2cc] ss:$44 sps:$4 sm:$0xff]  }
  0x84   : > { %3609 = vmatpush1.bf16.msra.mxu1 %v8497_v42  ;;  %v8581_v42 = vld [vmem:[#allocation3 + $0xdc0] ss:$44 sps:$4 sm:$0xff]  }
  0x85   : > { %3650 = vmatpush1.bf16.msra.mxu0 %v8498_v43  ;;  %3610 = vmatprep.subr.bf16.mxu1 %v8499_v44  ;;  %v8584_v43 = vld [vmem:[#allocation3 + $0x2c8] ss:$44 sps:$4 sm:$0xff]  }
  0x86   : > { %3651 = vmatprep.subr.bf16.mxu0 %v8501_v45  ;;  %v8589_v44 = vld [vmem:[#allocation3 + $0xe1c] ss:$44 sps:$4 sm:$0xff]   ;;  %v8592_v45 = vld [vmem:[#allocation3 + $0x324] ss:$44 sps:$4 sm:$0xff]  }
  0x88   : > { %3611 = vmatpush1.bf16.msra.mxu1 %v8503_v49  ;;  %v8595_v49 = vld [vmem:[#allocation3 + $0xe74] ss:$44 sps:$4 sm:$0xff]  }
  0x89   : > { %3652 = vmatpush1.bf16.msra.mxu0 %v8504_v50  ;;  %3612 = vmatprep.subr.bf16.mxu1 %v8505_v52  ;;  %v8598_v50 = vld [vmem:[#allocation3 + $0x37c] ss:$44 sps:$4 sm:$0xff]  }
  0x8a   : > { %3653 = vmatprep.subr.bf16.mxu0 %v8507_v53  ;;  %v8593_v52 = vld [vmem:[#allocation3 + $0xe70] ss:$44 sps:$4 sm:$0xff]   ;;  %v8596_v53 = vld [vmem:[#allocation3 + $0x378] ss:$44 sps:$4 sm:$0xff]  }
  0x8c   : > { %3613 = vmatpush1.bf16.msra.mxu1 %v8509_v54  ;;  %v8601_v54 = vld [vmem:[#allocation3 + $0xecc] ss:$44 sps:$4 sm:$0xff]  }
  0x8d   : > { %3654 = vmatpush1.bf16.msra.mxu0 %v8510_v55  ;;  %3614 = vmatprep.subr.bf16.mxu1 %v8511_v56  ;;  %v8604_v55 = vld [vmem:[#allocation3 + $0x3d4] ss:$44 sps:$4 sm:$0xff]  }
  0x8e   : > { %3655 = vmatprep.subr.bf16.mxu0 %v8513_v57  ;;  %v8599_v56 = vld [vmem:[#allocation3 + $0xec8] ss:$44 sps:$4 sm:$0xff]   ;;  %v8602_v57 = vld [vmem:[#allocation3 + $0x3d0] ss:$44 sps:$4 sm:$0xff]  }
  0x90   : > { %3615 = vmatpush1.bf16.msra.mxu1 %v8515_v58  ;;  %v8607_v58 = vld [vmem:[#allocation3 + $0xf24] ss:$44 sps:$4 sm:$0xff]  }
  0x91   : > { %3656 = vmatpush1.bf16.msra.mxu0 %v8516_v59  ;;  %3616 = vmatprep.subr.bf16.mxu1 %v8517_v60  ;;  %v8610_v59 = vld [vmem:[#allocation3 + $0x42c] ss:$44 sps:$4 sm:$0xff]  }
  0x92   : > { %3657 = vmatprep.subr.bf16.mxu0 %v8519_v61  ;;  %v8605_v60 = vld [vmem:[#allocation3 + $0xf20] ss:$44 sps:$4 sm:$0xff]   ;;  %v8608_v61 = vld [vmem:[#allocation3 + $0x428] ss:$44 sps:$4 sm:$0xff]  }
  0x94   : > { %3617 = vmatpush1.bf16.msra.mxu1 %v8521_v62  ;;  %v8613_v62 = vld [vmem:[#allocation3 + $0xf7c] ss:$44 sps:$4 sm:$0xff]  }
  0x95   : > { %3658 = vmatpush1.bf16.msra.mxu0 %v8522_v63  ;;  %3618 = vmatprep.subr.bf16.mxu1 %v8523_v0  ;;  %v8616_v63 = vld [vmem:[#allocation3 + $0x484] ss:$44 sps:$4 sm:$0xff]  }
  0x96   : > { %3659 = vmatprep.subr.bf16.mxu0 %v8525_v1  ;;  %v8611_v0 = vld [vmem:[#allocation3 + $0xf78] ss:$44 sps:$4 sm:$0xff]   ;;  %v8614_v1 = vld [vmem:[#allocation3 + $0x480] ss:$44 sps:$4 sm:$0xff]  }
  0x98   : > { %3619 = vmatpush1.bf16.msra.mxu1 %v8527_v2  ;;  %v8619_v2 = vld [vmem:[#allocation3 + $0xfd4] ss:$44 sps:$4 sm:$0xff]  }
  0x99   : > { %3660 = vmatpush1.bf16.msra.mxu0 %v8528_v3  ;;  %3711 = vmatprep.subr.bf16.mxu1 %v8537_v5  ;;  %v8622_v3 = vld [vmem:[#allocation3 + $0x4dc] ss:$44 sps:$4 sm:$0xff]   ;;  %v8620_v5 = vld [vmem:[#allocation3 + $0x4d8] ss:$44 sps:$4 sm:$0xff]  }
  0x9a   : > { %3670 = vmatprep.subr.bf16.mxu0 %v8534_v4  ;;  %v8617_v4 = vld [vmem:[#allocation3 + $0xfd0] ss:$44 sps:$4 sm:$0xff]  }
  0x9b   : > { %3621 = vmatmul.mubr.bf16.vlgmr.msra.gmra.mrb[0].mxu1 %v10027_v6 }
  0x9c   : > { %3662 = vmatmul.mubr.bf16.vlgmr.msra.gmra.mrb[0].mxu0 %v10029_v7  ;;  %3712 = vmatpush1.bf16.msra.mxu1 %v8535_v9  ;;  %v8628_v9 = vld [vmem:[#allocation3 + $0x534] ss:$44 sps:$4 sm:$0xff]  }
  0x9d   : > { %3671 = vmatpush1.bf16.msra.mxu0 %v8532_v8  ;;  %3713 = vmatprep.subr.bf16.mxu1 %v8544_v11  ;;  %v8625_v8 = vld [vmem:[#allocation3 + $0x102c] ss:$44 sps:$4 sm:$0xff]   ;;  %v8626_v11 = vld [vmem:[#allocation3 + $0x530] ss:$44 sps:$4 sm:$0xff]  }
  0x9e   : > { %3672 = vmatprep.subr.bf16.mxu0 %v8541_v10  ;;  %3743 = vmatprep.mubr.bf16.mxu1 %v10020_v47  ;;  %v8623_v10 = vld [vmem:[#allocation3 + $0x1028] ss:$44 sps:$4 sm:$0xff]  }
  0x9f   : > { %3702 = vmatprep.mubr.bf16.mxu0 %v10039_v34 }
  0xa0   : > { %3714 = vmatpush1.bf16.msra.mxu1 %v8542_v13  ;;  %v8636_v13 = vld [vmem:[#allocation3 + $0x14] ss:$44 sps:$4 sm:$0xff]  }
  0xa1   : > { %3673 = vmatpush1.bf16.msra.mxu0 %v8539_v12  ;;  %3715 = vmatprep.subr.bf16.mxu1 %v8550_v15  ;;  %v8633_v12 = vld [vmem:[#allocation3 + $0x58c] ss:$44 sps:$4 sm:$0xff]   ;;  %v8631_v15 = vld [vmem:[#allocation3 + $0x588] ss:$44 sps:$4 sm:$0xff]  }
  0xa2   : > { %3674 = vmatprep.subr.bf16.mxu0 %v8547_v14  ;;  %v10044_v14 = vcombine.low %v10035_v32, %v10035_v32  ;;  %v8658_v32 = vld [vmem:[#allocation3 + $0x170] ss:$44 sps:$4 sm:$0xff]  }
  0xa4   : > { %3716 = vmatpush1.bf16.msra.mxu1 %v8548_v17  ;;  %v8639_v17 = vld [vmem:[#allocation3 + $0x5e4] ss:$44 sps:$4 sm:$0xff]  }
  0xa5   : > { %3675 = vmatpush1.bf16.msra.mxu0 %v8545_v16  ;;  %3717 = vmatprep.subr.bf16.mxu1 %v8556_v19  ;;  %v8634_v16 = vld [vmem:[#allocation3 + $0x10] ss:$44 sps:$4 sm:$0xff]   ;;  %v8637_v19 = vld [vmem:[#allocation3 + $0x5e0] ss:$44 sps:$4 sm:$0xff]  }
  0xa6   : > { %3676 = vmatprep.subr.bf16.mxu0 %v8553_v18  ;;  %v8642_v18 = vld [vmem:[#allocation3 + $0x6c] ss:$44 sps:$4 sm:$0xff]  }
  0xa8   : > { %3718 = vmatpush1.bf16.msra.mxu1 %v8554_v21  ;;  %v8645_v21 = vld [vmem:[#allocation3 + $0x63c] ss:$44 sps:$4 sm:$0xff]  }
  0xa9   : > { %3677 = vmatpush1.bf16.msra.mxu0 %v8551_v20  ;;  %3719 = vmatprep.subr.bf16.mxu1 %v8562_v23  ;;  %v8640_v20 = vld [vmem:[#allocation3 + $0x68] ss:$44 sps:$4 sm:$0xff]   ;;  %v8643_v23 = vld [vmem:[#allocation3 + $0x638] ss:$44 sps:$4 sm:$0xff]  }
  0xaa   : > { %3678 = vmatprep.subr.bf16.mxu0 %v8559_v22  ;;  %v8648_v22 = vld [vmem:[#allocation3 + $0xc4] ss:$44 sps:$4 sm:$0xff]  }
  0xac   : > { %3720 = vmatpush1.bf16.msra.mxu1 %v8560_v25  ;;  %v8651_v25 = vld [vmem:[#allocation3 + $0x694] ss:$44 sps:$4 sm:$0xff]  }
  0xad   : > { %3679 = vmatpush1.bf16.msra.mxu0 %v8557_v24  ;;  %3721 = vmatprep.subr.bf16.mxu1 %v8568_v27  ;;  %v8646_v24 = vld [vmem:[#allocation3 + $0xc0] ss:$44 sps:$4 sm:$0xff]   ;;  %v8649_v27 = vld [vmem:[#allocation3 + $0x690] ss:$44 sps:$4 sm:$0xff]  }
  0xae   : > { %3680 = vmatprep.subr.bf16.mxu0 %v8565_v26  ;;  %v8654_v26 = vld [vmem:[#allocation3 + $0x11c] ss:$44 sps:$4 sm:$0xff]  }
  0xb0   : > { %3722 = vmatpush1.bf16.msra.mxu1 %v8566_v29  ;;  %v8657_v29 = vld [vmem:[#allocation3 + $0x6ec] ss:$44 sps:$4 sm:$0xff]  }
  0xb1   : > { %3681 = vmatpush1.bf16.msra.mxu0 %v8563_v28  ;;  %3723 = vmatprep.subr.bf16.mxu1 %v8574_v31  ;;  %v8652_v28 = vld [vmem:[#allocation3 + $0x118] ss:$44 sps:$4 sm:$0xff]   ;;  %v8655_v31 = vld [vmem:[#allocation3 + $0x6e8] ss:$44 sps:$4 sm:$0xff]  }
  0xb2   : > { %3682 = vmatprep.subr.bf16.mxu0 %v8571_v30  ;;  %v8660_v30 = vld [vmem:[#allocation3 + $0x174] ss:$44 sps:$4 sm:$0xff]  }
  0xb4   : > { %3724 = vmatpush1.bf16.msra.mxu1 %v8572_v35  ;;  %v8666_v35 = vld [vmem:[#allocation3 + $0x1cc] ss:$44 sps:$4 sm:$0xff]  }
  0xb5   : > { %3683 = vmatpush1.bf16.msra.mxu0 %v8569_v33  ;;  %3725 = vmatprep.subr.bf16.mxu1 %v8580_v37  ;;  %v8663_v33 = vld [vmem:[#allocation3 + $0x744] ss:$44 sps:$4 sm:$0xff]   ;;  %v8664_v37 = vld [vmem:[#allocation3 + $0x1c8] ss:$44 sps:$4 sm:$0xff]  }
  0xb6   : > { %3684 = vmatprep.subr.bf16.mxu0 %v8577_v36  ;;  %v8661_v36 = vld [vmem:[#allocation3 + $0x740] ss:$44 sps:$4 sm:$0xff]  }
  0xb8   : > { %3726 = vmatpush1.bf16.msra.mxu1 %v8578_v39  ;;  %v8672_v39 = vld [vmem:[#allocation3 + $0x224] ss:$44 sps:$4 sm:$0xff]  }
  0xb9   : > { %3685 = vmatpush1.bf16.msra.mxu0 %v8575_v38  ;;  %3727 = vmatprep.subr.bf16.mxu1 %v8586_v41  ;;  %v8669_v38 = vld [vmem:[#allocation3 + $0x79c] ss:$44 sps:$4 sm:$0xff]   ;;  %v8670_v41 = vld [vmem:[#allocation3 + $0x220] ss:$44 sps:$4 sm:$0xff]  }
  0xba   : > { %3686 = vmatprep.subr.bf16.mxu0 %v8583_v40  ;;  %v8667_v40 = vld [vmem:[#allocation3 + $0x798] ss:$44 sps:$4 sm:$0xff]  }
  0xbc   : > { %3728 = vmatpush1.bf16.msra.mxu1 %v8584_v43  ;;  %v8678_v43 = vld [vmem:[#allocation3 + $0x27c] ss:$44 sps:$4 sm:$0xff]  }
  0xbd   : > { %3687 = vmatpush1.bf16.msra.mxu0 %v8581_v42  ;;  %3729 = vmatprep.subr.bf16.mxu1 %v8592_v45  ;;  %v8675_v42 = vld [vmem:[#allocation3 + $0x7f4] ss:$44 sps:$4 sm:$0xff]   ;;  %v8676_v45 = vld [vmem:[#allocation3 + $0x278] ss:$44 sps:$4 sm:$0xff]  }
  0xbe   : > { %3688 = vmatprep.subr.bf16.mxu0 %v8589_v44  ;;  %v8673_v44 = vld [vmem:[#allocation3 + $0x7f0] ss:$44 sps:$4 sm:$0xff]  }
  0xc0   : > { %3730 = vmatpush1.bf16.msra.mxu1 %v8590_v48  ;;  %v8684_v48 = vld [vmem:[#allocation3 + $0x2d4] ss:$44 sps:$4 sm:$0xff]  }
  0xc1   : > { %3689 = vmatpush1.bf16.msra.mxu0 %v8587_v46  ;;  %3731 = vmatprep.subr.bf16.mxu1 %v8598_v50  ;;  %v8681_v46 = vld [vmem:[#allocation3 + $0x84c] ss:$44 sps:$4 sm:$0xff]   ;;  %v8682_v50 = vld [vmem:[#allocation3 + $0x2d0] ss:$44 sps:$4 sm:$0xff]  }
  0xc2   : > { %3690 = vmatprep.subr.bf16.mxu0 %v8595_v49  ;;  %v8679_v49 = vld [vmem:[#allocation3 + $0x848] ss:$44 sps:$4 sm:$0xff]  }
  0xc4   : > { %3732 = vmatpush1.bf16.msra.mxu1 %v8596_v53  ;;  %v8690_v53 = vld [vmem:[#allocation3 + $0x32c] ss:$44 sps:$4 sm:$0xff]  }
  0xc5   : > { %3691 = vmatpush1.bf16.msra.mxu0 %v8593_v52  ;;  %3733 = vmatprep.subr.bf16.mxu1 %v8604_v55  ;;  %v8687_v52 = vld [vmem:[#allocation3 + $0x8a4] ss:$44 sps:$4 sm:$0xff]   ;;  %v8688_v55 = vld [vmem:[#allocation3 + $0x328] ss:$44 sps:$4 sm:$0xff]  }
  0xc6   : > { %3692 = vmatprep.subr.bf16.mxu0 %v8601_v54  ;;  %v8685_v54 = vld [vmem:[#allocation3 + $0x8a0] ss:$44 sps:$4 sm:$0xff]  }
  0xc8   : > { %3734 = vmatpush1.bf16.msra.mxu1 %v8602_v57  ;;  %v8696_v57 = vld [vmem:[#allocation3 + $0x384] ss:$44 sps:$4 sm:$0xff]  }
  0xc9   : > { %3693 = vmatpush1.bf16.msra.mxu0 %v8599_v56  ;;  %3735 = vmatprep.subr.bf16.mxu1 %v8610_v59  ;;  %v8693_v56 = vld [vmem:[#allocation3 + $0x8fc] ss:$44 sps:$4 sm:$0xff]   ;;  %v8694_v59 = vld [vmem:[#allocation3 + $0x380] ss:$44 sps:$4 sm:$0xff]  }
  0xca   : > { %3694 = vmatprep.subr.bf16.mxu0 %v8607_v58  ;;  %v8691_v58 = vld [vmem:[#allocation3 + $0x8f8] ss:$44 sps:$4 sm:$0xff]  }
  0xcc   : > { %3736 = vmatpush1.bf16.msra.mxu1 %v8608_v61  ;;  %v8702_v61 = vld [vmem:[#allocation3 + $0x3dc] ss:$44 sps:$4 sm:$0xff]  }
  0xcd   : > { %3695 = vmatpush1.bf16.msra.mxu0 %v8605_v60  ;;  %3737 = vmatprep.subr.bf16.mxu1 %v8616_v63  ;;  %v8699_v60 = vld [vmem:[#allocation3 + $0x954] ss:$44 sps:$4 sm:$0xff]   ;;  %v8700_v63 = vld [vmem:[#allocation3 + $0x3d8] ss:$44 sps:$4 sm:$0xff]  }
  0xce   : > { %3696 = vmatprep.subr.bf16.mxu0 %v8613_v62  ;;  %v8697_v62 = vld [vmem:[#allocation3 + $0x950] ss:$44 sps:$4 sm:$0xff]  }
  0xd0   : > { %3738 = vmatpush1.bf16.msra.mxu1 %v8614_v1  ;;  %v8708_v1 = vld [vmem:[#allocation3 + $0x434] ss:$44 sps:$4 sm:$0xff]  }
  0xd1   : > { %3697 = vmatpush1.bf16.msra.mxu0 %v8611_v0  ;;  %3739 = vmatprep.subr.bf16.mxu1 %v8622_v3  ;;  %v8705_v0 = vld [vmem:[#allocation3 + $0x9ac] ss:$44 sps:$4 sm:$0xff]   ;;  %v8706_v3 = vld [vmem:[#allocation3 + $0x430] ss:$44 sps:$4 sm:$0xff]  }
  0xd2   : > { %3698 = vmatprep.subr.bf16.mxu0 %v8619_v2  ;;  %v8703_v2 = vld [vmem:[#allocation3 + $0x9a8] ss:$44 sps:$4 sm:$0xff]  }
  0xd4   : > { %3740 = vmatpush1.bf16.msra.mxu1 %v8620_v5  ;;  %v8714_v5 = vld [vmem:[#allocation3 + $0x48c] ss:$44 sps:$4 sm:$0xff]  }
  0xd5   : > { %3699 = vmatpush1.bf16.msra.mxu0 %v8617_v4  ;;  %3741 = vmatprep.subr.bf16.mxu1 %v8628_v9  ;;  %v8711_v4 = vld [vmem:[#allocation3 + $0xa04] ss:$44 sps:$4 sm:$0xff]   ;;  %v8712_v9 = vld [vmem:[#allocation3 + $0x488] ss:$44 sps:$4 sm:$0xff]  }
  0xd6   : > { %3700 = vmatprep.subr.bf16.mxu0 %v8625_v8  ;;  %v8709_v8 = vld [vmem:[#allocation3 + $0xa00] ss:$44 sps:$4 sm:$0xff]  }
  0xd8   : > { %3742 = vmatpush1.bf16.msra.mxu1 %v8626_v11  ;;  %v8720_v11 = vld [vmem:[#allocation3 + $0x4e4] ss:$44 sps:$4 sm:$0xff]  }
  0xd9   : > { %3701 = vmatpush1.bf16.msra.mxu0 %v8623_v10  ;;  %3752 = vmatprep.subr.bf16.mxu1 %v8633_v12  ;;  %v8717_v10 = vld [vmem:[#allocation3 + $0xa5c] ss:$44 sps:$4 sm:$0xff]   ;;  %v8715_v12 = vld [vmem:[#allocation3 + $0xa58] ss:$44 sps:$4 sm:$0xff]  }
  0xda   : > { %3834 = vmatprep.subr.bf16.mxu0 %v8636_v13  ;;  %v8718_v13 = vld [vmem:[#allocation3 + $0x4e0] ss:$44 sps:$4 sm:$0xff]  }
  0xdb   : > { %3744 = vmatmul.mubr.bf16.vlgmr.msra.gmra.mrb[4].mxu1 %v10027_v6 }
  0xdc   : > { %3703 = vmatmul.mubr.bf16.vlgmr.msra.gmra.mrb[0].mxu0 %v10044_v14  ;;  %3753 = vmatpush1.bf16.msra.mxu1 %v8631_v15  ;;  %v8723_v15 = vld [vmem:[#allocation3 + $0xab4] ss:$44 sps:$4 sm:$0xff]  }
  0xdd   : > { %3835 = vmatpush1.bf16.msra.mxu0 %v8634_v16  ;;  %3754 = vmatprep.subr.bf16.mxu1 %v8639_v17  ;;  %v8726_v16 = vld [vmem:[#allocation3 + $0x53c] ss:$44 sps:$4 sm:$0xff]  }
  0xde   : > { %3836 = vmatprep.subr.bf16.mxu0 %v8642_v18  ;;  %3784 = vmatprep.mubr.bf16.mxu1 %v10023_v51  ;;  %v8721_v17 = vld [vmem:[#allocation3 + $0xab0] ss:$44 sps:$4 sm:$0xff]   ;;  %v8724_v18 = vld [vmem:[#allocation3 + $0x538] ss:$44 sps:$4 sm:$0xff]  }
  0xdf   : > { %3866 = vmatprep.mubr.bf16.mxu0 %v10020_v47 }
  0xe0   : > { %3755 = vmatpush1.bf16.msra.mxu1 %v8637_v19  ;;  %v8729_v19 = vld [vmem:[#allocation3 + $0xb0c] ss:$44 sps:$4 sm:$0xff]  }
  0xe1   : > { %3837 = vmatpush1.bf16.msra.mxu0 %v8640_v20  ;;  %3756 = vmatprep.subr.bf16.mxu1 %v8645_v21  ;;  %v8732_v20 = vld [vmem:[#allocation3 + $0x594] ss:$44 sps:$4 sm:$0xff]  }
  0xe2   : > { %3838 = vmatprep.subr.bf16.mxu0 %v8648_v22  ;;  %v8727_v21 = vld [vmem:[#allocation3 + $0xb08] ss:$44 sps:$4 sm:$0xff]   ;;  %v8730_v22 = vld [vmem:[#allocation3 + $0x590] ss:$44 sps:$4 sm:$0xff]  }
  0xe4   : > { %3757 = vmatpush1.bf16.msra.mxu1 %v8643_v23  ;;  %v8735_v23 = vld [vmem:[#allocation3 + $0xb64] ss:$44 sps:$4 sm:$0xff]  }
  0xe5   : > { %3839 = vmatpush1.bf16.msra.mxu0 %v8646_v24  ;;  %3758 = vmatprep.subr.bf16.mxu1 %v8651_v25  ;;  %v8738_v24 = vld [vmem:[#allocation3 + $0x5ec] ss:$44 sps:$4 sm:$0xff]  }
  0xe6   : > { %3840 = vmatprep.subr.bf16.mxu0 %v8654_v26  ;;  %v8733_v25 = vld [vmem:[#allocation3 + $0xb60] ss:$44 sps:$4 sm:$0xff]   ;;  %v8736_v26 = vld [vmem:[#allocation3 + $0x5e8] ss:$44 sps:$4 sm:$0xff]  }
  0xe8   : > { %3759 = vmatpush1.bf16.msra.mxu1 %v8649_v27  ;;  %v8741_v27 = vld [vmem:[#allocation3 + $0xbbc] ss:$44 sps:$4 sm:$0xff]  }
  0xe9   : > { %3841 = vmatpush1.bf16.msra.mxu0 %v8652_v28  ;;  %3760 = vmatprep.subr.bf16.mxu1 %v8657_v29  ;;  %v8744_v28 = vld [vmem:[#allocation3 + $0x644] ss:$44 sps:$4 sm:$0xff]  }
  0xea   : > { %3842 = vmatprep.subr.bf16.mxu0 %v8660_v30  ;;  %v8739_v29 = vld [vmem:[#allocation3 + $0xbb8] ss:$44 sps:$4 sm:$0xff]   ;;  %v8742_v30 = vld [vmem:[#allocation3 + $0x640] ss:$44 sps:$4 sm:$0xff]  }
  0xec   : > { %3761 = vmatpush1.bf16.msra.mxu1 %v8655_v31  ;;  %v8747_v31 = vld [vmem:[#allocation3 + $0xc14] ss:$44 sps:$4 sm:$0xff]  }
  0xed   : > { %3843 = vmatpush1.bf16.msra.mxu0 %v8658_v32  ;;  %3762 = vmatprep.subr.bf16.mxu1 %v8663_v33  ;;  %v8750_v32 = vld [vmem:[#allocation3 + $0x69c] ss:$44 sps:$4 sm:$0xff]  }
  0xee   : > { %3844 = vmatprep.subr.bf16.mxu0 %v8666_v35  ;;  %v8745_v33 = vld [vmem:[#allocation3 + $0xc10] ss:$44 sps:$4 sm:$0xff]   ;;  %v8748_v35 = vld [vmem:[#allocation3 + $0x698] ss:$44 sps:$4 sm:$0xff]  }
  0xf0   : > { %3763 = vmatpush1.bf16.msra.mxu1 %v8661_v36  ;;  %v8753_v36 = vld [vmem:[#allocation3 + $0xc6c] ss:$44 sps:$4 sm:$0xff]  }
  0xf1   : > { %3845 = vmatpush1.bf16.msra.mxu0 %v8664_v37  ;;  %3764 = vmatprep.subr.bf16.mxu1 %v8669_v38  ;;  %v8756_v37 = vld [vmem:[#allocation3 + $0x6f4] ss:$44 sps:$4 sm:$0xff]  }
  0xf2   : > { %3846 = vmatprep.subr.bf16.mxu0 %v8672_v39  ;;  %v8751_v38 = vld [vmem:[#allocation3 + $0xc68] ss:$44 sps:$4 sm:$0xff]   ;;  %v8754_v39 = vld [vmem:[#allocation3 + $0x6f0] ss:$44 sps:$4 sm:$0xff]  }
  0xf4   : > { %3765 = vmatpush1.bf16.msra.mxu1 %v8667_v40  ;;  %v8759_v40 = vld [vmem:[#allocation3 + $0xcc4] ss:$44 sps:$4 sm:$0xff]  }
  0xf5   : > { %3847 = vmatpush1.bf16.msra.mxu0 %v8670_v41  ;;  %3766 = vmatprep.subr.bf16.mxu1 %v8675_v42  ;;  %v8762_v41 = vld [vmem:[#allocation3 + $0x74c] ss:$44 sps:$4 sm:$0xff]  }
  0xf6   : > { %3848 = vmatprep.subr.bf16.mxu0 %v8678_v43  ;;  %v8757_v42 = vld [vmem:[#allocation3 + $0xcc0] ss:$44 sps:$4 sm:$0xff]   ;;  %v8760_v43 = vld [vmem:[#allocation3 + $0x748] ss:$44 sps:$4 sm:$0xff]  }
  0xf8   : > { %3767 = vmatpush1.bf16.msra.mxu1 %v8673_v44  ;;  %v8765_v44 = vld [vmem:[#allocation3 + $0xd1c] ss:$44 sps:$4 sm:$0xff]  }
  0xf9   : > { %3849 = vmatpush1.bf16.msra.mxu0 %v8676_v45  ;;  %3768 = vmatprep.subr.bf16.mxu1 %v8681_v46  ;;  %v8768_v45 = vld [vmem:[#allocation3 + $0x7a4] ss:$44 sps:$4 sm:$0xff]  }
  0xfa   : > { %3850 = vmatprep.subr.bf16.mxu0 %v8684_v48  ;;  %v8763_v46 = vld [vmem:[#allocation3 + $0xd18] ss:$44 sps:$4 sm:$0xff]   ;;  %v8766_v48 = vld [vmem:[#allocation3 + $0x7a0] ss:$44 sps:$4 sm:$0xff]  }
  0xfc   : > { %3769 = vmatpush1.bf16.msra.mxu1 %v8679_v49  ;;  %v8771_v49 = vld [vmem:[#allocation3 + $0xd74] ss:$44 sps:$4 sm:$0xff]  }
  0xfd   : > { %3851 = vmatpush1.bf16.msra.mxu0 %v8682_v50  ;;  %3770 = vmatprep.subr.bf16.mxu1 %v8687_v52  ;;  %v8774_v50 = vld [vmem:[#allocation3 + $0x7fc] ss:$44 sps:$4 sm:$0xff]  }
  0xfe   : > { %3852 = vmatprep.subr.bf16.mxu0 %v8690_v53  ;;  %v8769_v52 = vld [vmem:[#allocation3 + $0xd70] ss:$44 sps:$4 sm:$0xff]   ;;  %v8772_v53 = vld [vmem:[#allocation3 + $0x7f8] ss:$44 sps:$4 sm:$0xff]  }
 0x100   : > { %3771 = vmatpush1.bf16.msra.mxu1 %v8685_v54  ;;  %v8777_v54 = vld [vmem:[#allocation3 + $0xdcc] ss:$44 sps:$4 sm:$0xff]  }
 0x101   : > { %3853 = vmatpush1.bf16.msra.mxu0 %v8688_v55  ;;  %3772 = vmatprep.subr.bf16.mxu1 %v8693_v56  ;;  %v8780_v55 = vld [vmem:[#allocation3 + $0x854] ss:$44 sps:$4 sm:$0xff]  }
 0x102   : > { %3854 = vmatprep.subr.bf16.mxu0 %v8696_v57  ;;  %v8775_v56 = vld [vmem:[#allocation3 + $0xdc8] ss:$44 sps:$4 sm:$0xff]   ;;  %v8778_v57 = vld [vmem:[#allocation3 + $0x850] ss:$44 sps:$4 sm:$0xff]  }
 0x104   : > { %3773 = vmatpush1.bf16.msra.mxu1 %v8691_v58  ;;  %v8783_v58 = vld [vmem:[#allocation3 + $0xe24] ss:$44 sps:$4 sm:$0xff]  }
 0x105   : > { %3855 = vmatpush1.bf16.msra.mxu0 %v8694_v59  ;;  %3774 = vmatprep.subr.bf16.mxu1 %v8699_v60  ;;  %v8786_v59 = vld [vmem:[#allocation3 + $0x8ac] ss:$44 sps:$4 sm:$0xff]  }
 0x106   : > { %3856 = vmatprep.subr.bf16.mxu0 %v8702_v61  ;;  %v8781_v60 = vld [vmem:[#allocation3 + $0xe20] ss:$44 sps:$4 sm:$0xff]   ;;  %v8784_v61 = vld [vmem:[#allocation3 + $0x8a8] ss:$44 sps:$4 sm:$0xff]  }
 0x108   : > { %3775 = vmatpush1.bf16.msra.mxu1 %v8697_v62  ;;  %v8789_v62 = vld [vmem:[#allocation3 + $0xe7c] ss:$44 sps:$4 sm:$0xff]  }
 0x109   : > { %3857 = vmatpush1.bf16.msra.mxu0 %v8700_v63  ;;  %3776 = vmatprep.subr.bf16.mxu1 %v8705_v0  ;;  %v8792_v63 = vld [vmem:[#allocation3 + $0x904] ss:$44 sps:$4 sm:$0xff]  }
 0x10a   : > { %3858 = vmatprep.subr.bf16.mxu0 %v8708_v1  ;;  %v8787_v0 = vld [vmem:[#allocation3 + $0xe78] ss:$44 sps:$4 sm:$0xff]   ;;  %v8790_v1 = vld [vmem:[#allocation3 + $0x900] ss:$44 sps:$4 sm:$0xff]  }
 0x10c   : > { %3777 = vmatpush1.bf16.msra.mxu1 %v8703_v2  ;;  %v8795_v2 = vld [vmem:[#allocation3 + $0xed4] ss:$44 sps:$4 sm:$0xff]  }
 0x10d   : > { %3859 = vmatpush1.bf16.msra.mxu0 %v8706_v3  ;;  %3778 = vmatprep.subr.bf16.mxu1 %v8711_v4  ;;  %v8798_v3 = vld [vmem:[#allocation3 + $0x95c] ss:$44 sps:$4 sm:$0xff]  }
 0x10e   : > { %3860 = vmatprep.subr.bf16.mxu0 %v8714_v5  ;;  %v8793_v4 = vld [vmem:[#allocation3 + $0xed0] ss:$44 sps:$4 sm:$0xff]   ;;  %v8796_v5 = vld [vmem:[#allocation3 + $0x958] ss:$44 sps:$4 sm:$0xff]  }
 0x110   : > { %3779 = vmatpush1.bf16.msra.mxu1 %v8709_v8  ;;  %v8801_v8 = vld [vmem:[#allocation3 + $0xf2c] ss:$44 sps:$4 sm:$0xff]  }
 0x111   : > { %3861 = vmatpush1.bf16.msra.mxu0 %v8712_v9  ;;  %3780 = vmatprep.subr.bf16.mxu1 %v8717_v10  ;;  %v8804_v9 = vld [vmem:[#allocation3 + $0x9b4] ss:$44 sps:$4 sm:$0xff]  }
 0x112   : > { %3862 = vmatprep.subr.bf16.mxu0 %v8720_v11  ;;  %v8799_v10 = vld [vmem:[#allocation3 + $0xf28] ss:$44 sps:$4 sm:$0xff]   ;;  %v8802_v11 = vld [vmem:[#allocation3 + $0x9b0] ss:$44 sps:$4 sm:$0xff]  }
 0x114   : > { %3781 = vmatpush1.bf16.msra.mxu1 %v8715_v12  ;;  %v8807_v12 = vld [vmem:[#allocation3 + $0xf84] ss:$44 sps:$4 sm:$0xff]  }
 0x115   : > { %3863 = vmatpush1.bf16.msra.mxu0 %v8718_v13  ;;  %3782 = vmatprep.subr.bf16.mxu1 %v8723_v15  ;;  %v8810_v13 = vld [vmem:[#allocation3 + $0xa0c] ss:$44 sps:$4 sm:$0xff]  }
 0x116   : > { %3864 = vmatprep.subr.bf16.mxu0 %v8726_v16  ;;  %v8805_v15 = vld [vmem:[#allocation3 + $0xf80] ss:$44 sps:$4 sm:$0xff]   ;;  %v8808_v16 = vld [vmem:[#allocation3 + $0xa08] ss:$44 sps:$4 sm:$0xff]  }
 0x118   : > { %3783 = vmatpush1.bf16.msra.mxu1 %v8721_v17  ;;  %v8813_v17 = vld [vmem:[#allocation3 + $0xfdc] ss:$44 sps:$4 sm:$0xff]  }
 0x119   : > { %3865 = vmatpush1.bf16.msra.mxu0 %v8724_v18  ;;  %3793 = vmatprep.subr.bf16.mxu1 %v8729_v19  ;;  %v8816_v18 = vld [vmem:[#allocation3 + $0xa64] ss:$44 sps:$4 sm:$0xff]  }
 0x11a   : > { %3875 = vmatprep.subr.bf16.mxu0 %v8732_v20  ;;  %v8811_v19 = vld [vmem:[#allocation3 + $0xfd8] ss:$44 sps:$4 sm:$0xff]   ;;  %v8814_v20 = vld [vmem:[#allocation3 + $0xa60] ss:$44 sps:$4 sm:$0xff]  }
 0x11b   : > { %3785 = vmatmul.mubr.bf16.vlgmr.msra.gmra.mrb[4].mxu1 %v10029_v7 }
 0x11c   : > { %3867 = vmatmul.mubr.bf16.vlgmr.msra.gmra.mrb[4].mxu0 %v10027_v6  ;;  %3794 = vmatpush1.bf16.msra.mxu1 %v8727_v21  ;;  %v8819_v21 = vld [vmem:[#allocation3 + $0x1034] ss:$44 sps:$4 sm:$0xff]  }
 0x11d   : > { %3876 = vmatpush1.bf16.msra.mxu0 %v8730_v22  ;;  %3795 = vmatprep.subr.bf16.mxu1 %v8735_v23  ;;  %v8822_v22 = vld [vmem:[#allocation3 + $0xabc] ss:$44 sps:$4 sm:$0xff]  }
 0x11e   : > { %3877 = vmatprep.subr.bf16.mxu0 %v8738_v24  ;;  %3825 = vmatprep.mubr.bf16.mxu1 %v10039_v34  ;;  %v8817_v23 = vld [vmem:[#allocation3 + $0x1030] ss:$44 sps:$4 sm:$0xff]   ;;  %v8820_v24 = vld [vmem:[#allocation3 + $0xab8] ss:$44 sps:$4 sm:$0xff]  }
 0x11f   : > { %3907 = vmatprep.mubr.bf16.mxu0 %v10023_v51 }
 0x120   : > { %3796 = vmatpush1.bf16.msra.mxu1 %v8733_v25  ;;  %v8825_v25 = vld [vmem:[#allocation3 + $0xb14] ss:$44 sps:$4 sm:$0xff]  }
 0x121   : > { %3878 = vmatpush1.bf16.msra.mxu0 %v8736_v26  ;;  %3797 = vmatprep.subr.bf16.mxu1 %v8741_v27  ;;  %v8828_v26 = vld [vmem:[#allocation3 + $0x1c] ss:$44 sps:$4 sm:$0xff]  }
 0x122   : > { %3879 = vmatprep.subr.bf16.mxu0 %v8744_v28  ;;  %v8823_v27 = vld [vmem:[#allocation3 + $0xb10] ss:$44 sps:$4 sm:$0xff]   ;;  %v8826_v28 = vld [vmem:[#allocation3 + $0x18] ss:$44 sps:$4 sm:$0xff]  }
 0x124   : > { %3798 = vmatpush1.bf16.msra.mxu1 %v8739_v29  ;;  %v8831_v29 = vld [vmem:[#allocation3 + $0xb6c] ss:$44 sps:$4 sm:$0xff]  }
 0x125   : > { %3880 = vmatpush1.bf16.msra.mxu0 %v8742_v30  ;;  %3799 = vmatprep.subr.bf16.mxu1 %v8747_v31  ;;  %v8834_v30 = vld [vmem:[#allocation3 + $0x74] ss:$44 sps:$4 sm:$0xff]  }
 0x126   : > { %3881 = vmatprep.subr.bf16.mxu0 %v8750_v32  ;;  %v8829_v31 = vld [vmem:[#allocation3 + $0xb68] ss:$44 sps:$4 sm:$0xff]   ;;  %v8832_v32 = vld [vmem:[#allocation3 + $0x70] ss:$44 sps:$4 sm:$0xff]  }
 0x128   : > { %3800 = vmatpush1.bf16.msra.mxu1 %v8745_v33  ;;  %v8837_v33 = vld [vmem:[#allocation3 + $0xbc4] ss:$44 sps:$4 sm:$0xff]  }
 0x129   : > { %3882 = vmatpush1.bf16.msra.mxu0 %v8748_v35  ;;  %3801 = vmatprep.subr.bf16.mxu1 %v8753_v36  ;;  %v8840_v35 = vld [vmem:[#allocation3 + $0xcc] ss:$44 sps:$4 sm:$0xff]  }
 0x12a   : > { %3883 = vmatprep.subr.bf16.mxu0 %v8756_v37  ;;  %v8835_v36 = vld [vmem:[#allocation3 + $0xbc0] ss:$44 sps:$4 sm:$0xff]   ;;  %v8838_v37 = vld [vmem:[#allocation3 + $0xc8] ss:$44 sps:$4 sm:$0xff]  }
 0x12c   : > { %3802 = vmatpush1.bf16.msra.mxu1 %v8751_v38  ;;  %v8843_v38 = vld [vmem:[#allocation3 + $0xc1c] ss:$44 sps:$4 sm:$0xff]  }
 0x12d   : > { %3884 = vmatpush1.bf16.msra.mxu0 %v8754_v39  ;;  %3803 = vmatprep.subr.bf16.mxu1 %v8759_v40  ;;  %v8846_v39 = vld [vmem:[#allocation3 + $0x124] ss:$44 sps:$4 sm:$0xff]  }
 0x12e   : > { %3885 = vmatprep.subr.bf16.mxu0 %v8762_v41  ;;  %v8841_v40 = vld [vmem:[#allocation3 + $0xc18] ss:$44 sps:$4 sm:$0xff]   ;;  %v8844_v41 = vld [vmem:[#allocation3 + $0x120] ss:$44 sps:$4 sm:$0xff]  }
 0x130   : > { %3804 = vmatpush1.bf16.msra.mxu1 %v8757_v42  ;;  %v8849_v42 = vld [vmem:[#allocation3 + $0xc74] ss:$44 sps:$4 sm:$0xff]  }
 0x131   : > { %3886 = vmatpush1.bf16.msra.mxu0 %v8760_v43  ;;  %3805 = vmatprep.subr.bf16.mxu1 %v8765_v44  ;;  %v8852_v43 = vld [vmem:[#allocation3 + $0x17c] ss:$44 sps:$4 sm:$0xff]  }
 0x132   : > { %3887 = vmatprep.subr.bf16.mxu0 %v8768_v45  ;;  %v8847_v44 = vld [vmem:[#allocation3 + $0xc70] ss:$44 sps:$4 sm:$0xff]   ;;  %v8850_v45 = vld [vmem:[#allocation3 + $0x178] ss:$44 sps:$4 sm:$0xff]  }
 0x134   : > { %3806 = vmatpush1.bf16.msra.mxu1 %v8763_v46  ;;  %v8855_v46 = vld [vmem:[#allocation3 + $0xccc] ss:$44 sps:$4 sm:$0xff]  }
 0x135   : > { %3888 = vmatpush1.bf16.msra.mxu0 %v8766_v48  ;;  %3807 = vmatprep.subr.bf16.mxu1 %v8771_v49  ;;  %v8858_v48 = vld [vmem:[#allocation3 + $0x1d4] ss:$44 sps:$4 sm:$0xff]  }
 0x136   : > { %3889 = vmatprep.subr.bf16.mxu0 %v8774_v50  ;;  %v8853_v49 = vld [vmem:[#allocation3 + $0xcc8] ss:$44 sps:$4 sm:$0xff]   ;;  %v8856_v50 = vld [vmem:[#allocation3 + $0x1d0] ss:$44 sps:$4 sm:$0xff]  }
 0x138   : > { %3808 = vmatpush1.bf16.msra.mxu1 %v8769_v52  ;;  %v8861_v52 = vld [vmem:[#allocation3 + $0xd24] ss:$44 sps:$4 sm:$0xff]  }
 0x139   : > { %3890 = vmatpush1.bf16.msra.mxu0 %v8772_v53  ;;  %3809 = vmatprep.subr.bf16.mxu1 %v8777_v54  ;;  %v8864_v53 = vld [vmem:[#allocation3 + $0x22c] ss:$44 sps:$4 sm:$0xff]  }
 0x13a   : > { %3891 = vmatprep.subr.bf16.mxu0 %v8780_v55 }
 0x13c   : > { %3810 = vmatpush1.bf16.msra.mxu1 %v8775_v56 }
 0x13d   : > { %3892 = vmatpush1.bf16.msra.mxu0 %v8778_v57  ;;  %3811 = vmatprep.subr.bf16.mxu1 %v8783_v58  ;;  %v8859_v57 = vld [vmem:[#allocation3 + $0xd20] ss:$44 sps:$4 sm:$0xff]   ;;  %v8862_v58 = vld [vmem:[#allocation3 + $0x228] ss:$44 sps:$4 sm:$0xff]  }
 0x13e   : > { %3893 = vmatprep.subr.bf16.mxu0 %v8786_v59 }
 0x140   : > { %3812 = vmatpush1.bf16.msra.mxu1 %v8781_v60  ;;  %v8867_v60 = vld [vmem:[#allocation3 + $0xd7c] ss:$44 sps:$4 sm:$0xff]  }
 0x141   : > { %3894 = vmatpush1.bf16.msra.mxu0 %v8784_v61  ;;  %3813 = vmatprep.subr.bf16.mxu1 %v8789_v62  ;;  %v8870_v61 = vld [vmem:[#allocation3 + $0x284] ss:$44 sps:$4 sm:$0xff]  }
 0x142   : > { %3895 = vmatprep.subr.bf16.mxu0 %v8792_v63  ;;  %v8865_v62 = vld [vmem:[#allocation3 + $0xd78] ss:$44 sps:$4 sm:$0xff]   ;;  %v8868_v63 = vld [vmem:[#allocation3 + $0x280] ss:$44 sps:$4 sm:$0xff]  }
 0x144   : > { %3814 = vmatpush1.bf16.msra.mxu1 %v8787_v0  ;;  %v8873_v0 = vld [vmem:[#allocation3 + $0xdd4] ss:$44 sps:$4 sm:$0xff]  }
 0x145   : > { %3896 = vmatpush1.bf16.msra.mxu0 %v8790_v1  ;;  %3815 = vmatprep.subr.bf16.mxu1 %v8795_v2  ;;  %v8876_v1 = vld [vmem:[#allocation3 + $0x2dc] ss:$44 sps:$4 sm:$0xff]  }
 0x146   : > { %3897 = vmatprep.subr.bf16.mxu0 %v8798_v3  ;;  %v8871_v2 = vld [vmem:[#allocation3 + $0xdd0] ss:$44 sps:$4 sm:$0xff]   ;;  %v8874_v3 = vld [vmem:[#allocation3 + $0x2d8] ss:$44 sps:$4 sm:$0xff]  }
 0x148   : > { %3816 = vmatpush1.bf16.msra.mxu1 %v8793_v4  ;;  %v8879_v4 = vld [vmem:[#allocation3 + $0xe2c] ss:$44 sps:$4 sm:$0xff]  }
 0x149   : > { %3898 = vmatpush1.bf16.msra.mxu0 %v8796_v5  ;;  %3817 = vmatprep.subr.bf16.mxu1 %v8801_v8  ;;  %v8882_v5 = vld [vmem:[#allocation3 + $0x334] ss:$44 sps:$4 sm:$0xff]  }
 0x14a   : > { %3899 = vmatprep.subr.bf16.mxu0 %v8804_v9  ;;  %v8877_v8 = vld [vmem:[#allocation3 + $0xe28] ss:$44 sps:$4 sm:$0xff]   ;;  %v8880_v9 = vld [vmem:[#allocation3 + $0x330] ss:$44 sps:$4 sm:$0xff]  }
 0x14c   : > { %3818 = vmatpush1.bf16.msra.mxu1 %v8799_v10  ;;  %v8885_v10 = vld [vmem:[#allocation3 + $0xe84] ss:$44 sps:$4 sm:$0xff]  }
 0x14d   : > { %3900 = vmatpush1.bf16.msra.mxu0 %v8802_v11  ;;  %3819 = vmatprep.subr.bf16.mxu1 %v8807_v12  ;;  %v8888_v11 = vld [vmem:[#allocation3 + $0x38c] ss:$44 sps:$4 sm:$0xff]  }
 0x14e   : > { %3901 = vmatprep.subr.bf16.mxu0 %v8810_v13  ;;  %v8883_v12 = vld [vmem:[#allocation3 + $0xe80] ss:$44 sps:$4 sm:$0xff]   ;;  %v8886_v13 = vld [vmem:[#allocation3 + $0x388] ss:$44 sps:$4 sm:$0xff]  }
 0x150   : > { %3820 = vmatpush1.bf16.msra.mxu1 %v8805_v15  ;;  %v8891_v15 = vld [vmem:[#allocation3 + $0xedc] ss:$44 sps:$4 sm:$0xff]  }
 0x151   : > { %3902 = vmatpush1.bf16.msra.mxu0 %v8808_v16  ;;  %3821 = vmatprep.subr.bf16.mxu1 %v8813_v17  ;;  %v8894_v16 = vld [vmem:[#allocation3 + $0x3e4] ss:$44 sps:$4 sm:$0xff]  }
 0x152   : > { %3903 = vmatprep.subr.bf16.mxu0 %v8816_v18  ;;  %v8889_v17 = vld [vmem:[#allocation3 + $0xed8] ss:$44 sps:$4 sm:$0xff]   ;;  %v8892_v18 = vld [vmem:[#allocation3 + $0x3e0] ss:$44 sps:$4 sm:$0xff]  }
 0x154   : > { %3822 = vmatpush1.bf16.msra.mxu1 %v8811_v19  ;;  %v8897_v19 = vld [vmem:[#allocation3 + $0xf34] ss:$44 sps:$4 sm:$0xff]  }
 0x155   : > { %3904 = vmatpush1.bf16.msra.mxu0 %v8814_v20  ;;  %3823 = vmatprep.subr.bf16.mxu1 %v8819_v21  ;;  %v8900_v20 = vld [vmem:[#allocation3 + $0x43c] ss:$44 sps:$4 sm:$0xff]  }
 0x156   : > { %3905 = vmatprep.subr.bf16.mxu0 %v8822_v22  ;;  %v8895_v21 = vld [vmem:[#allocation3 + $0xf30] ss:$44 sps:$4 sm:$0xff]   ;;  %v8898_v22 = vld [vmem:[#allocation3 + $0x438] ss:$44 sps:$4 sm:$0xff]  }
 0x158   : > { %3824 = vmatpush1.bf16.msra.mxu1 %v8817_v23  ;;  %v8903_v23 = vld [vmem:[#allocation3 + $0xf8c] ss:$44 sps:$4 sm:$0xff]  }
 0x159   : > { %3906 = vmatpush1.bf16.msra.mxu0 %v8820_v24  ;;  %3957 = vmatprep.subr.bf16.mxu1 %v8828_v26  ;;  %v8906_v24 = vld [vmem:[#allocation3 + $0x494] ss:$44 sps:$4 sm:$0xff]   ;;  %v8904_v26 = vld [vmem:[#allocation3 + $0x490] ss:$44 sps:$4 sm:$0xff]  }
 0x15a   : > { %3916 = vmatprep.subr.bf16.mxu0 %v8825_v25  ;;  %v8901_v25 = vld [vmem:[#allocation3 + $0xf88] ss:$44 sps:$4 sm:$0xff]  }
 0x15b   : > { %3826 = vmatmul.mubr.bf16.vlgmr.msra.gmra.mrb[4].mxu1 %v10044_v14 }
 0x15c   : > { %3908 = vmatmul.mubr.bf16.vlgmr.msra.gmra.mrb[4].mxu0 %v10029_v7  ;;  %3958 = vmatpush1.bf16.msra.mxu1 %v8826_v28  ;;  %v8912_v28 = vld [vmem:[#allocation3 + $0x4ec] ss:$44 sps:$4 sm:$0xff]  }
 0x15d   : > { %3917 = vmatpush1.bf16.msra.mxu0 %v8823_v27  ;;  %3959 = vmatprep.subr.bf16.mxu1 %v8834_v30  ;;  %v8909_v27 = vld [vmem:[#allocation3 + $0xfe4] ss:$44 sps:$4 sm:$0xff]   ;;  %v8910_v30 = vld [vmem:[#allocation3 + $0x4e8] ss:$44 sps:$4 sm:$0xff]  }
 0x15e   : > { %3918 = vmatprep.subr.bf16.mxu0 %v8831_v29  ;;  %3948 = vmatprep.mubr.bf16.mxu0 %v10039_v34  ;;  %v8907_v29 = vld [vmem:[#allocation3 + $0xfe0] ss:$44 sps:$4 sm:$0xff]  }
 0x15f   : > { %3989 = vmatprep.mubr.bf16.mxu1 %v10020_v47 }
 0x160   : > { %3960 = vmatpush1.bf16.msra.mxu1 %v8832_v32  ;;  %v8918_v32 = vld [vmem:[#allocation3 + $0x544] ss:$44 sps:$4 sm:$0xff]  }
 0x161   : > { %3919 = vmatpush1.bf16.msra.mxu0 %v8829_v31  ;;  %3961 = vmatprep.subr.bf16.mxu1 %v8840_v35  ;;  %v8915_v31 = vld [vmem:[#allocation3 + $0x103c] ss:$44 sps:$4 sm:$0xff]   ;;  %v8916_v35 = vld [vmem:[#allocation3 + $0x540] ss:$44 sps:$4 sm:$0xff]  }
 0x162   : > { %3920 = vmatprep.subr.bf16.mxu0 %v8837_v33  ;;  %v8913_v33 = vld [vmem:[#allocation3 + $0x1038] ss:$44 sps:$4 sm:$0xff]  }
 0x164   : > { %3962 = vmatpush1.bf16.msra.mxu1 %v8838_v37  ;;  %v8924_v37 = vld [vmem:[#allocation3 + $0x24] ss:$44 sps:$4 sm:$0xff]  }
 0x165   : > { %3921 = vmatpush1.bf16.msra.mxu0 %v8835_v36  ;;  %3963 = vmatprep.subr.bf16.mxu1 %v8846_v39  ;;  %v8921_v36 = vld [vmem:[#allocation3 + $0x59c] ss:$44 sps:$4 sm:$0xff]   ;;  %v8922_v39 = vld [vmem:[#allocation3 + $0x20] ss:$44 sps:$4 sm:$0xff]  }
 0x166   : > { %3922 = vmatprep.subr.bf16.mxu0 %v8843_v38  ;;  %v8919_v38 = vld [vmem:[#allocation3 + $0x598] ss:$44 sps:$4 sm:$0xff]  }
 0x168   : > { %3964 = vmatpush1.bf16.msra.mxu1 %v8844_v41  ;;  %v8930_v41 = vld [vmem:[#allocation3 + $0x7c] ss:$44 sps:$4 sm:$0xff]  }
 0x169   : > { %3923 = vmatpush1.bf16.msra.mxu0 %v8841_v40  ;;  %3965 = vmatprep.subr.bf16.mxu1 %v8852_v43  ;;  %v8927_v40 = vld [vmem:[#allocation3 + $0x5f4] ss:$44 sps:$4 sm:$0xff]   ;;  %v8928_v43 = vld [vmem:[#allocation3 + $0x78] ss:$44 sps:$4 sm:$0xff]  }
 0x16a   : > { %3924 = vmatprep.subr.bf16.mxu0 %v8849_v42  ;;  %v8925_v42 = vld [vmem:[#allocation3 + $0x5f0] ss:$44 sps:$4 sm:$0xff]  }
 0x16c   : > { %3966 = vmatpush1.bf16.msra.mxu1 %v8850_v45  ;;  %v8936_v45 = vld [vmem:[#allocation3 + $0xd4] ss:$44 sps:$4 sm:$0xff]  }
 0x16d   : > { %3925 = vmatpush1.bf16.msra.mxu0 %v8847_v44  ;;  %3967 = vmatprep.subr.bf16.mxu1 %v8858_v48  ;;  %v8933_v44 = vld [vmem:[#allocation3 + $0x64c] ss:$44 sps:$4 sm:$0xff]   ;;  %v8934_v48 = vld [vmem:[#allocation3 + $0xd0] ss:$44 sps:$4 sm:$0xff]  }
 0x16e   : > { %3926 = vmatprep.subr.bf16.mxu0 %v8855_v46  ;;  %v10058_v54 = vpop.f32.mrb[0].mxu1  ;;  %v8931_v46 = vld [vmem:[#allocation3 + $0x648] ss:$44 sps:$4 sm:$0xff]  }
 0x16f   : > { %v10060_v55 = vpop.f32.mrb[1].mxu1 }
 0x170   : > { %v3626_v56 = vpop.f32.mrb[2].mxu1  ;;  %3968 = vmatpush1.bf16.msra.mxu1 %v8856_v50  ;;  %v8942_v50 = vld [vmem:[#allocation3 + $0x12c] ss:$44 sps:$4 sm:$0xff]  }
 0x171   : > { %3927 = vmatpush1.bf16.msra.mxu0 %v8853_v49  ;;  %v3627_v59 = vpop.f32.mrb[3].mxu1  ;;  %3969 = vmatprep.subr.bf16.mxu1 %v8864_v53  ;;  %v8939_v49 = vld [vmem:[#allocation3 + $0x6a4] ss:$44 sps:$4 sm:$0xff]   ;;  %v8940_v53 = vld [vmem:[#allocation3 + $0x128] ss:$44 sps:$4 sm:$0xff]  }
 0x172   : > { %3928 = vmatprep.subr.bf16.mxu0 %v8861_v52  ;;  %v8937_v52 = vld [vmem:[#allocation3 + $0x6a0] ss:$44 sps:$4 sm:$0xff]   ;;  %v8945_v56 = vld [vmem:[#allocation3 + $0x6fc] ss:$44 sps:$4 sm:$0xff]  }
 0x173   : > { %v8946_v59 = vld [vmem:[#allocation3 + $0x180] ss:$44 sps:$4 sm:$0xff]  }
 0x174   : > { %3970 = vmatpush1.bf16.msra.mxu1 %v8862_v58  ;;  %v8943_v58 = vld [vmem:[#allocation3 + $0x6f8] ss:$44 sps:$4 sm:$0xff]  }
 0x175   : > { %3929 = vmatpush1.bf16.msra.mxu0 %v8859_v57  ;;  %3971 = vmatprep.subr.bf16.mxu1 %v8870_v61  ;;  %v8948_v57 = vld [vmem:[#allocation3 + $0x184] ss:$44 sps:$4 sm:$0xff]   ;;  %v8954_v61 = vld [vmem:[#allocation3 + $0x1dc] ss:$44 sps:$4 sm:$0xff]  }
 0x176   : > { %3930 = vmatprep.subr.bf16.mxu0 %v8867_v60  ;;  %v8951_v60 = vld [vmem:[#allocation3 + $0x754] ss:$44 sps:$4 sm:$0xff]  }
 0x178   : > { %3972 = vmatpush1.bf16.msra.mxu1 %v8868_v63  ;;  %v8952_v63 = vld [vmem:[#allocation3 + $0x1d8] ss:$44 sps:$4 sm:$0xff]  }
 0x179   : > { %3931 = vmatpush1.bf16.msra.mxu0 %v8865_v62  ;;  %3973 = vmatprep.subr.bf16.mxu1 %v8876_v1  ;;  %v8949_v62 = vld [vmem:[#allocation3 + $0x750] ss:$44 sps:$4 sm:$0xff]   ;;  %v8960_v1 = vld [vmem:[#allocation3 + $0x234] ss:$44 sps:$4 sm:$0xff]  }
 0x17a   : > { %3932 = vmatprep.subr.bf16.mxu0 %v8873_v0  ;;  %v8957_v0 = vld [vmem:[#allocation3 + $0x7ac] ss:$44 sps:$4 sm:$0xff]  }
 0x17c   : > { %3974 = vmatpush1.bf16.msra.mxu1 %v8874_v3  ;;  %v8955_v3 = vld [vmem:[#allocation3 + $0x7a8] ss:$44 sps:$4 sm:$0xff]  }
 0x17d   : > { %3933 = vmatpush1.bf16.msra.mxu0 %v8871_v2  ;;  %3975 = vmatprep.subr.bf16.mxu1 %v8882_v5 }
 0x17e   : > { %3934 = vmatprep.subr.bf16.mxu0 %v8879_v4  ;;  %v8958_v4 = vld [vmem:[#allocation3 + $0x230] ss:$44 sps:$4 sm:$0xff]  }
 0x180   : > { %3976 = vmatpush1.bf16.msra.mxu1 %v8880_v9 }
 0x181   : > { %3935 = vmatpush1.bf16.msra.mxu0 %v8877_v8  ;;  %3977 = vmatprep.subr.bf16.mxu1 %v8888_v11 }
 0x182   : > { %3936 = vmatprep.subr.bf16.mxu0 %v8885_v10 }
 0x184   : > { %3978 = vmatpush1.bf16.msra.mxu1 %v8886_v13  ;;  %v8966_v13 = vld [vmem:[#allocation3 + $0x28c] ss:$44 sps:$4 sm:$0xff]  }
 0x185   : > { %3937 = vmatpush1.bf16.msra.mxu0 %v8883_v12  ;;  %3979 = vmatprep.subr.bf16.mxu1 %v8894_v16  ;;  %v8963_v12 = vld [vmem:[#allocation3 + $0x804] ss:$44 sps:$4 sm:$0xff]  }
 0x186   : > { %3938 = vmatprep.subr.bf16.mxu0 %v8891_v15 }
 0x188   : > { %3980 = vmatpush1.bf16.msra.mxu1 %v8892_v18  ;;  %v8964_v18 = vld [vmem:[#allocation3 + $0x288] ss:$44 sps:$4 sm:$0xff]  }
 0x189   : > { %3939 = vmatpush1.bf16.msra.mxu0 %v8889_v17  ;;  %3981 = vmatprep.subr.bf16.mxu1 %v8900_v20  ;;  %v8961_v17 = vld [vmem:[#allocation3 + $0x800] ss:$44 sps:$4 sm:$0xff]  }
 0x18a   : > { %3940 = vmatprep.subr.bf16.mxu0 %v8897_v19 }
 0x18c   : > { %3982 = vmatpush1.bf16.msra.mxu1 %v8898_v22 }
 0x18d   : > { %3941 = vmatpush1.bf16.msra.mxu0 %v8895_v21  ;;  %3983 = vmatprep.subr.bf16.mxu1 %v8906_v24  ;;  %v8972_v21 = vld [vmem:[#allocation3 + $0x2e4] ss:$44 sps:$4 sm:$0xff]   ;;  %v8970_v24 = vld [vmem:[#allocation3 + $0x2e0] ss:$44 sps:$4 sm:$0xff]  }
 0x18e   : > { %3942 = vmatprep.subr.bf16.mxu0 %v8903_v23  ;;  %v8967_v23 = vld [vmem:[#allocation3 + $0x858] ss:$44 sps:$4 sm:$0xff]  }
 0x190   : > { %3984 = vmatpush1.bf16.msra.mxu1 %v8904_v26 }
 0x191   : > { %3943 = vmatpush1.bf16.msra.mxu0 %v8901_v25  ;;  %3985 = vmatprep.subr.bf16.mxu1 %v8912_v28  ;;  %v8975_v28 = vld [vmem:[#allocation3 + $0x8b4] ss:$44 sps:$4 sm:$0xff]  }
 0x192   : > { %3944 = vmatprep.subr.bf16.mxu0 %v8909_v27 }
 0x194   : > { %3986 = vmatpush1.bf16.msra.mxu1 %v8910_v30 }
 0x195   : > { %3945 = vmatpush1.bf16.msra.mxu0 %v8907_v29  ;;  %3987 = vmatprep.subr.bf16.mxu1 %v8918_v32  ;;  %v8978_v29 = vld [vmem:[#allocation3 + $0x33c] ss:$44 sps:$4 sm:$0xff]   ;;  %v8976_v32 = vld [vmem:[#allocation3 + $0x338] ss:$44 sps:$4 sm:$0xff]  }
 0x196   : > { %3946 = vmatprep.subr.bf16.mxu0 %v8915_v31  ;;  %v8973_v31 = vld [vmem:[#allocation3 + $0x8b0] ss:$44 sps:$4 sm:$0xff]  }
 0x198   : > { %3988 = vmatpush1.bf16.msra.mxu1 %v8916_v35 }
 0x199   : > { %3947 = vmatpush1.bf16.msra.mxu0 %v8913_v33  ;;  %3998 = vmatprep.subr.bf16.mxu1 %v8921_v36  ;;  %v8981_v36 = vld [vmem:[#allocation3 + $0x90c] ss:$44 sps:$4 sm:$0xff]  }
 0x19a   : > { %4080 = vmatprep.subr.bf16.mxu0 %v8924_v37  ;;  %v8984_v37 = vld [vmem:[#allocation3 + $0x394] ss:$44 sps:$4 sm:$0xff]  }
 0x19b   : > { %3990 = vmatmul.mubr.bf16.vlgmr.msra.gmra.mrb[8].mxu1 %v10027_v6 }
 0x19c   : > { %3949 = vmatmul.mubr.bf16.vlgmr.msra.gmra.mrb[4].mxu0 %v10044_v14  ;;  %3999 = vmatpush1.bf16.msra.mxu1 %v8919_v38 }
 0x19d   : > { %4081 = vmatpush1.bf16.msra.mxu0 %v8922_v39  ;;  %4000 = vmatprep.subr.bf16.mxu1 %v8927_v40  ;;  %v8979_v39 = vld [vmem:[#allocation3 + $0x908] ss:$44 sps:$4 sm:$0xff]   ;;  %v8982_v40 = vld [vmem:[#allocation3 + $0x390] ss:$44 sps:$4 sm:$0xff]  }
 0x19e   : > { %4082 = vmatprep.subr.bf16.mxu0 %v8930_v41  ;;  %4030 = vmatprep.mubr.bf16.mxu1 %v10023_v51  ;;  %v8987_v41 = vld [vmem:[#allocation3 + $0x964] ss:$44 sps:$4 sm:$0xff]  }
 0x19f   : > { %4112 = vmatprep.mubr.bf16.mxu0 %v10020_v47 }
 0x1a0   : > { %4001 = vmatpush1.bf16.msra.mxu1 %v8925_v42  ;;  %v8990_v42 = vld [vmem:[#allocation3 + $0x3ec] ss:$44 sps:$4 sm:$0xff]  }
 0x1a1   : > { %4083 = vmatpush1.bf16.msra.mxu0 %v8928_v43  ;;  %4002 = vmatprep.subr.bf16.mxu1 %v8933_v44  ;;  %v8985_v43 = vld [vmem:[#allocation3 + $0x960] ss:$44 sps:$4 sm:$0xff]   ;;  %v8988_v44 = vld [vmem:[#allocation3 + $0x3e8] ss:$44 sps:$4 sm:$0xff]  }
 0x1a2   : > { %4084 = vmatprep.subr.bf16.mxu0 %v8936_v45  ;;  %v8993_v45 = vld [vmem:[#allocation3 + $0x9bc] ss:$44 sps:$4 sm:$0xff]  }
 0x1a4   : > { %4003 = vmatpush1.bf16.msra.mxu1 %v8931_v46  ;;  %v8996_v46 = vld [vmem:[#allocation3 + $0x444] ss:$44 sps:$4 sm:$0xff]  }
 0x1a5   : > { %4085 = vmatpush1.bf16.msra.mxu0 %v8934_v48  ;;  %4004 = vmatprep.subr.bf16.mxu1 %v8939_v49  ;;  %v8991_v48 = vld [vmem:[#allocation3 + $0x9b8] ss:$44 sps:$4 sm:$0xff]   ;;  %v8994_v49 = vld [vmem:[#allocation3 + $0x440] ss:$44 sps:$4 sm:$0xff]  }
 0x1a6   : > { %4086 = vmatprep.subr.bf16.mxu0 %v8942_v50  ;;  %v8999_v50 = vld [vmem:[#allocation3 + $0xa14] ss:$44 sps:$4 sm:$0xff]  }
 0x1a8   : > { %4005 = vmatpush1.bf16.msra.mxu1 %v8937_v52  ;;  %v9002_v52 = vld [vmem:[#allocation3 + $0x49c] ss:$44 sps:$4 sm:$0xff]  }
 0x1a9   : > { %4087 = vmatpush1.bf16.msra.mxu0 %v8940_v53  ;;  %4006 = vmatprep.subr.bf16.mxu1 %v8945_v56  ;;  %v8997_v53 = vld [vmem:[#allocation3 + $0xa10] ss:$44 sps:$4 sm:$0xff]   ;;  %v9000_v56 = vld [vmem:[#allocation3 + $0x498] ss:$44 sps:$4 sm:$0xff]  }
 0x1aa   : > { %4088 = vmatprep.subr.bf16.mxu0 %v8948_v57  ;;  %v9005_v57 = vld [vmem:[#allocation3 + $0xa6c] ss:$44 sps:$4 sm:$0xff]  }
 0x1ac   : > { %4007 = vmatpush1.bf16.msra.mxu1 %v8943_v58  ;;  %v9008_v58 = vld [vmem:[#allocation3 + $0x4f4] ss:$44 sps:$4 sm:$0xff]  }
 0x1ad   : > { %4089 = vmatpush1.bf16.msra.mxu0 %v8946_v59  ;;  %4008 = vmatprep.subr.bf16.mxu1 %v8951_v60  ;;  %v9003_v59 = vld [vmem:[#allocation3 + $0xa68] ss:$44 sps:$4 sm:$0xff]   ;;  %v9006_v60 = vld [vmem:[#allocation3 + $0x4f0] ss:$44 sps:$4 sm:$0xff]  }
 0x1ae   : > { %4090 = vmatprep.subr.bf16.mxu0 %v8954_v61  ;;  %v9011_v61 = vld [vmem:[#allocation3 + $0xac4] ss:$44 sps:$4 sm:$0xff]  }
 0x1af   : > { %v3704_v2 = vpop.f32.mrb[0].mxu0 }
 0x1b0   : > { %v8290_v5 = vadd.f32 %v3704_v2, %v10058_v54  ;;  %v3706_v8 = vpop.f32.mrb[1].mxu0  ;;  %4009 = vmatpush1.bf16.msra.mxu1 %v8949_v62  ;;  %v9014_v62 = vld [vmem:[#allocation3 + $0x54c] ss:$44 sps:$4 sm:$0xff]   ;;  %v9020_v2 = vld [vmem:[#allocation3 + $0x5a4] ss:$44 sps:$4 sm:$0xff]  }
 0x1b1   : > { %v8291_v9 = vadd.f32 %v3706_v8, %v10060_v55  ;;  %4091 = vmatpush1.bf16.msra.mxu0 %v8952_v63  ;;  %v3708_v10 = vpop.f32.mrb[2].mxu0  ;;  %4010 = vmatprep.subr.bf16.mxu1 %v8957_v0  ;;  %v8969_v55 = vld [vmem:[#allocation3 + $0x85c] ss:$44 sps:$4 sm:$0xff]   ;;  %v9009_v63 = vld [vmem:[#allocation3 + $0xac0] ss:$44 sps:$4 sm:$0xff]  }
 0x1b2   : > { %v4325_v11 = vrot.slane %v8290_v5, 4  ;;  %4092 = vmatprep.subr.bf16.mxu0 %v8960_v1  ;;  %v3709_v15 = vpop.f32.mrb[3].mxu0  ;;  %v9012_v0 = vld [vmem:[#allocation3 + $0x548] ss:$44 sps:$4 sm:$0xff]   ;;  %v9024_v10 = vld [vmem:[#allocation3 + $0x5f8] ss:$44 sps:$4 sm:$0xff]  }
 0x1b3   : > { %v4331_v16 = vrot.slane %v8291_v9, 4  ;;  %v9017_v1 = vld [vmem:[#allocation3 + $0xb1c] ss:$44 sps:$4 sm:$0xff]  }
 0x1b4   : > { %v4326_v19 = vadd.f32 %v8290_v5, %v4325_v11  ;;  %4011 = vmatpush1.bf16.msra.mxu1 %v8955_v3  ;;  %v9015_v3 = vld [vmem:[#allocation3 + $0xb18] ss:$44 sps:$4 sm:$0xff]   ;;  %v9023_v5 = vld [vmem:[#allocation3 + $0xb74] ss:$44 sps:$4 sm:$0xff]   ;;  %v9026_v8 = vld [vmem:[#allocation3 + $0x5fc] ss:$44 sps:$4 sm:$0xff]  }
 0x1b5   : > { %v4332_v20 = vadd.f32 %v8291_v9, %v4331_v16  ;;  %4093 = vmatpush1.bf16.msra.mxu0 %v8958_v4  ;;  %4012 = vmatprep.subr.bf16.mxu1 %v8963_v12  ;;  %v9018_v4 = vld [vmem:[#allocation3 + $0x5a0] ss:$44 sps:$4 sm:$0xff]   ;;  %v9021_v9 = vld [vmem:[#allocation3 + $0xb70] ss:$44 sps:$4 sm:$0xff]  }
 0x1b6   : > { %v4327_v54 = vrot.slane %v4326_v19, 2  ;;  %4094 = vmatprep.subr.bf16.mxu0 %v8966_v13  ;;  %v9029_v11 = vld [vmem:[#allocation3 + $0xbcc] ss:$44 sps:$4 sm:$0xff]   ;;  %v9032_v12 = vld [vmem:[#allocation3 + $0x654] ss:$44 sps:$4 sm:$0xff]  }
 0x1b7   : > { %v4333_v22 = vrot.slane %v4332_v20, 2  ;;  %v9027_v13 = vld [vmem:[#allocation3 + $0xbc8] ss:$44 sps:$4 sm:$0xff]   ;;  %v9030_v15 = vld [vmem:[#allocation3 + $0x650] ss:$44 sps:$4 sm:$0xff]  }
 0x1b8   : > { %v4328_v25 = vadd.f32 %v4327_v54, %v4326_v19  ;;  %4013 = vmatpush1.bf16.msra.mxu1 %v8961_v17  ;;  %v9035_v16 = vld [vmem:[#allocation3 + $0xc24] ss:$44 sps:$4 sm:$0xff]   ;;  %v9038_v17 = vld [vmem:[#allocation3 + $0x6ac] ss:$44 sps:$4 sm:$0xff]   ;;  %v9036_v19 = vld [vmem:[#allocation3 + $0x6a8] ss:$44 sps:$4 sm:$0xff]  }
 0x1b9   : > { %v4334_v26 = vadd.f32 %v4333_v22, %v4332_v20  ;;  %4095 = vmatpush1.bf16.msra.mxu0 %v8964_v18  ;;  %4014 = vmatprep.subr.bf16.mxu1 %v8969_v55  ;;  %v9033_v18 = vld [vmem:[#allocation3 + $0xc20] ss:$44 sps:$4 sm:$0xff]   ;;  %v9041_v20 = vld [vmem:[#allocation3 + $0xc7c] ss:$44 sps:$4 sm:$0xff]   ;;  %v9044_v54 = vld [vmem:[#allocation3 + $0x704] ss:$44 sps:$4 sm:$0xff]  }
 0x1ba   : > { %v4329_v27 = vrot.slane %v4328_v25, 1  ;;  %4096 = vmatprep.subr.bf16.mxu0 %v8972_v21  ;;  %v9039_v55 = vld [vmem:[#allocation3 + $0xc78] ss:$44 sps:$4 sm:$0xff]   ;;  %v9042_v21 = vld [vmem:[#allocation3 + $0x700] ss:$44 sps:$4 sm:$0xff]  }
 0x1bb   : > { %v4335_v30 = vrot.slane %v4334_v26, 1  ;;  %v9047_v22 = vld [vmem:[#allocation3 + $0xcd4] ss:$44 sps:$4 sm:$0xff]  }
 0x1bc   : > { %v10068_v33 = vadd.f32 %v4329_v27, %v4328_v25  ;;  %4015 = vmatpush1.bf16.msra.mxu1 %v8967_v23  ;;  %v9050_v23 = vld [vmem:[#allocation3 + $0x75c] ss:$44 sps:$4 sm:$0xff]   ;;  %v9048_v25 = vld [vmem:[#allocation3 + $0x758] ss:$44 sps:$4 sm:$0xff]   ;;  %v9056_v27 = vld [vmem:[#allocation3 + $0x7b4] ss:$44 sps:$4 sm:$0xff]  }
 0x1bd   : > { %v10070_v35 = vadd.f32 %v4335_v30, %v4334_v26  ;;  %4097 = vmatpush1.bf16.msra.mxu0 %v8970_v24  ;;  %4016 = vmatprep.subr.bf16.mxu1 %v8975_v28  ;;  %v9045_v24 = vld [vmem:[#allocation3 + $0xcd0] ss:$44 sps:$4 sm:$0xff]   ;;  %v9053_v26 = vld [vmem:[#allocation3 + $0xd2c] ss:$44 sps:$4 sm:$0xff]   ;;  %v9051_v28 = vld [vmem:[#allocation3 + $0xd28] ss:$44 sps:$4 sm:$0xff]  }
 0x1be   : > { %4098 = vmatprep.subr.bf16.mxu0 %v8978_v29  ;;  %v9054_v29 = vld [vmem:[#allocation3 + $0x7b0] ss:$44 sps:$4 sm:$0xff]  }
 0x1bf   : > { %v4402_v38 = vcombine.low %v10068_v33, %v10070_v35  ;;  %v9059_v30 = vld [vmem:[#allocation3 + $0xd84] ss:$44 sps:$4 sm:$0xff]  }
 0x1c0   : > { %4017 = vmatpush1.bf16.msra.mxu1 %v8973_v31  ;;  %v9062_v31 = vld [vmem:[#allocation3 + $0x80c] ss:$44 sps:$4 sm:$0xff]   ;;  %v9170_v33 = vld [vmem:[#allocation3 + $0x6b0] ss:$44 sps:$4 sm:$0xff]  }
 0x1c1   : > { %4099 = vmatpush1.bf16.msra.mxu0 %v8976_v32  ;;  %4018 = vmatprep.subr.bf16.mxu1 %v8981_v36  ;;  %v9057_v32 = vld [vmem:[#allocation3 + $0xd80] ss:$44 sps:$4 sm:$0xff]   ;;  %v9060_v36 = vld [vmem:[#allocation3 + $0x808] ss:$44 sps:$4 sm:$0xff]   ;;  %v9173_v35 = vld [vmem:[#allocation3 + $0xf44] ss:$44 sps:$4 sm:$0xff]  }
 0x1c2   : > { %4100 = vmatprep.subr.bf16.mxu0 %v8984_v37  ;;  %v9065_v37 = vld [vmem:[#allocation3 + $0xddc] ss:$44 sps:$4 sm:$0xff]  }
 0x1c4   : > { %4019 = vmatpush1.bf16.msra.mxu1 %v8979_v39  ;;  %v9068_v39 = vld [vmem:[#allocation3 + $0x864] ss:$44 sps:$4 sm:$0xff]  }
 0x1c5   : > { %4101 = vmatpush1.bf16.msra.mxu0 %v8982_v40  ;;  %4020 = vmatprep.subr.bf16.mxu1 %v8987_v41  ;;  %v9063_v40 = vld [vmem:[#allocation3 + $0xdd8] ss:$44 sps:$4 sm:$0xff]   ;;  %v9066_v41 = vld [vmem:[#allocation3 + $0x860] ss:$44 sps:$4 sm:$0xff]  }
 0x1c6   : > { %4102 = vmatprep.subr.bf16.mxu0 %v8990_v42  ;;  %v9071_v42 = vld [vmem:[#allocation3 + $0xe34] ss:$44 sps:$4 sm:$0xff]  }
 0x1c8   : > { %4021 = vmatpush1.bf16.msra.mxu1 %v8985_v43  ;;  %v9074_v43 = vld [vmem:[#allocation3 + $0x8bc] ss:$44 sps:$4 sm:$0xff]  }
 0x1c9   : > { %4103 = vmatpush1.bf16.msra.mxu0 %v8988_v44  ;;  %4022 = vmatprep.subr.bf16.mxu1 %v8993_v45  ;;  %v9069_v44 = vld [vmem:[#allocation3 + $0xe30] ss:$44 sps:$4 sm:$0xff]   ;;  %v9072_v45 = vld [vmem:[#allocation3 + $0x8b8] ss:$44 sps:$4 sm:$0xff]  }
 0x1ca   : > { %4104 = vmatprep.subr.bf16.mxu0 %v8996_v46  ;;  %v9077_v46 = vld [vmem:[#allocation3 + $0xe8c] ss:$44 sps:$4 sm:$0xff]  }
 0x1cc   : > { %4023 = vmatpush1.bf16.msra.mxu1 %v8991_v48  ;;  %v9080_v48 = vld [vmem:[#allocation3 + $0x914] ss:$44 sps:$4 sm:$0xff]  }
 0x1cd   : > { %4105 = vmatpush1.bf16.msra.mxu0 %v8994_v49  ;;  %4024 = vmatprep.subr.bf16.mxu1 %v8999_v50  ;;  %v9075_v49 = vld [vmem:[#allocation3 + $0xe88] ss:$44 sps:$4 sm:$0xff]   ;;  %v9078_v50 = vld [vmem:[#allocation3 + $0x910] ss:$44 sps:$4 sm:$0xff]  }
 0x1ce   : > { %4106 = vmatprep.subr.bf16.mxu0 %v9002_v52  ;;  %v9083_v52 = vld [vmem:[#allocation3 + $0xee4] ss:$44 sps:$4 sm:$0xff]  }
 0x1d0   : > { %4025 = vmatpush1.bf16.msra.mxu1 %v8997_v53  ;;  %v9086_v53 = vld [vmem:[#allocation3 + $0x96c] ss:$44 sps:$4 sm:$0xff]  }
 0x1d1   : > { %4107 = vmatpush1.bf16.msra.mxu0 %v9000_v56  ;;  %4026 = vmatprep.subr.bf16.mxu1 %v9005_v57  ;;  %v9081_v56 = vld [vmem:[#allocation3 + $0xee0] ss:$44 sps:$4 sm:$0xff]   ;;  %v9084_v57 = vld [vmem:[#allocation3 + $0x968] ss:$44 sps:$4 sm:$0xff]  }
 0x1d2   : > { %4108 = vmatprep.subr.bf16.mxu0 %v9008_v58  ;;  %v9089_v58 = vld [vmem:[#allocation3 + $0xf3c] ss:$44 sps:$4 sm:$0xff]  }
 0x1d4   : > { %4027 = vmatpush1.bf16.msra.mxu1 %v9003_v59  ;;  %v9092_v59 = vld [vmem:[#allocation3 + $0x9c4] ss:$44 sps:$4 sm:$0xff]  }
 0x1d5   : > { %4109 = vmatpush1.bf16.msra.mxu0 %v9006_v60  ;;  %4028 = vmatprep.subr.bf16.mxu1 %v9011_v61  ;;  %v9087_v60 = vld [vmem:[#allocation3 + $0xf38] ss:$44 sps:$4 sm:$0xff]   ;;  %v9090_v61 = vld [vmem:[#allocation3 + $0x9c0] ss:$44 sps:$4 sm:$0xff]  }
 0x1d6   : > { %4110 = vmatprep.subr.bf16.mxu0 %v9014_v62  ;;  %v9095_v62 = vld [vmem:[#allocation3 + $0xf94] ss:$44 sps:$4 sm:$0xff]  }
 0x1d8   : > { %4029 = vmatpush1.bf16.msra.mxu1 %v9009_v63  ;;  %v9098_v63 = vld [vmem:[#allocation3 + $0xa1c] ss:$44 sps:$4 sm:$0xff]  }
 0x1d9   : > { %4111 = vmatpush1.bf16.msra.mxu0 %v9012_v0  ;;  %4039 = vmatprep.subr.bf16.mxu1 %v9017_v1  ;;  %v9093_v0 = vld [vmem:[#allocation3 + $0xf90] ss:$44 sps:$4 sm:$0xff]   ;;  %v9096_v1 = vld [vmem:[#allocation3 + $0xa18] ss:$44 sps:$4 sm:$0xff]  }
 0x1da   : > { %4121 = vmatprep.subr.bf16.mxu0 %v9020_v2  ;;  %v9101_v2 = vld [vmem:[#allocation3 + $0xfec] ss:$44 sps:$4 sm:$0xff]  }
 0x1db   : > { %4031 = vmatmul.mubr.bf16.vlgmr.msra.gmra.mrb[8].mxu1 %v10029_v7 }
 0x1dc   : > { %4113 = vmatmul.mubr.bf16.vlgmr.msra.gmra.mrb[8].mxu0 %v10027_v6  ;;  %4040 = vmatpush1.bf16.msra.mxu1 %v9015_v3  ;;  %v9104_v3 = vld [vmem:[#allocation3 + $0xa74] ss:$44 sps:$4 sm:$0xff]  }
 0x1dd   : > { %4122 = vmatpush1.bf16.msra.mxu0 %v9018_v4  ;;  %4041 = vmatprep.subr.bf16.mxu1 %v9023_v5  ;;  %v9099_v4 = vld [vmem:[#allocation3 + $0xfe8] ss:$44 sps:$4 sm:$0xff]   ;;  %v9102_v5 = vld [vmem:[#allocation3 + $0xa70] ss:$44 sps:$4 sm:$0xff]  }
 0x1de   : > { %4123 = vmatprep.subr.bf16.mxu0 %v9026_v8  ;;  %4071 = vmatprep.mubr.bf16.mxu1 %v10039_v34  ;;  %v9107_v8 = vld [vmem:[#allocation3 + $0x1044] ss:$44 sps:$4 sm:$0xff]  }
 0x1df   : > { %4153 = vmatprep.mubr.bf16.mxu0 %v10023_v51 }
 0x1e0   : > { %4042 = vmatpush1.bf16.msra.mxu1 %v9021_v9  ;;  %v9110_v9 = vld [vmem:[#allocation3 + $0xacc] ss:$44 sps:$4 sm:$0xff]  }
 0x1e1   : > { %4124 = vmatpush1.bf16.msra.mxu0 %v9024_v10  ;;  %4043 = vmatprep.subr.bf16.mxu1 %v9029_v11  ;;  %v9105_v10 = vld [vmem:[#allocation3 + $0x1040] ss:$44 sps:$4 sm:$0xff]   ;;  %v9108_v11 = vld [vmem:[#allocation3 + $0xac8] ss:$44 sps:$4 sm:$0xff]  }
 0x1e2   : > { %4125 = vmatprep.subr.bf16.mxu0 %v9032_v12  ;;  %v9113_v12 = vld [vmem:[#allocation3 + $0xb24] ss:$44 sps:$4 sm:$0xff]  }
 0x1e4   : > { %4044 = vmatpush1.bf16.msra.mxu1 %v9027_v13  ;;  %v9114_v13 = vld [vmem:[#allocation3 + $0x2e8] ss:$44 sps:$4 sm:$0xff]  }
 0x1e5   : > { %4126 = vmatpush1.bf16.msra.mxu0 %v9030_v15  ;;  %4045 = vmatprep.subr.bf16.mxu1 %v9035_v16  ;;  %v9111_v15 = vld [vmem:[#allocation3 + $0xb20] ss:$44 sps:$4 sm:$0xff]   ;;  %v9115_v16 = vld [vmem:[#allocation3 + $0x28] ss:$44 sps:$4 sm:$0xff]  }
 0x1e6   : > { %4127 = vmatprep.subr.bf16.mxu0 %v9038_v17  ;;  %v9118_v17 = vld [vmem:[#allocation3 + $0xb7c] ss:$44 sps:$4 sm:$0xff]  }
 0x1e8   : > { %4046 = vmatpush1.bf16.msra.mxu1 %v9033_v18  ;;  %v9119_v18 = vld [vmem:[#allocation3 + $0x340] ss:$44 sps:$4 sm:$0xff]  }
 0x1e9   : > { %4128 = vmatpush1.bf16.msra.mxu0 %v9036_v19  ;;  %4047 = vmatprep.subr.bf16.mxu1 %v9041_v20  ;;  %v9116_v19 = vld [vmem:[#allocation3 + $0xb78] ss:$44 sps:$4 sm:$0xff]   ;;  %v9120_v20 = vld [vmem:[#allocation3 + $0x80] ss:$44 sps:$4 sm:$0xff]  }
 0x1ea   : > { %4129 = vmatprep.subr.bf16.mxu0 %v9044_v54  ;;  %v9123_v54 = vld [vmem:[#allocation3 + $0xbd4] ss:$44 sps:$4 sm:$0xff]  }
 0x1ec   : > { %4048 = vmatpush1.bf16.msra.mxu1 %v9039_v55  ;;  %v9124_v55 = vld [vmem:[#allocation3 + $0x398] ss:$44 sps:$4 sm:$0xff]  }
 0x1ed   : > { %4130 = vmatpush1.bf16.msra.mxu0 %v9042_v21  ;;  %4049 = vmatprep.subr.bf16.mxu1 %v9047_v22  ;;  %v9121_v21 = vld [vmem:[#allocation3 + $0xbd0] ss:$44 sps:$4 sm:$0xff]   ;;  %v9125_v22 = vld [vmem:[#allocation3 + $0xd8] ss:$44 sps:$4 sm:$0xff]  }
 0x1ee   : > { %4131 = vmatprep.subr.bf16.mxu0 %v9050_v23  ;;  %v9128_v23 = vld [vmem:[#allocation3 + $0xc2c] ss:$44 sps:$4 sm:$0xff]  }
 0x1f0   : > { %4050 = vmatpush1.bf16.msra.mxu1 %v9045_v24  ;;  %v9129_v24 = vld [vmem:[#allocation3 + $0x3f0] ss:$44 sps:$4 sm:$0xff]  }
 0x1f1   : > { %4132 = vmatpush1.bf16.msra.mxu0 %v9048_v25  ;;  %4051 = vmatprep.subr.bf16.mxu1 %v9053_v26  ;;  %v9126_v25 = vld [vmem:[#allocation3 + $0xc28] ss:$44 sps:$4 sm:$0xff]   ;;  %v9130_v26 = vld [vmem:[#allocation3 + $0x130] ss:$44 sps:$4 sm:$0xff]  }
 0x1f2   : > { %4133 = vmatprep.subr.bf16.mxu0 %v9056_v27  ;;  %v9133_v27 = vld [vmem:[#allocation3 + $0xc84] ss:$44 sps:$4 sm:$0xff]  }
 0x1f4   : > { %4052 = vmatpush1.bf16.msra.mxu1 %v9051_v28  ;;  %v9134_v28 = vld [vmem:[#allocation3 + $0x448] ss:$44 sps:$4 sm:$0xff]  }
 0x1f5   : > { %4134 = vmatpush1.bf16.msra.mxu0 %v9054_v29  ;;  %4053 = vmatprep.subr.bf16.mxu1 %v9059_v30  ;;  %v9131_v29 = vld [vmem:[#allocation3 + $0xc80] ss:$44 sps:$4 sm:$0xff]   ;;  %v9135_v30 = vld [vmem:[#allocation3 + $0x188] ss:$44 sps:$4 sm:$0xff]  }
 0x1f6   : > { %4135 = vmatprep.subr.bf16.mxu0 %v9062_v31  ;;  %v9138_v31 = vld [vmem:[#allocation3 + $0xcdc] ss:$44 sps:$4 sm:$0xff]  }
 0x1f8   : > { %4054 = vmatpush1.bf16.msra.mxu1 %v9057_v32  ;;  %v9136_v32 = vld [vmem:[#allocation3 + $0xcd8] ss:$44 sps:$4 sm:$0xff]  }
 0x1f9   : > { %4136 = vmatpush1.bf16.msra.mxu0 %v9060_v36  ;;  %4055 = vmatprep.subr.bf16.mxu1 %v9065_v37  ;;  %v9140_v36 = vld [vmem:[#allocation3 + $0x1e0] ss:$44 sps:$4 sm:$0xff]  }
 0x1fa   : > { %4137 = vmatprep.subr.bf16.mxu0 %v9068_v39  ;;  %v9143_v37 = vld [vmem:[#allocation3 + $0xd34] ss:$44 sps:$4 sm:$0xff]   ;;  %v9144_v39 = vld [vmem:[#allocation3 + $0x4f8] ss:$44 sps:$4 sm:$0xff]  }
 0x1fc   : > { %4056 = vmatpush1.bf16.msra.mxu1 %v9063_v40 }
 0x1fd   : > { %4138 = vmatpush1.bf16.msra.mxu0 %v9066_v41  ;;  %4057 = vmatprep.subr.bf16.mxu1 %v9071_v42  ;;  %v9141_v41 = vld [vmem:[#allocation3 + $0xd30] ss:$44 sps:$4 sm:$0xff]   ;;  %v9145_v42 = vld [vmem:[#allocation3 + $0x238] ss:$44 sps:$4 sm:$0xff]  }
 0x1fe   : > { %4139 = vmatprep.subr.bf16.mxu0 %v9074_v43 }
 0x200   : > { %4058 = vmatpush1.bf16.msra.mxu1 %v9069_v44 }
 0x201   : > { %4140 = vmatpush1.bf16.msra.mxu0 %v9072_v45  ;;  %4059 = vmatprep.subr.bf16.mxu1 %v9077_v46  ;;  %v9148_v45 = vld [vmem:[#allocation3 + $0xd8c] ss:$44 sps:$4 sm:$0xff]   ;;  %v9149_v46 = vld [vmem:[#allocation3 + $0x550] ss:$44 sps:$4 sm:$0xff]  }
 0x202   : > { %4141 = vmatprep.subr.bf16.mxu0 %v9080_v48 }
 0x204   : > { %4060 = vmatpush1.bf16.msra.mxu1 %v9075_v49 }
 0x205   : > { %4142 = vmatpush1.bf16.msra.mxu0 %v9078_v50  ;;  %4061 = vmatprep.subr.bf16.mxu1 %v9083_v52 }
 0x206   : > { %4143 = vmatprep.subr.bf16.mxu0 %v9086_v53  ;;  %v295_v53 = vlaneseq }
 0x208   : > { %4062 = vmatpush1.bf16.msra.mxu1 %v9081_v56  ;;  %v9856_v56 = vmov 1966171168   ;;  %vm10310_vm0 = vcmp.lt.s32.totalorder %v295_v53, 384  ;;  %vm7218_vm1 = vcmp.lt.s32.totalorder %v295_v53, 512 }
 0x209   : > { %4144 = vmatpush1.bf16.msra.mxu0 %v9084_v57  ;;  %4063 = vmatprep.subr.bf16.mxu1 %v9089_v58  ;;  %v4407_v57 = vunpack.c.l.s4 %v9856_v56  ;;  %v9216_v56 = vld [vmem:[%s11266_s3 + $0x28] ss:$16 sps:$4 sm:$0xff]  }
 0x20a   : > { %4145 = vmatprep.subr.bf16.mxu0 %v9092_v59  ;;  %v9146_v59 = vld [vmem:[#allocation3 + $0xd88] ss:$44 sps:$4 sm:$0xff]  }
 0x20c   : > { %4064 = vmatpush1.bf16.msra.mxu1 %v9087_v60  ;;  %v9150_v60 = vld [vmem:[#allocation3 + $0x290] ss:$44 sps:$4 sm:$0xff]  }
 0x20d   : > { %4146 = vmatpush1.bf16.msra.mxu0 %v9090_v61  ;;  %4065 = vmatprep.subr.bf16.mxu1 %v9095_v62  ;;  %v9153_v62 = vld [vmem:[#allocation3 + $0xde4] ss:$44 sps:$4 sm:$0xff]  }
 0x20e   : > { %4147 = vmatprep.subr.bf16.mxu0 %v9098_v63  ;;  %v9154_v63 = vld [vmem:[#allocation3 + $0x868] ss:$44 sps:$4 sm:$0xff]  }
 0x210   : > { %4066 = vmatpush1.bf16.msra.mxu1 %v9093_v0 }
 0x211   : > { %4148 = vmatpush1.bf16.msra.mxu0 %v9096_v1  ;;  %4067 = vmatprep.subr.bf16.mxu1 %v9101_v2  ;;  %v4408_v2 = vunpack.c.0.s8 %v4407_v57  ;;  %v9224_v57 = vld [vmem:[%s11266_s3 + $0x4c] ss:$16 sps:$4 sm:$0xff]  }
 0x212   : > { %4149 = vmatprep.subr.bf16.mxu0 %v9104_v3  ;;  %v10083_v3 = vshrl.u32 %v295_v53, 7 }
 0x214   : > { %4068 = vmatpush1.bf16.msra.mxu1 %v9099_v4 }
 0x215   : > { %4150 = vmatpush1.bf16.msra.mxu0 %v9102_v5  ;;  %4069 = vmatprep.subr.bf16.mxu1 %v9107_v8  ;;  %v9151_v5 = vld [vmem:[#allocation3 + $0xde0] ss:$44 sps:$4 sm:$0xff]   ;;  %v9155_v8 = vld [vmem:[#allocation3 + $0x5a8] ss:$44 sps:$4 sm:$0xff]  }
 0x216   : > { %4151 = vmatprep.subr.bf16.mxu0 %v9110_v9 }
 0x218   : > { %4070 = vmatpush1.bf16.msra.mxu1 %v9105_v10  ;;  %v9158_v10 = vld [vmem:[#allocation3 + $0xe3c] ss:$44 sps:$4 sm:$0xff]  }
 0x219   : > { %4152 = vmatpush1.bf16.msra.mxu0 %v9108_v11  ;;  %8224 = vmatprep.subr.bf16.mxu1 %v9114_v13  ;;  %v9159_v11 = vld [vmem:[#allocation3 + $0x8c0] ss:$44 sps:$4 sm:$0xff]  }
 0x21a   : > { %4162 = vmatprep.subr.bf16.mxu0 %v9113_v12 }
 0x21b   : > { %4072 = vmatmul.mubr.bf16.vlgmr.msra.gmra.mrb[8].mxu1 %v10044_v14 }
 0x21c   : > { %4154 = vmatmul.mubr.bf16.vlgmr.msra.gmra.mrb[8].mxu0 %v10029_v7  ;;  %8225 = vmatpush3.bf16.msra.mxu1 %v9115_v16 }
 0x21d   : > { %4163 = vmatpush1.bf16.msra.mxu0 %v9111_v15  ;;  %8226 = vmatprep.subr.bf16.mxu1 %v9119_v18  ;;  %v10086_v15 = vsub.s32 %v4408_v2, %v10083_v3  ;;  %v9160_v18 = vld [vmem:[#allocation3 + $0x600] ss:$44 sps:$4 sm:$0xff]  }
 0x21e   : > { %4164 = vmatprep.subr.bf16.mxu0 %v9118_v17  ;;  %4235 = vmatprep.mubr.bf16.mxu1 %v10020_v47  ;;  %v9139_v47 = vld [vmem:[#allocation3 + $0x4a0] ss:$44 sps:$4 sm:$0xff]   ;;  %v9156_v17 = vld [vmem:[#allocation3 + $0xe38] ss:$44 sps:$4 sm:$0xff]  }
 0x21f   : > { %4194 = vmatprep.mubr.bf16.mxu0 %v10039_v34  ;;  %v9234_v2 = vld [vmem:[%s11266_s3 + $0x88] ss:$16 sps:$4 sm:$0xff]  }
 0x220   : > { %8227 = vmatpush3.bf16.msra.mxu1 %v9120_v20  ;;  %v9164_v20 = vld [vmem:[#allocation3 + $0x918] ss:$44 sps:$4 sm:$0xff]  }
 0x221   : > { %4165 = vmatpush1.bf16.msra.mxu0 %v9116_v19  ;;  %8228 = vmatprep.subr.bf16.mxu1 %v9124_v55  ;;  %v9163_v19 = vld [vmem:[#allocation3 + $0xe94] ss:$44 sps:$4 sm:$0xff]   ;;  %v10093_v55 = vrot.slane %v4402_v38, %v10086_v15 }
 0x222   : > { %4166 = vmatprep.subr.bf16.mxu0 %v9123_v54  ;;  %v9174_v38 = vld [vmem:[#allocation3 + $0x9c8] ss:$44 sps:$4 sm:$0xff]  }
 0x224   : > { %8229 = vmatpush3.bf16.msra.mxu1 %v9125_v22  ;;  %v9161_v22 = vld [vmem:[#allocation3 + $0xe90] ss:$44 sps:$4 sm:$0xff]  }
 0x225   : > { %4167 = vmatpush1.bf16.msra.mxu0 %v9121_v21  ;;  %8230 = vmatprep.subr.bf16.mxu1 %v9129_v24  ;;  %v9169_v24 = vld [vmem:[#allocation3 + $0x970] ss:$44 sps:$4 sm:$0xff]  }
 0x226   : > { %4168 = vmatprep.subr.bf16.mxu0 %v9128_v23  ;;  %v9165_v23 = vld [vmem:[#allocation3 + $0x658] ss:$44 sps:$4 sm:$0xff]  }
 0x228   : > { %8231 = vmatpush3.bf16.msra.mxu1 %v9130_v26  ;;  %v9166_v26 = vld [vmem:[#allocation3 + $0xee8] ss:$44 sps:$4 sm:$0xff]  }
 0x229   : > { %4169 = vmatpush1.bf16.msra.mxu0 %v9126_v25  ;;  %8232 = vmatprep.subr.bf16.mxu1 %v9134_v28  ;;  %v9178_v28 = vld [vmem:[#allocation3 + $0xf9c] ss:$44 sps:$4 sm:$0xff]  }
 0x22a   : > { %4170 = vmatprep.subr.bf16.mxu0 %v9133_v27  ;;  %v9175_v27 = vld [vmem:[#allocation3 + $0x708] ss:$44 sps:$4 sm:$0xff]  }
 0x22c   : > { %8233 = vmatpush3.bf16.msra.mxu1 %v9135_v30  ;;  %v9176_v30 = vld [vmem:[#allocation3 + $0xf98] ss:$44 sps:$4 sm:$0xff]  }
 0x22d   : > { %4171 = vmatpush1.bf16.msra.mxu0 %v9131_v29  ;;  %8234 = vmatprep.subr.bf16.mxu1 %v9139_v47  ;;  %v9179_v29 = vld [vmem:[#allocation3 + $0xa20] ss:$44 sps:$4 sm:$0xff]  }
 0x22e   : > { %4172 = vmatprep.subr.bf16.mxu0 %v9138_v31  ;;  %v3827_v40 = vpop.f32.mrb[4].mxu1  ;;  %v9180_v31 = vld [vmem:[#allocation3 + $0x760] ss:$44 sps:$4 sm:$0xff]  }
 0x22f   : > { %v4337_v43 = vrot.slane %v3827_v40, 4  ;;  %v3829_v44 = vpop.f32.mrb[5].mxu1  ;;  %v9183_v47 = vld [vmem:[#allocation3 + $0xff4] ss:$44 sps:$4 sm:$0xff]  }
 0x230   : > { %v4343_v48 = vrot.slane %v3829_v44, 4  ;;  %v3831_v49 = vpop.f32.mrb[6].mxu1  ;;  %8235 = vmatpush3.bf16.msra.mxu1 %v9140_v36  ;;  %v9181_v36 = vld [vmem:[#allocation3 + $0xff0] ss:$44 sps:$4 sm:$0xff]  }
 0x231   : > { %4173 = vmatpush1.bf16.msra.mxu0 %v9136_v32  ;;  %v4338_v50 = vadd.f32 %v4337_v43, %v3827_v40  ;;  %v3832_v52 = vpop.f32.mrb[7].mxu1  ;;  %8236 = vmatprep.subr.bf16.mxu1 %v9144_v39  ;;  %v9184_v32 = vld [vmem:[#allocation3 + $0xa78] ss:$44 sps:$4 sm:$0xff]   ;;  %v9189_v40 = vld [vmem:[#allocation3 + $0xad0] ss:$44 sps:$4 sm:$0xff]  }
 0x232   : > { %4174 = vmatprep.subr.bf16.mxu0 %v9143_v37  ;;  %v4344_v58 = vadd.f32 %v4343_v48, %v3829_v44  ;;  %v9185_v37 = vld [vmem:[#allocation3 + $0x7b8] ss:$44 sps:$4 sm:$0xff]   ;;  %v9191_v43 = vld [vmem:[#allocation3 + $0xde8] ss:$44 sps:$4 sm:$0xff]   ;;  %v9210_v48 = vld [vmem:[%s11266_s3 + $0x8] ss:$16 sps:$4 sm:$0xff]  }
 0x233   : > { %v4339_v61 = vrot.slane %v4338_v50, 2  ;;  %v9188_v39 = vld [vmem:[#allocation3 + $0x104c] ss:$44 sps:$4 sm:$0xff]   ;;  %v9212_v44 = vld [vmem:[%s11266_s3 + $0xc] ss:$16 sps:$4 sm:$0xff]  }
 0x234   : > { %v4345_v0 = vrot.slane %v4344_v58, 2  ;;  %8237 = vmatpush3.bf16.msra.mxu1 %v9145_v42  ;;  %v9190_v42 = vld [vmem:[#allocation3 + $0x810] ss:$44 sps:$4 sm:$0xff]   ;;  %v9195_v52 = vld [vmem:[#allocation3 + $0xe98] ss:$44 sps:$4 sm:$0xff]  }
 0x235   : > { %4175 = vmatpush1.bf16.msra.mxu0 %v9141_v41  ;;  %v4340_v1 = vadd.f32 %v4339_v61, %v4338_v50  ;;  %8238 = vmatprep.subr.bf16.mxu1 %v9149_v46  ;;  %v9186_v41 = vld [vmem:[#allocation3 + $0x1048] ss:$44 sps:$4 sm:$0xff]   ;;  %v9193_v46 = vld [vmem:[#allocation3 + $0xe40] ss:$44 sps:$4 sm:$0xff]  }
 0x236   : > { %4176 = vmatprep.subr.bf16.mxu0 %v9148_v45  ;;  %v4346_v4 = vadd.f32 %v4345_v0, %v4344_v58  ;;  %v9192_v45 = vld [vmem:[#allocation3 + $0xb28] ss:$44 sps:$4 sm:$0xff]   ;;  %v9194_v50 = vld [vmem:[#allocation3 + $0xb80] ss:$44 sps:$4 sm:$0xff]   ;;  %v9196_v58 = vld [vmem:[#allocation3 + $0xbd8] ss:$44 sps:$4 sm:$0xff]  }
 0x237   : > { %v4341_v9 = vrot.slane %v4340_v1, 1  ;;  %v9218_v49 = vld [vmem:[%s11266_s3 + $0x2c] ss:$16 sps:$4 sm:$0xff]  }
 0x238   : > { %v4347_v12 = vrot.slane %v4346_v4, 1  ;;  %8239 = vmatpush3.bf16.msra.mxu1 %v9150_v60  ;;  %v9198_v60 = vld [vmem:[#allocation3 + $0xc30] ss:$44 sps:$4 sm:$0xff]   ;;  %v9199_v61 = vld [vmem:[#allocation3 + $0xf48] ss:$44 sps:$4 sm:$0xff]  }
 0x239   : > { %4177 = vmatpush1.bf16.msra.mxu0 %v9146_v59  ;;  %v4342_v13 = vadd.f32 %v4341_v9, %v4340_v1  ;;  %8246 = vmatprep.subr.bf16.mxu1 %v9154_v63  ;;  %v9230_v59 = vld [vmem:[%s11266_s3 + $0x6c] ss:$16 sps:$4 sm:$0xff]   ;;  %v9240_v9 = vld [vmem:[%s11266_s3 + $0xa8] ss:$16 sps:$4 sm:$0xff]  }
 0x23a   : > { %4178 = vmatprep.subr.bf16.mxu0 %v9153_v62  ;;  %v4348_v16 = vadd.f32 %v4347_v12, %v4346_v4  ;;  %v9228_v62 = vld [vmem:[%s11266_s3 + $0x68] ss:$16 sps:$4 sm:$0xff]   ;;  %v9236_v63 = vld [vmem:[%s11266_s3 + $0x8c] ss:$16 sps:$4 sm:$0xff]  }
 0x23b   : > { %4236 = vmatmul.mubr.bf16.vlgmr.msra.gmra.mrb[12].mxu1 %v10027_v6  ;;  %v9168_v6 = vld [vmem:[#allocation3 + $0xeec] ss:$44 sps:$4 sm:$0xff]   ;;  %v9200_v0 = vld [vmem:[#allocation3 + $0xc88] ss:$44 sps:$4 sm:$0xff]  }
 0x23c   : > { %v4403_v54 = vcombine.low %v4342_v13, %v4348_v16  ;;  %8247 = vmatpush3.bf16.msra.mxu1 %v9155_v8  ;;  %4275 = vmatprep.mubr.bf16.mxu1 %v10023_v51  ;;  %v9171_v51 = vld [vmem:[#allocation3 + $0xf40] ss:$44 sps:$4 sm:$0xff]   ;;  %v9203_v8 = vld [vmem:[#allocation3 + $0xff8] ss:$44 sps:$4 sm:$0xff]  }
 0x23d   : > { %4179 = vmatpush1.bf16.msra.mxu0 %v9151_v5  ;;  %8248 = vmatprep.subr.bf16.mxu1 %v9159_v11  ;;  %v9201_v1 = vld [vmem:[#allocation3 + $0xfa0] ss:$44 sps:$4 sm:$0xff]  }
 0x23e   : > { %4180 = vmatprep.subr.bf16.mxu0 %v9158_v10  ;;  %v10096_v21 = vrot.slane %v4403_v54, %v10086_v15  ;;  %v9242_v4 = vld [vmem:[%s11266_s3 + $0xac] ss:$16 sps:$4 sm:$0xff]  }
 0x23f   : > { %v9202_v5 = vld [vmem:[#allocation3 + $0xce0] ss:$44 sps:$4 sm:$0xff]   ;;  %v9205_v54 = vld [vmem:[#allocation3 + $0x1050] ss:$44 sps:$4 sm:$0xff]  }
 0x240   : > { %v4434_v25 = vcombine.low %v10093_v55, %v10096_v21  ;;  %8249 = vmatpush3.bf16.msra.mxu1 %v9160_v18  ;;  %v9248_v11 = vld [vmem:[%s11266_s3 + $0xcc] ss:$16 sps:$4 sm:$0xff]  }
 0x241   : > { %4181 = vmatpush1.bf16.msra.mxu0 %v9156_v17  ;;  %8250 = vmatprep.subr.bf16.mxu1 %v9164_v20  ;;  %v9204_v18 = vld [vmem:[#allocation3 + $0xd38] ss:$44 sps:$4 sm:$0xff]  }
 0x242   : > { %4182 = vmatprep.subr.bf16.mxu0 %v9163_v19 }
 0x244   : > { %8251 = vmatpush3.bf16.msra.mxu1 %v9165_v23 }
 0x245   : > { %4183 = vmatpush1.bf16.msra.mxu0 %v9161_v22  ;;  %8252 = vmatprep.subr.bf16.mxu1 %v9169_v24  ;;  %v9246_v22 = vld [vmem:[%s11266_s3 + $0xc8] ss:$16 sps:$4 sm:$0xff]  }
 0x246   : > { %4184 = vmatprep.subr.bf16.mxu0 %v9168_v6  ;;  %v9254_v6 = vld [vmem:[%s11266_s3 + $0xec] ss:$16 sps:$4 sm:$0xff]  }
 0x248   : > { %8253 = vmatpush3.bf16.msra.mxu1 %v9170_v33  ;;  %v9206_v33 = vld [vmem:[#allocation3 + $0xd90] ss:$44 sps:$4 sm:$0xff]  }
 0x249   : > { %4185 = vmatpush1.bf16.msra.mxu0 %v9166_v26  ;;  %8254 = vmatprep.subr.bf16.mxu1 %v9174_v38  ;;  %v9209_v38 = vld [vmem:[%s11266_s3 + $0x4] ss:$16 sps:$4 sm:$0xff]  }
 0x24a   : > { %4186 = vmatprep.subr.bf16.mxu0 %v9173_v35 }
 0x24c   : > { %8255 = vmatpush3.bf16.msra.mxu1 %v9175_v27 }
 0x24d   : > { %4187 = vmatpush1.bf16.msra.mxu0 %v9171_v51  ;;  %8256 = vmatprep.subr.bf16.mxu1 %v9179_v29  ;;  %v9252_v51 = vld [vmem:[%s11266_s3 + $0xe8] ss:$16 sps:$4 sm:$0xff]  }
 0x24e   : > { %4188 = vmatprep.subr.bf16.mxu0 %v9178_v28  ;;  %v9260_v28 = vld [vmem:[%s11266_s3 + $0x10c] ss:$16 sps:$4 sm:$0xff]  }
 0x250   : > { %8257 = vmatpush3.bf16.msra.mxu1 %v9180_v31  ;;  %v9207_v31 = vld [vmem:[%s11266_s3] ss:$16 sps:$4 sm:$0xff]  }
 0x251   : > { %4189 = vmatpush1.bf16.msra.mxu0 %v9176_v30  ;;  %8258 = vmatprep.subr.bf16.mxu1 %v9184_v32  ;;  %v9215_v32 = vld [vmem:[%s11266_s3 + $0x24] ss:$16 sps:$4 sm:$0xff]  }
 0x252   : > { %4190 = vmatprep.subr.bf16.mxu0 %v9183_v47 }
 0x254   : > { %8259 = vmatpush3.bf16.msra.mxu1 %v9185_v37 }
 0x255   : > { %4191 = vmatpush1.bf16.msra.mxu0 %v9181_v36  ;;  %8260 = vmatprep.subr.bf16.mxu1 %v9189_v40  ;;  %v9258_v36 = vld [vmem:[%s11266_s3 + $0x108] ss:$16 sps:$4 sm:$0xff]  }
 0x256   : > { %4192 = vmatprep.subr.bf16.mxu0 %v9188_v39  ;;  %v9266_v39 = vld [vmem:[%s11266_s3 + $0x12c] ss:$16 sps:$4 sm:$0xff]  }
 0x258   : > { %8261 = vmatpush3.bf16.msra.mxu1 %v9190_v42  ;;  %v9221_v42 = vld [vmem:[%s11266_s3 + $0x44] ss:$16 sps:$4 sm:$0xff]  }
 0x259   : > { %4193 = vmatpush1.bf16.msra.mxu0 %v9186_v41  ;;  %8268 = vmatprep.subr.bf16.mxu1 %v9191_v43  ;;  %v9213_v41 = vld [vmem:[%s11266_s3 + $0x20] ss:$16 sps:$4 sm:$0xff]   ;;  %v9264_v43 = vld [vmem:[%s11266_s3 + $0x128] ss:$16 sps:$4 sm:$0xff]  }
 0x25a   : > { %6943 = vmatprep.subr.bf16.mxu0 %v9212_v44  ;;  %v9219_v44 = vld [vmem:[%s11266_s3 + $0x40] ss:$16 sps:$4 sm:$0xff]  }
 0x25b   : > { %4276 = vmatmul.mubr.bf16.vlgmr.msra.gmra.mrb[16].mxu1 %v10029_v7  ;;  %v9197_v7 = vld [vmem:[#allocation3 + $0xef0] ss:$44 sps:$4 sm:$0xff]  }
 0x25c   : > { %4195 = vmatmul.mubr.bf16.vlgmr.msra.gmra.mrb[8].mxu0 %v10044_v14  ;;  %8269 = vmatpush3.bf16.msra.mxu1 %v9192_v45  ;;  %v9227_v45 = vld [vmem:[%s11266_s3 + $0x64] ss:$16 sps:$4 sm:$0xff]  }
 0x25d   : > { %4315 = vmatprep.mubr.bf16.mxu1 %v10039_v34  ;;  %8270 = vmatprep.subr.bf16.mxu1 %v9193_v46  ;;  %v9222_v34 = vld [vmem:[%s11266_s3 + $0x48] ss:$16 sps:$4 sm:$0xff]  }
 0x25e   : > { %6944 = vmatpush1.bf16.msra.mxu0 %v9210_v48  ;;  %v9270_v46 = vld [vmem:[%s11266_s3 + $0x148] ss:$16 sps:$4 sm:$0xff]   ;;  %v9278_v48 = vld [vmem:[%s11266_s3 + $0x16c] ss:$16 sps:$4 sm:$0xff]  }
 0x25f   : > { %6945 = vmatprep.subr.bf16.mxu0 %v9218_v49  ;;  %v9225_v49 = vld [vmem:[%s11266_s3 + $0x60] ss:$16 sps:$4 sm:$0xff]  }
 0x260   : > { %8271 = vmatpush3.bf16.msra.mxu1 %v9194_v50  ;;  %v9233_v50 = vld [vmem:[%s11266_s3 + $0x84] ss:$16 sps:$4 sm:$0xff]  }
 0x261   : > { %8272 = vmatprep.subr.bf16.mxu1 %v9195_v52  ;;  %v9276_v52 = vld [vmem:[%s11266_s3 + $0x168] ss:$16 sps:$4 sm:$0xff]  }
 0x262   : > { %6946 = vmatpush1.bf16.msra.mxu0 %v9216_v56  ;;  %v9284_v56 = vld [vmem:[%s11266_s3 + $0x18c] ss:$16 sps:$4 sm:$0xff]  }
 0x263   : > { %6947 = vmatprep.subr.bf16.mxu0 %v9224_v57  ;;  %v9231_v57 = vld [vmem:[%s11266_s3 + $0x80] ss:$16 sps:$4 sm:$0xff]  }
 0x264   : > { %8273 = vmatpush3.bf16.msra.mxu1 %v9196_v58  ;;  %v9239_v58 = vld [vmem:[%s11266_s3 + $0xa4] ss:$16 sps:$4 sm:$0xff]  }
 0x265   : > { %8274 = vmatprep.subr.bf16.mxu1 %v9197_v7  ;;  %v9282_v7 = vld [vmem:[%s11266_s3 + $0x188] ss:$16 sps:$4 sm:$0xff]  }
 0x266   : > { %6948 = vmatpush1.bf16.msra.mxu0 %v9222_v34  ;;  %v9290_v34 = vld [vmem:[%s11266_s3 + $0x1ac] ss:$16 sps:$4 sm:$0xff]  }
 0x267   : > { %6949 = vmatprep.subr.bf16.mxu0 %v9230_v59  ;;  %v9237_v59 = vld [vmem:[%s11266_s3 + $0xa0] ss:$16 sps:$4 sm:$0xff]  }
 0x268   : > { %8275 = vmatpush3.bf16.msra.mxu1 %v9198_v60  ;;  %v9245_v60 = vld [vmem:[%s11266_s3 + $0xc4] ss:$16 sps:$4 sm:$0xff]  }
 0x269   : > { %8276 = vmatprep.subr.bf16.mxu1 %v9199_v61  ;;  %v9288_v61 = vld [vmem:[%s11266_s3 + $0x1a8] ss:$16 sps:$4 sm:$0xff]  }
 0x26a   : > { %6950 = vmatpush1.bf16.msra.mxu0 %v9228_v62  ;;  %v9296_v62 = vld [vmem:[%s11266_s3 + $0x1cc] ss:$16 sps:$4 sm:$0xff]  }
 0x26b   : > { %6951 = vmatprep.subr.bf16.mxu0 %v9236_v63  ;;  %v9243_v63 = vld [vmem:[%s11266_s3 + $0xc0] ss:$16 sps:$4 sm:$0xff]  }
 0x26c   : > { %8277 = vmatpush3.bf16.msra.mxu1 %v9200_v0  ;;  %v9251_v0 = vld [vmem:[%s11266_s3 + $0xe4] ss:$16 sps:$4 sm:$0xff]  }
 0x26d   : > { %8278 = vmatprep.subr.bf16.mxu1 %v9201_v1  ;;  %v9294_v1 = vld [vmem:[%s11266_s3 + $0x1c8] ss:$16 sps:$4 sm:$0xff]  }
 0x26e   : > { %6952 = vmatpush1.bf16.msra.mxu0 %v9234_v2  ;;  %v9302_v2 = vld [vmem:[%s11266_s3 + $0x1ec] ss:$16 sps:$4 sm:$0xff]  }
 0x26f   : > { %v3950_v10 = vpop.f32.mrb[4].mxu0  ;;  %6953 = vmatprep.subr.bf16.mxu0 %v9242_v4  ;;  %v9249_v4 = vld [vmem:[%s11266_s3 + $0xe0] ss:$16 sps:$4 sm:$0xff]  }
 0x270   : > { %v4349_v12 = vrot.slane %v3950_v10, 4  ;;  %v3952_v13 = vpop.f32.mrb[5].mxu0  ;;  %8279 = vmatpush3.bf16.msra.mxu1 %v9202_v5  ;;  %v9257_v5 = vld [vmem:[%s11266_s3 + $0x104] ss:$16 sps:$4 sm:$0xff]  }
 0x271   : > { %v4355_v16 = vrot.slane %v3952_v13, 4  ;;  %v3954_v17 = vpop.f32.mrb[6].mxu0  ;;  %8280 = vmatprep.subr.bf16.mxu1 %v9203_v8  ;;  %v9300_v8 = vld [vmem:[%s11266_s3 + $0x1e8] ss:$16 sps:$4 sm:$0xff]  }
 0x272   : > { %v4350_v19 = vadd.f32 %v4349_v12, %v3950_v10  ;;  %v3955_v20 = vpop.f32.mrb[7].mxu0  ;;  %6954 = vmatpush1.bf16.msra.mxu0 %v9240_v9  ;;  %v9308_v9 = vld [vmem:[%s11266_s3 + $0x20c] ss:$16 sps:$4 sm:$0xff]   ;;  %v9255_v10 = vld [vmem:[%s11266_s3 + $0x100] ss:$16 sps:$4 sm:$0xff]  }
 0x273   : > { %v4356_v23 = vadd.f32 %v4355_v16, %v3952_v13  ;;  %6955 = vmatprep.subr.bf16.mxu0 %v9248_v11  ;;  %v9263_v11 = vld [vmem:[%s11266_s3 + $0x124] ss:$16 sps:$4 sm:$0xff]   ;;  %v9261_v12 = vld [vmem:[%s11266_s3 + $0x120] ss:$16 sps:$4 sm:$0xff]  }
 0x274   : > { %v4351_v24 = vrot.slane %v4350_v19, 2  ;;  %8281 = vmatpush3.bf16.msra.mxu1 %v9204_v18  ;;  %v9269_v13 = vld [vmem:[%s11266_s3 + $0x144] ss:$16 sps:$4 sm:$0xff]   ;;  %v9267_v16 = vld [vmem:[%s11266_s3 + $0x140] ss:$16 sps:$4 sm:$0xff]  }
 0x275   : > { %v4357_v26 = vrot.slane %v4356_v23, 2  ;;  %8282 = vmatprep.subr.bf16.mxu1 %v9205_v54  ;;  %v9275_v17 = vld [vmem:[%s11266_s3 + $0x164] ss:$16 sps:$4 sm:$0xff]   ;;  %v9273_v18 = vld [vmem:[%s11266_s3 + $0x160] ss:$16 sps:$4 sm:$0xff]  }
 0x276   : > { %v4352_v35 = vadd.f32 %v4351_v24, %v4350_v19  ;;  %6956 = vmatpush1.bf16.msra.mxu0 %v9246_v22  ;;  %v9281_v19 = vld [vmem:[%s11266_s3 + $0x184] ss:$16 sps:$4 sm:$0xff]   ;;  %v9279_v20 = vld [vmem:[%s11266_s3 + $0x180] ss:$16 sps:$4 sm:$0xff]  }
 0x277   : > { %v4358_v27 = vadd.f32 %v4357_v26, %v4356_v23  ;;  %6957 = vmatprep.subr.bf16.mxu0 %v9254_v6  ;;  %v9287_v54 = vld [vmem:[%s11266_s3 + $0x1a4] ss:$16 sps:$4 sm:$0xff]   ;;  %v9285_v22 = vld [vmem:[%s11266_s3 + $0x1a0] ss:$16 sps:$4 sm:$0xff]  }
 0x278   : > { %v4353_v29 = vrot.slane %v4352_v35, 1  ;;  %8283 = vmatpush3.bf16.msra.mxu1 %v9206_v33  ;;  %v9293_v23 = vld [vmem:[%s11266_s3 + $0x1c4] ss:$16 sps:$4 sm:$0xff]   ;;  %v9291_v6 = vld [vmem:[%s11266_s3 + $0x1c0] ss:$16 sps:$4 sm:$0xff]  }
 0x279   : > { %v4359_v30 = vrot.slane %v4358_v27, 1  ;;  %6697 = vmatprep.subr.bf16.mxu1 %v9209_v38  ;;  %v9299_v24 = vld [vmem:[%s11266_s3 + $0x1e4] ss:$16 sps:$4 sm:$0xff]   ;;  %v9297_v26 = vld [vmem:[%s11266_s3 + $0x1e0] ss:$16 sps:$4 sm:$0xff]   ;;  %v9857_v38 = vmov 0.0  }
 0x27a   : > { %v10161_v47 = vadd.f32 %v4353_v29, %v4352_v35  ;;  %6958 = vmatpush1.bf16.msra.mxu0 %v9252_v51  ;;  %v9305_v33 = vld [vmem:[%s11266_s3 + $0x204] ss:$16 sps:$4 sm:$0xff]   ;;  %299 = vst.msk [vmem:[#allocation2 + $0x8] sm:$0x7] %vm10310_vm0, %v9857_v38  ;;  %v9338_v38 = vld [vmem:[%s11266_s3 + $0x2ac] ss:$16 sps:$4 sm:$0xff]  }
 0x27b   : > { %v10169_v37 = vadd.f32 %v4359_v30, %v4358_v27  ;;  %6959 = vmatprep.subr.bf16.mxu0 %v9260_v28  ;;  %4316 = vmatmul.mubr.bf16.vlgmr.msra.gmra.mrb[20].mxu1 %v10044_v14  ;;  %v9272_v14 = vld [vmem:[%s11266_s3 + $0x14c] ss:$16 sps:$4 sm:$0xff]   ;;  %v9449_v35 = vld [vmem:[%s11266_s3 + $0x504] ss:$16 sps:$4 sm:$0xff]  }
 0x27c   : > { %6698 = vmatpush1.bf16.msra.mxu1 %v9207_v31 }
 0x27d   : > { %v4404_v40 = vcombine.low %v10161_v47, %v10169_v37  ;;  %6699 = vmatprep.subr.bf16.mxu1 %v9215_v32  ;;  %v4511_v47 = vsub.s32 3, %v10083_v3 }
 0x27e   : > { %6960 = vmatpush1.bf16.msra.mxu0 %v9258_v36 }
 0x27f   : > { %6961 = vmatprep.subr.bf16.mxu0 %v9266_v39 }
 0x280   : > { %6700 = vmatpush1.bf16.msra.mxu1 %v9213_v41 }
 0x281   : > { %6701 = vmatprep.subr.bf16.mxu1 %v9221_v42 }
 0x282   : > { %6962 = vmatpush1.bf16.msra.mxu0 %v9264_v43 }
 0x283   : > { %6963 = vmatprep.subr.bf16.mxu0 %v9272_v14 }
 0x284   : > { %6702 = vmatpush1.bf16.msra.mxu1 %v9219_v44 }
 0x285   : > { %6703 = vmatprep.subr.bf16.mxu1 %v9227_v45 }
 0x286   : > { %6964 = vmatpush1.bf16.msra.mxu0 %v9270_v46 }
 0x287   : > { %6965 = vmatprep.subr.bf16.mxu0 %v9278_v48 }
 0x288   : > { %6704 = vmatpush1.bf16.msra.mxu1 %v9225_v49  ;;  %v4426_v49 = vrot.slane %v4404_v40, %v10086_v15 }
 0x289   : > { %6705 = vmatprep.subr.bf16.mxu1 %v9233_v50 }
 0x28a   : > { %6966 = vmatpush1.bf16.msra.mxu0 %v9276_v52 }
 0x28b   : > { %6967 = vmatprep.subr.bf16.mxu0 %v9284_v56  ;;  %v4442_v56 = vrot.slane %v4434_v25, %v10086_v15 }
 0x28c   : > { %6706 = vmatpush1.bf16.msra.mxu1 %v9231_v57 }
 0x28d   : > { %6707 = vmatprep.subr.bf16.mxu1 %v9239_v58 }
 0x28e   : > { %6968 = vmatpush1.bf16.msra.mxu0 %v9282_v7  ;;  %v4491_v7 = vld [vmem:[#allocation5] sm:$0xff] }
 0x28f   : > { %6969 = vmatprep.subr.bf16.mxu0 %v9290_v34 }
 0x290   : > { %6708 = vmatpush1.bf16.msra.mxu1 %v9237_v59  ;;  %v10327_v59 = vsub.s32 1, %v10083_v3 }
 0x291   : > { %6709 = vmatprep.subr.bf16.mxu1 %v9245_v60  ;;  %v10330_v60 = vsub.s32 0, %v10083_v3 }
 0x292   : > { %6970 = vmatpush1.bf16.msra.mxu0 %v9288_v61  ;;  %v9303_v61 = vld [vmem:[%s11266_s3 + $0x200] ss:$16 sps:$4 sm:$0xff]  }
 0x293   : > { %6971 = vmatprep.subr.bf16.mxu0 %v9296_v62  ;;  %v9306_v62 = vld [vmem:[%s11266_s3 + $0x208] ss:$16 sps:$4 sm:$0xff]  }
 0x294   : > { %6710 = vmatpush1.bf16.msra.mxu1 %v9243_v63 }
 0x295   : > { %6711 = vmatprep.subr.bf16.mxu1 %v9251_v0 }
 0x296   : > { %6972 = vmatpush1.bf16.msra.mxu0 %v9294_v1 }
 0x297   : > { %6973 = vmatprep.subr.bf16.mxu0 %v9302_v2  ;;  %v9311_v2 = vld [vmem:[%s11266_s3 + $0x224] ss:$16 sps:$4 sm:$0xff]  }
 0x298   : > { %6712 = vmatpush1.bf16.msra.mxu1 %v9249_v4  ;;  %v9314_v4 = vld [vmem:[%s11266_s3 + $0x22c] ss:$16 sps:$4 sm:$0xff]  }
 0x299   : > { %6713 = vmatprep.subr.bf16.mxu1 %v9257_v5 }
 0x29a   : > { %6974 = vmatpush1.bf16.msra.mxu0 %v9300_v8 }
 0x29b   : > { %6984 = vmatprep.subr.bf16.mxu0 %v9308_v9 }
 0x29c   : > { %6714 = vmatpush1.bf16.msra.mxu1 %v9255_v10 }
 0x29d   : > { %6715 = vmatprep.subr.bf16.mxu1 %v9263_v11  ;;  %v9309_v11 = vld [vmem:[%s11266_s3 + $0x220] ss:$16 sps:$4 sm:$0xff]  }
 0x2a0   : > { %6716 = vmatpush1.bf16.msra.mxu1 %v9261_v12  ;;  %v9312_v12 = vld [vmem:[%s11266_s3 + $0x228] ss:$16 sps:$4 sm:$0xff]  }
 0x2a1   : > { %6717 = vmatprep.subr.bf16.mxu1 %v9269_v13  ;;  %v9317_v13 = vld [vmem:[%s11266_s3 + $0x244] ss:$16 sps:$4 sm:$0xff]  }
 0x2a4   : > { %6718 = vmatpush1.bf16.msra.mxu1 %v9267_v16  ;;  %v9320_v16 = vld [vmem:[%s11266_s3 + $0x24c] ss:$16 sps:$4 sm:$0xff]  }
 0x2a5   : > { %6719 = vmatprep.subr.bf16.mxu1 %v9275_v17  ;;  %v9315_v17 = vld [vmem:[%s11266_s3 + $0x240] ss:$16 sps:$4 sm:$0xff]  }
 0x2a8   : > { %6720 = vmatpush1.bf16.msra.mxu1 %v9273_v18  ;;  %v9318_v18 = vld [vmem:[%s11266_s3 + $0x248] ss:$16 sps:$4 sm:$0xff]  }
 0x2a9   : > { %6721 = vmatprep.subr.bf16.mxu1 %v9281_v19  ;;  %v9323_v19 = vld [vmem:[%s11266_s3 + $0x264] ss:$16 sps:$4 sm:$0xff]  }
 0x2ac   : > { %6722 = vmatpush1.bf16.msra.mxu1 %v9279_v20  ;;  %v9326_v20 = vld [vmem:[%s11266_s3 + $0x26c] ss:$16 sps:$4 sm:$0xff]  }
 0x2ad   : > { %6723 = vmatprep.subr.bf16.mxu1 %v9287_v54  ;;  %v9321_v54 = vld [vmem:[%s11266_s3 + $0x260] ss:$16 sps:$4 sm:$0xff]  }
 0x2b0   : > { %6724 = vmatpush1.bf16.msra.mxu1 %v9285_v22  ;;  %v9324_v22 = vld [vmem:[%s11266_s3 + $0x268] ss:$16 sps:$4 sm:$0xff]  }
 0x2b1   : > { %6725 = vmatprep.subr.bf16.mxu1 %v9293_v23  ;;  %v9329_v23 = vld [vmem:[%s11266_s3 + $0x284] ss:$16 sps:$4 sm:$0xff]  }
 0x2b4   : > { %6726 = vmatpush1.bf16.msra.mxu1 %v9291_v6  ;;  %v9332_v6 = vld [vmem:[%s11266_s3 + $0x28c] ss:$16 sps:$4 sm:$0xff]  }
 0x2b5   : > { %6727 = vmatprep.subr.bf16.mxu1 %v9299_v24  ;;  %v9327_v24 = vld [vmem:[%s11266_s3 + $0x280] ss:$16 sps:$4 sm:$0xff]  }
 0x2b8   : > { %6728 = vmatpush1.bf16.msra.mxu1 %v9297_v26  ;;  %v9330_v26 = vld [vmem:[%s11266_s3 + $0x288] ss:$16 sps:$4 sm:$0xff]  }
 0x2b9   : > { %6738 = vmatprep.subr.bf16.mxu1 %v9305_v33  ;;  %v9335_v33 = vld [vmem:[%s11266_s3 + $0x2a4] ss:$16 sps:$4 sm:$0xff]  }
 0x2ee   : > { %v4073_v51 = vpop.f32.mrb[8].mxu1 }
 0x2ef   : > { %v4361_v27 = vrot.slane %v4073_v51, 4  ;;  %v4075_v28 = vpop.f32.mrb[9].mxu1 }
 0x2f0   : > { %v4367_v29 = vrot.slane %v4075_v28, 4  ;;  %v4077_v30 = vpop.f32.mrb[10].mxu1 }
 0x2f1   : > { %v4362_v31 = vadd.f32 %v4361_v27, %v4073_v51  ;;  %v4078_v32 = vpop.f32.mrb[11].mxu1  ;;  %v9333_v51 = vld [vmem:[%s11266_s3 + $0x2a0] ss:$16 sps:$4 sm:$0xff]   ;;  %v9336_v27 = vld [vmem:[%s11266_s3 + $0x2a8] ss:$16 sps:$4 sm:$0xff]  }
 0x2f2   : > { %v4368_v36 = vadd.f32 %v4367_v29, %v4075_v28  ;;  %v9341_v28 = vld [vmem:[%s11266_s3 + $0x2c4] ss:$16 sps:$4 sm:$0xff]   ;;  %v9344_v29 = vld [vmem:[%s11266_s3 + $0x2cc] ss:$16 sps:$4 sm:$0xff]   ;;  %v9339_v30 = vld [vmem:[%s11266_s3 + $0x2c0] ss:$16 sps:$4 sm:$0xff]  }
 0x2f3   : > { %v4363_v39 = vrot.slane %v4362_v31, 2  ;;  %v9347_v32 = vld [vmem:[%s11266_s3 + $0x2e4] ss:$16 sps:$4 sm:$0xff]  }
 0x2f4   : > { %v4369_v41 = vrot.slane %v4368_v36, 2 }
 0x2f5   : > { %v4364_v42 = vadd.f32 %v4363_v39, %v4362_v31  ;;  %v9342_v31 = vld [vmem:[%s11266_s3 + $0x2c8] ss:$16 sps:$4 sm:$0xff]   ;;  %v9345_v39 = vld [vmem:[%s11266_s3 + $0x2e0] ss:$16 sps:$4 sm:$0xff]  }
 0x2f6   : > { %v4370_v43 = vadd.f32 %v4369_v41, %v4368_v36  ;;  %v9350_v36 = vld [vmem:[%s11266_s3 + $0x2ec] ss:$16 sps:$4 sm:$0xff]   ;;  %v9348_v41 = vld [vmem:[%s11266_s3 + $0x2e8] ss:$16 sps:$4 sm:$0xff]  }
 0x2f7   : > { %v4365_v14 = vrot.slane %v4364_v42, 1 }
 0x2f8   : > { %v4371_v44 = vrot.slane %v4370_v43, 1 }
 0x2f9   : > { %v4366_v45 = vadd.f32 %v4365_v14, %v4364_v42  ;;  %v9353_v42 = vld [vmem:[%s11266_s3 + $0x304] ss:$16 sps:$4 sm:$0xff]   ;;  %v9351_v14 = vld [vmem:[%s11266_s3 + $0x300] ss:$16 sps:$4 sm:$0xff]  }
 0x2fa   : > { %v4372_v46 = vadd.f32 %v4371_v44, %v4370_v43  ;;  %v9356_v43 = vld [vmem:[%s11266_s3 + $0x30c] ss:$16 sps:$4 sm:$0xff]  }
 0x2fc   : > { %v4405_v48 = vcombine.low %v4366_v45, %v4372_v46  ;;  %v9354_v45 = vld [vmem:[%s11266_s3 + $0x308] ss:$16 sps:$4 sm:$0xff]   ;;  %v9359_v46 = vld [vmem:[%s11266_s3 + $0x324] ss:$16 sps:$4 sm:$0xff]  }
 0x2fe   : > { %v4433_v50 = vrot.slane %v4405_v48, %v10086_v15 }
 0x300   : > { %v4435_v52 = vcombine.low %v4426_v49, %v4433_v50 }
 0x302   : > { %v4449_v57 = vrot.slane %v4435_v52, %v10086_v15  ;;  %v9362_v52 = vld [vmem:[%s11266_s3 + $0x32c] ss:$16 sps:$4 sm:$0xff]  }
 0x304   : > { %v4450_v58 = vcombine.low %v4442_v56, %v4449_v57 }
 0x306   : > { %v4489_v34 = vmul.f32 0.25, %v4450_v58 }
 0x308   : > { %v10333_v37 = vadd.f32 %v4491_v7, %v4489_v34 }
 0x30a   : > { %v4504_v40 = vrot.slane %v10333_v37, %v10327_v59  ;;  %v4500_v55 = vrot.slane %v10333_v37, %v10330_v60  ;;  %v4512_v21 = vrot.slane %v10333_v37, %v4511_v47 }
 0x30c   : > { %v4553_v25 = vpack.c.bf16 %v4504_v40, %v4504_v40  ;;  %v4552_v63 = vpack.c.bf16 %v4500_v55, %v4500_v55  ;;  %v4555_v9 = vpack.c.bf16 %v4512_v21, %v4512_v21 }
 0x30e   : > { %v8240_v0 = vpop.f32.mrb[12].mxu1  ;;  %6729 = vmatprep.mubr.bf16.mxu1 %v4553_v25  ;;  %6975 = vmatprep.mubr.bf16.mxu0 %v4553_v25 }
 0x30f   : > { %v8241_v1 = vpop.f32.mrb[13].mxu1  ;;  %6730 = vmatmul.mubr.bf16.vlgmr.msra.gmra.mrb[24].mxu1 %v4552_v63  ;;  %6976 = vmatmul.mubr.bf16.vlgmr.msra.gmra.mrb[12].mxu0 %v4552_v63 }
 0x310   : > { %v10354_v5 = vadd.f32 %v8241_v1, %v8240_v0  ;;  %v8243_v8 = vpop.f32.mrb[14].mxu1  ;;  %6739 = vmatpush1.bf16.msra.mxu1 %v9303_v61  ;;  %6985 = vmatpush1.bf16.msra.mxu0 %v9306_v62  ;;  %v9357_v61 = vld [vmem:[%s11266_s3 + $0x320] ss:$16 sps:$4 sm:$0xff]   ;;  %v9360_v62 = vld [vmem:[%s11266_s3 + $0x328] ss:$16 sps:$4 sm:$0xff]  }
 0x311   : > { %v8244_v10 = vpop.f32.mrb[15].mxu1  ;;  %6770 = vmatprep.mubr.bf16.mxu1 %v4555_v9  ;;  %7016 = vmatprep.mubr.bf16.mxu0 %v4555_v9  ;;  %v9365_v1 = vld [vmem:[%s11266_s3 + $0x344] ss:$16 sps:$4 sm:$0xff]  }
 0x312   : > { %6740 = vmatprep.subr.bf16.mxu1 %v9311_v2  ;;  %6986 = vmatprep.subr.bf16.mxu0 %v9314_v4  ;;  %v9368_v2 = vld [vmem:[%s11266_s3 + $0x34c] ss:$16 sps:$4 sm:$0xff]   ;;  %v9366_v10 = vld [vmem:[%s11266_s3 + $0x348] ss:$16 sps:$4 sm:$0xff]  }
 0x314   : > { %6741 = vmatpush1.bf16.msra.mxu1 %v9309_v11  ;;  %6987 = vmatpush1.bf16.msra.mxu0 %v9312_v12  ;;  %v9371_v12 = vld [vmem:[%s11266_s3 + $0x364] ss:$16 sps:$4 sm:$0xff]  }
 0x315   : > { %6742 = vmatprep.subr.bf16.mxu1 %v9317_v13  ;;  %6988 = vmatprep.subr.bf16.mxu0 %v9320_v16  ;;  %v9374_v13 = vld [vmem:[%s11266_s3 + $0x36c] ss:$16 sps:$4 sm:$0xff]  }
 0x318   : > { %6743 = vmatpush1.bf16.msra.mxu1 %v9315_v17  ;;  %6989 = vmatpush1.bf16.msra.mxu0 %v9318_v18 }
 0x319   : > { %6744 = vmatprep.subr.bf16.mxu1 %v9323_v19  ;;  %6990 = vmatprep.subr.bf16.mxu0 %v9326_v20  ;;  %v9369_v19 = vld [vmem:[%s11266_s3 + $0x360] ss:$16 sps:$4 sm:$0xff]   ;;  %v9372_v20 = vld [vmem:[%s11266_s3 + $0x368] ss:$16 sps:$4 sm:$0xff]  }
 0x31c   : > { %6745 = vmatpush1.bf16.msra.mxu1 %v9321_v54  ;;  %6991 = vmatpush1.bf16.msra.mxu0 %v9324_v22  ;;  %v9377_v54 = vld [vmem:[%s11266_s3 + $0x384] ss:$16 sps:$4 sm:$0xff]   ;;  %v9380_v22 = vld [vmem:[%s11266_s3 + $0x38c] ss:$16 sps:$4 sm:$0xff]  }
 0x31d   : > { %6746 = vmatprep.subr.bf16.mxu1 %v9329_v23  ;;  %6992 = vmatprep.subr.bf16.mxu0 %v9332_v6  ;;  %v9375_v6 = vld [vmem:[%s11266_s3 + $0x380] ss:$16 sps:$4 sm:$0xff]  }
 0x320   : > { %6747 = vmatpush1.bf16.msra.mxu1 %v9327_v24  ;;  %6993 = vmatpush1.bf16.msra.mxu0 %v9330_v26  ;;  %v9378_v24 = vld [vmem:[%s11266_s3 + $0x388] ss:$16 sps:$4 sm:$0xff]   ;;  %v9383_v26 = vld [vmem:[%s11266_s3 + $0x3a4] ss:$16 sps:$4 sm:$0xff]  }
 0x321   : > { %6748 = vmatprep.subr.bf16.mxu1 %v9335_v33  ;;  %6994 = vmatprep.subr.bf16.mxu0 %v9338_v38  ;;  %v9386_v33 = vld [vmem:[%s11266_s3 + $0x3ac] ss:$16 sps:$4 sm:$0xff]   ;;  %v9381_v38 = vld [vmem:[%s11266_s3 + $0x3a0] ss:$16 sps:$4 sm:$0xff]  }
 0x324   : > { %6749 = vmatpush1.bf16.msra.mxu1 %v9333_v51  ;;  %6995 = vmatpush1.bf16.msra.mxu0 %v9336_v27  ;;  %v9384_v51 = vld [vmem:[%s11266_s3 + $0x3a8] ss:$16 sps:$4 sm:$0xff]   ;;  %v9389_v27 = vld [vmem:[%s11266_s3 + $0x3c4] ss:$16 sps:$4 sm:$0xff]  }
 0x325   : > { %6750 = vmatprep.subr.bf16.mxu1 %v9341_v28  ;;  %6996 = vmatprep.subr.bf16.mxu0 %v9344_v29  ;;  %v9392_v28 = vld [vmem:[%s11266_s3 + $0x3cc] ss:$16 sps:$4 sm:$0xff]   ;;  %v9387_v29 = vld [vmem:[%s11266_s3 + $0x3c0] ss:$16 sps:$4 sm:$0xff]  }
 0x328   : > { %6751 = vmatpush1.bf16.msra.mxu1 %v9339_v30  ;;  %6997 = vmatpush1.bf16.msra.mxu0 %v9342_v31  ;;  %v9390_v30 = vld [vmem:[%s11266_s3 + $0x3c8] ss:$16 sps:$4 sm:$0xff]   ;;  %v9395_v31 = vld [vmem:[%s11266_s3 + $0x3e4] ss:$16 sps:$4 sm:$0xff]  }
 0x329   : > { %6752 = vmatprep.subr.bf16.mxu1 %v9347_v32  ;;  %6998 = vmatprep.subr.bf16.mxu0 %v9350_v36  ;;  %v9398_v32 = vld [vmem:[%s11266_s3 + $0x3ec] ss:$16 sps:$4 sm:$0xff]   ;;  %v10534_v36 = vsub.s32 2, %v10083_v3 }
 0x32c   : > { %6753 = vmatpush1.bf16.msra.mxu1 %v9345_v39  ;;  %6999 = vmatpush1.bf16.msra.mxu0 %v9348_v41  ;;  %v4519_v39 = vsub.s32 5, %v10083_v3  ;;  %v9393_v41 = vld [vmem:[%s11266_s3 + $0x3e0] ss:$16 sps:$4 sm:$0xff]  }
 0x32d   : > { %6754 = vmatprep.subr.bf16.mxu1 %v9353_v42  ;;  %7000 = vmatprep.subr.bf16.mxu0 %v9356_v43  ;;  %v9396_v42 = vld [vmem:[%s11266_s3 + $0x3e8] ss:$16 sps:$4 sm:$0xff]   ;;  %v4508_v43 = vrot.slane %v10333_v37, %v10534_v36 }
 0x32e   : > { %v8262_v48 = vpop.f32.mrb[16].mxu1 }
 0x32f   : > { %v4196_v44 = vpop.f32.mrb[8].mxu0  ;;  %v8263_v56 = vpop.f32.mrb[17].mxu1 }
 0x330   : > { %v4373_v49 = vrot.slane %v4196_v44, 4  ;;  %v4198_v50 = vpop.f32.mrb[9].mxu0  ;;  %v8264_v7 = vadd.f32 %v8263_v56, %v8262_v48  ;;  %v8265_v34 = vpop.f32.mrb[18].mxu1  ;;  %6755 = vmatpush1.bf16.msra.mxu1 %v9351_v14  ;;  %7001 = vmatpush1.bf16.msra.mxu0 %v9354_v45  ;;  %v9401_v14 = vld [vmem:[%s11266_s3 + $0x404] ss:$16 sps:$4 sm:$0xff]   ;;  %v4520_v45 = vrot.slane %v10333_v37, %v4519_v39 }
 0x331   : > { %v4379_v57 = vrot.slane %v4198_v50, 4  ;;  %v4200_v58 = vpop.f32.mrb[10].mxu0  ;;  %v8266_v21 = vpop.f32.mrb[19].mxu1  ;;  %6756 = vmatprep.subr.bf16.mxu1 %v9359_v46  ;;  %7002 = vmatprep.subr.bf16.mxu0 %v9362_v52  ;;  %v9399_v48 = vld [vmem:[%s11266_s3 + $0x400] ss:$16 sps:$4 sm:$0xff]  }
 0x332   : > { %v4374_v40 = vadd.f32 %v4373_v49, %v4196_v44  ;;  %v4201_v55 = vpop.f32.mrb[11].mxu0  ;;  %v10459_v63 = vadd.f32 %v8264_v7, %v10354_v5  ;;  %v9363_v5 = vld [vmem:[%s11266_s3 + $0x340] ss:$16 sps:$4 sm:$0xff]   ;;  %v9404_v44 = vld [vmem:[%s11266_s3 + $0x40c] ss:$16 sps:$4 sm:$0xff]  }
 0x333   : > { %v4380_v25 = vadd.f32 %v4379_v57, %v4198_v50  ;;  %v4554_v50 = vpack.c.bf16 %v4508_v43, %v4508_v43  ;;  %v9402_v52 = vld [vmem:[%s11266_s3 + $0x408] ss:$16 sps:$4 sm:$0xff]   ;;  %v4557_v57 = vpack.c.bf16 %v4520_v45, %v4520_v45  ;;  %v9407_v58 = vld [vmem:[%s11266_s3 + $0x424] ss:$16 sps:$4 sm:$0xff]   ;;  %v9410_v7 = vld [vmem:[%s11266_s3 + $0x42c] ss:$16 sps:$4 sm:$0xff]  }
 0x334   : > { %v4375_v0 = vrot.slane %v4374_v40, 2  ;;  %6757 = vmatpush1.bf16.msra.mxu1 %v9357_v61  ;;  %7003 = vmatpush1.bf16.msra.mxu0 %v9360_v62  ;;  %v9405_v21 = vld [vmem:[%s11266_s3 + $0x420] ss:$16 sps:$4 sm:$0xff]   ;;  %v9413_v61 = vld [vmem:[%s11266_s3 + $0x444] ss:$16 sps:$4 sm:$0xff]  }
 0x335   : > { %v4381_v4 = vrot.slane %v4380_v25, 2  ;;  %6758 = vmatprep.subr.bf16.mxu1 %v9365_v1  ;;  %7004 = vmatprep.subr.bf16.mxu0 %v9368_v2  ;;  %v9411_v1 = vld [vmem:[%s11266_s3 + $0x440] ss:$16 sps:$4 sm:$0xff]   ;;  %v9414_v2 = vld [vmem:[%s11266_s3 + $0x448] ss:$16 sps:$4 sm:$0xff]  }
 0x336   : > { %v4376_v8 = vadd.f32 %v4375_v0, %v4374_v40  ;;  %v9441_v39 = vld [vmem:[%s11266_s3 + $0x4e0] ss:$16 sps:$4 sm:$0xff]   ;;  %v9458_v45 = vld [vmem:[%s11266_s3 + $0x52c] ss:$16 sps:$4 sm:$0xff]  }
 0x337   : > { %v4382_v9 = vadd.f32 %v4381_v4, %v4380_v25  ;;  %v9408_v25 = vld [vmem:[%s11266_s3 + $0x428] ss:$16 sps:$4 sm:$0xff]   ;;  %v9419_v4 = vld [vmem:[%s11266_s3 + $0x464] ss:$16 sps:$4 sm:$0xff]   ;;  %v9447_v43 = vld [vmem:[%s11266_s3 + $0x500] ss:$16 sps:$4 sm:$0xff]  }
 0x338   : > { %v4377_v11 = vrot.slane %v4376_v8, 1  ;;  %6759 = vmatpush1.bf16.msra.mxu1 %v9363_v5  ;;  %7005 = vmatpush1.bf16.msra.mxu0 %v9366_v10  ;;  %v9417_v10 = vld [vmem:[%s11266_s3 + $0x460] ss:$16 sps:$4 sm:$0xff]  }
 0x339   : > { %v4383_v16 = vrot.slane %v4382_v9, 1  ;;  %6760 = vmatprep.subr.bf16.mxu1 %v9371_v12  ;;  %7006 = vmatprep.subr.bf16.mxu0 %v9374_v13  ;;  %v9425_v12 = vld [vmem:[%s11266_s3 + $0x484] ss:$16 sps:$4 sm:$0xff]  }
 0x33a   : > { %v10479_v17 = vadd.f32 %v4377_v11, %v4376_v8  ;;  %v9420_v11 = vld [vmem:[%s11266_s3 + $0x468] ss:$16 sps:$4 sm:$0xff]  }
 0x33b   : > { %v10481_v18 = vadd.f32 %v4383_v16, %v4382_v9  ;;  %v9422_v9 = vld [vmem:[%s11266_s3 + $0x46c] ss:$16 sps:$4 sm:$0xff]  }
 0x33c   : > { %6761 = vmatpush1.bf16.msra.mxu1 %v9369_v19  ;;  %7007 = vmatpush1.bf16.msra.mxu0 %v9372_v20  ;;  %v9428_v16 = vld [vmem:[%s11266_s3 + $0x48c] ss:$16 sps:$4 sm:$0xff]   ;;  %v9423_v20 = vld [vmem:[%s11266_s3 + $0x480] ss:$16 sps:$4 sm:$0xff]  }
 0x33d   : > { %v4451_v23 = vcombine.low %v10479_v17, %v10481_v18  ;;  %6762 = vmatprep.subr.bf16.mxu1 %v9377_v54  ;;  %7008 = vmatprep.subr.bf16.mxu0 %v9380_v22  ;;  %v9426_v54 = vld [vmem:[%s11266_s3 + $0x488] ss:$16 sps:$4 sm:$0xff]   ;;  %v9431_v22 = vld [vmem:[%s11266_s3 + $0x4a4] ss:$16 sps:$4 sm:$0xff]  }
 0x33e   : > { %v9432_v17 = vld [vmem:[%s11266_s3 + $0x4a8] ss:$16 sps:$4 sm:$0xff]   ;;  %v9437_v18 = vld [vmem:[%s11266_s3 + $0x4c4] ss:$16 sps:$4 sm:$0xff]  }
 0x340   : > { %6763 = vmatpush1.bf16.msra.mxu1 %v9375_v6  ;;  %7009 = vmatpush1.bf16.msra.mxu0 %v9378_v24  ;;  %v4458_v6 = vrot.slane %v4451_v23, %v10086_v15 }
 0x341   : > { %6764 = vmatprep.subr.bf16.mxu1 %v9383_v26  ;;  %7010 = vmatprep.subr.bf16.mxu0 %v9386_v33  ;;  %v9434_v26 = vld [vmem:[%s11266_s3 + $0x4ac] ss:$16 sps:$4 sm:$0xff]  }
 0x344   : > { %6765 = vmatpush1.bf16.msra.mxu1 %v9381_v38  ;;  %7011 = vmatpush1.bf16.msra.mxu0 %v9384_v51  ;;  %v9429_v38 = vld [vmem:[%s11266_s3 + $0x4a0] ss:$16 sps:$4 sm:$0xff]   ;;  %v4324_v51 = vld [vmem:[#allocation2 + $0x8] sm:$0x7] }
 0x345   : > { %6766 = vmatprep.subr.bf16.mxu1 %v9389_v27  ;;  %7012 = vmatprep.subr.bf16.mxu0 %v9392_v28  ;;  %v9440_v27 = vld [vmem:[%s11266_s3 + $0x4cc] ss:$16 sps:$4 sm:$0xff]  }
 0x348   : > { %6767 = vmatpush1.bf16.msra.mxu1 %v9387_v29  ;;  %7013 = vmatpush1.bf16.msra.mxu0 %v9390_v30  ;;  %v9435_v29 = vld [vmem:[%s11266_s3 + $0x4c0] ss:$16 sps:$4 sm:$0xff]   ;;  %v9438_v30 = vld [vmem:[%s11266_s3 + $0x4c8] ss:$16 sps:$4 sm:$0xff]  }
 0x349   : > { %6768 = vmatprep.subr.bf16.mxu1 %v9395_v31  ;;  %7014 = vmatprep.subr.bf16.mxu0 %v9398_v32  ;;  %v9443_v31 = vld [vmem:[%s11266_s3 + $0x4e4] ss:$16 sps:$4 sm:$0xff]   ;;  %v9446_v32 = vld [vmem:[%s11266_s3 + $0x4ec] ss:$16 sps:$4 sm:$0xff]  }
 0x34c   : > { %6769 = vmatpush1.bf16.msra.mxu1 %v9393_v41  ;;  %7015 = vmatpush1.bf16.msra.mxu0 %v9396_v42  ;;  %v9444_v41 = vld [vmem:[%s11266_s3 + $0x4e8] ss:$16 sps:$4 sm:$0xff]   ;;  %v9452_v42 = vld [vmem:[%s11266_s3 + $0x50c] ss:$16 sps:$4 sm:$0xff]  }
 0x34d   : > { %6779 = vmatprep.subr.bf16.mxu1 %v9401_v14  ;;  %7025 = vmatprep.subr.bf16.mxu0 %v9404_v44  ;;  %v9450_v14 = vld [vmem:[%s11266_s3 + $0x508] ss:$16 sps:$4 sm:$0xff]   ;;  %v9455_v44 = vld [vmem:[%s11266_s3 + $0x524] ss:$16 sps:$4 sm:$0xff]  }
 0x34e   : > { %v8284_v46 = vpop.f32.mrb[20].mxu1 }
 0x34f   : > { %v8285_v49 = vpop.f32.mrb[21].mxu1  ;;  %6771 = vmatmul.mubr.bf16.vlgmr.msra.gmra.mrb[24].mxu1 %v4554_v50  ;;  %7017 = vmatmul.mubr.bf16.vlgmr.msra.gmra.mrb[12].mxu0 %v4554_v50  ;;  %v9464_v50 = vld [vmem:[%s11266_s3 + $0x54c] ss:$16 sps:$4 sm:$0xff]  }
 0x350   : > { %v8286_v56 = vadd.f32 %v8285_v49, %v8284_v46  ;;  %v8287_v34 = vpop.f32.mrb[22].mxu1  ;;  %6780 = vmatpush1.bf16.msra.mxu1 %v9399_v48  ;;  %6811 = vmatprep.mubr.bf16.mxu1 %v4557_v57  ;;  %v9453_v46 = vld [vmem:[%s11266_s3 + $0x520] ss:$16 sps:$4 sm:$0xff]   ;;  %v9456_v48 = vld [vmem:[%s11266_s3 + $0x528] ss:$16 sps:$4 sm:$0xff]  }
 0x351   : > { %v8288_v40 = vpop.f32.mrb[23].mxu1  ;;  %7026 = vmatpush1.bf16.msra.mxu0 %v9402_v52  ;;  %7057 = vmatprep.mubr.bf16.mxu0 %v4557_v57  ;;  %v9461_v49 = vld [vmem:[%s11266_s3 + $0x544] ss:$16 sps:$4 sm:$0xff]   ;;  %v9459_v52 = vld [vmem:[%s11266_s3 + $0x540] ss:$16 sps:$4 sm:$0xff]  }
 0x352   : > { %v4318_v55 = vadd.f32 %v8286_v56, %v10459_v63  ;;  %6781 = vmatprep.subr.bf16.mxu1 %v9407_v58  ;;  %7027 = vmatprep.subr.bf16.mxu0 %v9410_v7  ;;  %v9416_v63 = vld [vmem:[%s11266_s3 + $0x44c] ss:$16 sps:$4 sm:$0xff]   ;;  %v9462_v56 = vld [vmem:[%s11266_s3 + $0x548] ss:$16 sps:$4 sm:$0xff]   ;;  %v9467_v57 = vld [vmem:[%s11266_s3 + $0x564] ss:$16 sps:$4 sm:$0xff]  }
 0x353   : > { %v9470_v58 = vld [vmem:[%s11266_s3 + $0x56c] ss:$16 sps:$4 sm:$0xff]   ;;  %v9465_v7 = vld [vmem:[%s11266_s3 + $0x560] ss:$16 sps:$4 sm:$0xff]   ;;  %v9468_v34 = vld [vmem:[%s11266_s3 + $0x568] ss:$16 sps:$4 sm:$0xff]  }
 0x354   : > { %v4385_v62 = vrot.slane %v4318_v55, 4  ;;  %6782 = vmatpush1.bf16.msra.mxu1 %v9405_v21  ;;  %v9473_v40 = vld [vmem:[%s11266_s3 + $0x584] ss:$16 sps:$4 sm:$0xff]   ;;  %v9471_v21 = vld [vmem:[%s11266_s3 + $0x580] ss:$16 sps:$4 sm:$0xff]  }
 0x355   : > { %7028 = vmatpush1.bf16.msra.mxu0 %v9408_v25  ;;  %6783 = vmatprep.subr.bf16.mxu1 %v9413_v61  ;;  %v9474_v25 = vld [vmem:[%s11266_s3 + $0x588] ss:$16 sps:$4 sm:$0xff]   ;;  %v9479_v61 = vld [vmem:[%s11266_s3 + $0x5a4] ss:$16 sps:$4 sm:$0xff]  }
 0x356   : > { %v4386_v0 = vadd.f32 %v4385_v62, %v4318_v55  ;;  %7029 = vmatprep.subr.bf16.mxu0 %v9416_v63  ;;  %v9476_v55 = vld [vmem:[%s11266_s3 + $0x58c] ss:$16 sps:$4 sm:$0xff]   ;;  %v9477_v63 = vld [vmem:[%s11266_s3 + $0x5a0] ss:$16 sps:$4 sm:$0xff]  }
 0x357   : > { %v9482_v62 = vld [vmem:[%s11266_s3 + $0x5ac] ss:$16 sps:$4 sm:$0xff]  }
 0x358   : > { %v4387_v8 = vrot.slane %v4386_v0, 2  ;;  %6784 = vmatpush1.bf16.msra.mxu1 %v9411_v1  ;;  %v9485_v1 = vld [vmem:[%s11266_s3 + $0x5c4] ss:$16 sps:$4 sm:$0xff]  }
 0x359   : > { %7030 = vmatpush1.bf16.msra.mxu0 %v9414_v2  ;;  %6785 = vmatprep.subr.bf16.mxu1 %v9419_v4  ;;  %v9488_v2 = vld [vmem:[%s11266_s3 + $0x5cc] ss:$16 sps:$4 sm:$0xff]   ;;  %v9483_v4 = vld [vmem:[%s11266_s3 + $0x5c0] ss:$16 sps:$4 sm:$0xff]  }
 0x35a   : > { %v4388_v5 = vadd.f32 %v4387_v8, %v4386_v0  ;;  %7031 = vmatprep.subr.bf16.mxu0 %v9422_v9  ;;  %v9480_v0 = vld [vmem:[%s11266_s3 + $0x5a8] ss:$16 sps:$4 sm:$0xff]   ;;  %v9491_v9 = vld [vmem:[%s11266_s3 + $0x5e4] ss:$16 sps:$4 sm:$0xff]  }
 0x35b   : > { %v9486_v8 = vld [vmem:[%s11266_s3 + $0x5c8] ss:$16 sps:$4 sm:$0xff]  }
 0x35c   : > { %v4389_v13 = vrot.slane %v4388_v5, 1  ;;  %6786 = vmatpush1.bf16.msra.mxu1 %v9417_v10  ;;  %v9494_v10 = vld [vmem:[%s11266_s3 + $0x5ec] ss:$16 sps:$4 sm:$0xff]  }
 0x35d   : > { %7032 = vmatpush1.bf16.msra.mxu0 %v9420_v11  ;;  %6787 = vmatprep.subr.bf16.mxu1 %v9425_v12  ;;  %v4527_v11 = vsub.s32 7, %v10083_v3  ;;  %v9489_v12 = vld [vmem:[%s11266_s3 + $0x5e0] ss:$16 sps:$4 sm:$0xff]  }
 0x35e   : > { %v4390_v19 = vadd.f32 %v4389_v13, %v4388_v5  ;;  %7033 = vmatprep.subr.bf16.mxu0 %v9428_v16  ;;  %v4515_v5 = vsub.s32 4, %v10083_v3  ;;  %v9492_v13 = vld [vmem:[%s11266_s3 + $0x5e8] ss:$16 sps:$4 sm:$0xff]  }
 0x360   : > { %v4465_v24 = vrot.slane %v4390_v19, %v10086_v15  ;;  %6788 = vmatpush1.bf16.msra.mxu1 %v9423_v20  ;;  %v4516_v16 = vrot.slane %v10333_v37, %v4515_v5  ;;  %v9497_v19 = vld [vmem:[%s11266_s3 + $0x604] ss:$16 sps:$4 sm:$0xff]   ;;  %v9500_v20 = vld [vmem:[%s11266_s3 + $0x60c] ss:$16 sps:$4 sm:$0xff]   ;;  %v9564_v5 = vld [vmem:[%s11266_s3 + $0x768] ss:$16 sps:$4 sm:$0xff]  }
 0x361   : > { %7034 = vmatpush1.bf16.msra.mxu0 %v9426_v54  ;;  %6789 = vmatprep.subr.bf16.mxu1 %v9431_v22  ;;  %v4528_v54 = vrot.slane %v10333_v37, %v4527_v11  ;;  %v9495_v22 = vld [vmem:[%s11266_s3 + $0x600] ss:$16 sps:$4 sm:$0xff]   ;;  %v9572_v11 = vld [vmem:[%s11266_s3 + $0x78c] ss:$16 sps:$4 sm:$0xff]  }
 0x362   : > { %v4466_v33 = vcombine.low %v4458_v6, %v4465_v24  ;;  %7035 = vmatprep.subr.bf16.mxu0 %v9434_v26  ;;  %v4556_v6 = vpack.c.bf16 %v4516_v16, %v4516_v16  ;;  %v9498_v24 = vld [vmem:[%s11266_s3 + $0x608] ss:$16 sps:$4 sm:$0xff]   ;;  %v9503_v26 = vld [vmem:[%s11266_s3 + $0x624] ss:$16 sps:$4 sm:$0xff]  }
 0x363   : > { %v9575_v16 = vld [vmem:[%s11266_s3 + $0x7a4] ss:$16 sps:$4 sm:$0xff]  }
 0x364   : > { %v4473_v23 = vrot.slane %v4466_v33, %v10086_v15  ;;  %6790 = vmatpush1.bf16.msra.mxu1 %v9429_v38  ;;  %v4559_v33 = vpack.c.bf16 %v4528_v54, %v4528_v54  ;;  %v9506_v38 = vld [vmem:[%s11266_s3 + $0x62c] ss:$16 sps:$4 sm:$0xff]  }
 0x365   : > { %7036 = vmatpush1.bf16.msra.mxu0 %v9432_v17  ;;  %6791 = vmatprep.subr.bf16.mxu1 %v9437_v18  ;;  %v9504_v17 = vld [vmem:[%s11266_s3 + $0x628] ss:$16 sps:$4 sm:$0xff]   ;;  %v9509_v18 = vld [vmem:[%s11266_s3 + $0x644] ss:$16 sps:$4 sm:$0xff]  }
 0x366   : > { %v4477_v28 = vadd.f32 %v4473_v23, %v4324_v51  ;;  %7037 = vmatprep.subr.bf16.mxu0 %v9440_v27  ;;  %v9501_v51 = vld [vmem:[%s11266_s3 + $0x620] ss:$16 sps:$4 sm:$0xff]   ;;  %v9512_v23 = vld [vmem:[%s11266_s3 + $0x64c] ss:$16 sps:$4 sm:$0xff]  }
 0x367   : > { %v9507_v27 = vld [vmem:[%s11266_s3 + $0x640] ss:$16 sps:$4 sm:$0xff]  }
 0x368   : > { %4483 = vst.msk [vmem:[#allocation2 + $0x8] sm:$0x7] %vm10310_vm0, %v4477_v28  ;;  %6792 = vmatpush1.bf16.msra.mxu1 %v9435_v29  ;;  %v9510_v28 = vld [vmem:[%s11266_s3 + $0x648] ss:$16 sps:$4 sm:$0xff]   ;;  %v9515_v29 = vld [vmem:[%s11266_s3 + $0x664] ss:$16 sps:$4 sm:$0xff]  }
 0x369   : > { %7038 = vmatpush1.bf16.msra.mxu0 %v9438_v30  ;;  %6793 = vmatprep.subr.bf16.mxu1 %v9443_v31  ;;  %v9518_v30 = vld [vmem:[%s11266_s3 + $0x66c] ss:$16 sps:$4 sm:$0xff]   ;;  %v9513_v31 = vld [vmem:[%s11266_s3 + $0x660] ss:$16 sps:$4 sm:$0xff]  }
 0x36a   : > { %7039 = vmatprep.subr.bf16.mxu0 %v9446_v32  ;;  %v9516_v32 = vld [vmem:[%s11266_s3 + $0x668] ss:$16 sps:$4 sm:$0xff]  }
 0x36c   : > { %6794 = vmatpush1.bf16.msra.mxu1 %v9441_v39  ;;  %v9521_v39 = vld [vmem:[%s11266_s3 + $0x684] ss:$16 sps:$4 sm:$0xff]  }
 0x36d   : > { %7040 = vmatpush1.bf16.msra.mxu0 %v9444_v41  ;;  %6795 = vmatprep.subr.bf16.mxu1 %v9449_v35  ;;  %v9524_v41 = vld [vmem:[%s11266_s3 + $0x68c] ss:$16 sps:$4 sm:$0xff]   ;;  %v9519_v35 = vld [vmem:[%s11266_s3 + $0x680] ss:$16 sps:$4 sm:$0xff]  }
 0x36e   : > { %7041 = vmatprep.subr.bf16.mxu0 %v9452_v42  ;;  %v9522_v42 = vld [vmem:[%s11266_s3 + $0x688] ss:$16 sps:$4 sm:$0xff]  }
 0x36f   : > { %v4488_v54 = vld [vmem:[#allocation2 + $0x8] sm:$0x7] }
 0x370   : > { %6796 = vmatpush1.bf16.msra.mxu1 %v9447_v43  ;;  %v9527_v43 = vld [vmem:[%s11266_s3 + $0x6a4] ss:$16 sps:$4 sm:$0xff]  }
 0x371   : > { %7042 = vmatpush1.bf16.msra.mxu0 %v9450_v14  ;;  %6797 = vmatprep.subr.bf16.mxu1 %v9455_v44  ;;  %v9530_v14 = vld [vmem:[%s11266_s3 + $0x6ac] ss:$16 sps:$4 sm:$0xff]   ;;  %v9525_v44 = vld [vmem:[%s11266_s3 + $0x6a0] ss:$16 sps:$4 sm:$0xff]  }
 0x372   : > { %7043 = vmatprep.subr.bf16.mxu0 %v9458_v45  ;;  %v9528_v45 = vld [vmem:[%s11266_s3 + $0x6a8] ss:$16 sps:$4 sm:$0xff]  }
 0x374   : > { %6798 = vmatpush1.bf16.msra.mxu1 %v9453_v46  ;;  %v9533_v46 = vld [vmem:[%s11266_s3 + $0x6c4] ss:$16 sps:$4 sm:$0xff]  }
 0x375   : > { %7044 = vmatpush1.bf16.msra.mxu0 %v9456_v48  ;;  %6799 = vmatprep.subr.bf16.mxu1 %v9461_v49  ;;  %v9536_v48 = vld [vmem:[%s11266_s3 + $0x6cc] ss:$16 sps:$4 sm:$0xff]   ;;  %v9531_v49 = vld [vmem:[%s11266_s3 + $0x6c0] ss:$16 sps:$4 sm:$0xff]  }
 0x376   : > { %7045 = vmatprep.subr.bf16.mxu0 %v9464_v50  ;;  %v9534_v50 = vld [vmem:[%s11266_s3 + $0x6c8] ss:$16 sps:$4 sm:$0xff]  }
 0x378   : > { %6800 = vmatpush1.bf16.msra.mxu1 %v9459_v52  ;;  %v9539_v52 = vld [vmem:[%s11266_s3 + $0x6e4] ss:$16 sps:$4 sm:$0xff]  }
 0x379   : > { %7046 = vmatpush1.bf16.msra.mxu0 %v9462_v56  ;;  %6801 = vmatprep.subr.bf16.mxu1 %v9467_v57  ;;  %v9542_v56 = vld [vmem:[%s11266_s3 + $0x6ec] ss:$16 sps:$4 sm:$0xff]   ;;  %v9537_v57 = vld [vmem:[%s11266_s3 + $0x6e0] ss:$16 sps:$4 sm:$0xff]  }
 0x37a   : > { %7047 = vmatprep.subr.bf16.mxu0 %v9470_v58  ;;  %v9540_v58 = vld [vmem:[%s11266_s3 + $0x6e8] ss:$16 sps:$4 sm:$0xff]  }
 0x37c   : > { %6802 = vmatpush1.bf16.msra.mxu1 %v9465_v7  ;;  %v9545_v7 = vld [vmem:[%s11266_s3 + $0x704] ss:$16 sps:$4 sm:$0xff]  }
 0x37d   : > { %7048 = vmatpush1.bf16.msra.mxu0 %v9468_v34  ;;  %6803 = vmatprep.subr.bf16.mxu1 %v9473_v40  ;;  %v9548_v34 = vld [vmem:[%s11266_s3 + $0x70c] ss:$16 sps:$4 sm:$0xff]   ;;  %v9543_v40 = vld [vmem:[%s11266_s3 + $0x700] ss:$16 sps:$4 sm:$0xff]  }
 0x37e   : > { %7049 = vmatprep.subr.bf16.mxu0 %v9476_v55  ;;  %v9546_v55 = vld [vmem:[%s11266_s3 + $0x708] ss:$16 sps:$4 sm:$0xff]  }
 0x380   : > { %6804 = vmatpush1.bf16.msra.mxu1 %v9471_v21  ;;  %v9551_v21 = vld [vmem:[%s11266_s3 + $0x724] ss:$16 sps:$4 sm:$0xff]  }
 0x381   : > { %7050 = vmatpush1.bf16.msra.mxu0 %v9474_v25  ;;  %6805 = vmatprep.subr.bf16.mxu1 %v9479_v61  ;;  %v9554_v25 = vld [vmem:[%s11266_s3 + $0x72c] ss:$16 sps:$4 sm:$0xff]   ;;  %v9549_v61 = vld [vmem:[%s11266_s3 + $0x720] ss:$16 sps:$4 sm:$0xff]  }
 0x382   : > { %7051 = vmatprep.subr.bf16.mxu0 %v9482_v62  ;;  %v9552_v62 = vld [vmem:[%s11266_s3 + $0x728] ss:$16 sps:$4 sm:$0xff]  }
 0x384   : > { %6806 = vmatpush1.bf16.msra.mxu1 %v9477_v63  ;;  %v9557_v63 = vld [vmem:[%s11266_s3 + $0x744] ss:$16 sps:$4 sm:$0xff]  }
 0x385   : > { %7052 = vmatpush1.bf16.msra.mxu0 %v9480_v0  ;;  %6807 = vmatprep.subr.bf16.mxu1 %v9485_v1  ;;  %v9560_v0 = vld [vmem:[%s11266_s3 + $0x74c] ss:$16 sps:$4 sm:$0xff]   ;;  %v9555_v1 = vld [vmem:[%s11266_s3 + $0x740] ss:$16 sps:$4 sm:$0xff]  }
 0x386   : > { %7053 = vmatprep.subr.bf16.mxu0 %v9488_v2  ;;  %v9558_v2 = vld [vmem:[%s11266_s3 + $0x748] ss:$16 sps:$4 sm:$0xff]  }
 0x388   : > { %6808 = vmatpush1.bf16.msra.mxu1 %v9483_v4  ;;  %v9563_v4 = vld [vmem:[%s11266_s3 + $0x764] ss:$16 sps:$4 sm:$0xff]  }
 0x389   : > { %7054 = vmatpush1.bf16.msra.mxu0 %v9486_v8  ;;  %6809 = vmatprep.subr.bf16.mxu1 %v9491_v9  ;;  %v9566_v8 = vld [vmem:[%s11266_s3 + $0x76c] ss:$16 sps:$4 sm:$0xff]   ;;  %v9561_v9 = vld [vmem:[%s11266_s3 + $0x760] ss:$16 sps:$4 sm:$0xff]  }
 0x38a   : > { %7055 = vmatprep.subr.bf16.mxu0 %v9494_v10  ;;  %v9569_v10 = vld [vmem:[%s11266_s3 + $0x784] ss:$16 sps:$4 sm:$0xff]  }
 0x38c   : > { %6810 = vmatpush1.bf16.msra.mxu1 %v9489_v12  ;;  %v9567_v12 = vld [vmem:[%s11266_s3 + $0x780] ss:$16 sps:$4 sm:$0xff]  }
 0x38d   : > { %7056 = vmatpush1.bf16.msra.mxu0 %v9492_v13  ;;  %6820 = vmatprep.subr.bf16.mxu1 %v9497_v19  ;;  %v9570_v13 = vld [vmem:[%s11266_s3 + $0x788] ss:$16 sps:$4 sm:$0xff]   ;;  %v9578_v19 = vld [vmem:[%s11266_s3 + $0x7ac] ss:$16 sps:$4 sm:$0xff]  }
 0x38e   : > { %7066 = vmatprep.subr.bf16.mxu0 %v9500_v20  ;;  %v9573_v20 = vld [vmem:[%s11266_s3 + $0x7a0] ss:$16 sps:$4 sm:$0xff]  }
 0x38f   : > { %6812 = vmatmul.mubr.bf16.vlgmr.msra.gmra.mrb[24].mxu1 %v4556_v6 }
 0x390   : > { %7058 = vmatmul.mubr.bf16.vlgmr.msra.gmra.mrb[12].mxu0 %v4556_v6  ;;  %6821 = vmatpush1.bf16.msra.mxu1 %v9495_v22  ;;  %v9576_v22 = vld [vmem:[%s11266_s3 + $0x7a8] ss:$16 sps:$4 sm:$0xff]   ;;  %v9581_v6 = vld [vmem:[%s11266_s3 + $0x7c4] ss:$16 sps:$4 sm:$0xff]  }
 0x391   : > { %6852 = vmatprep.mubr.bf16.mxu1 %v4559_v33  ;;  %7067 = vmatpush1.bf16.msra.mxu0 %v9498_v24  ;;  %v9584_v24 = vld [vmem:[%s11266_s3 + $0x7cc] ss:$16 sps:$4 sm:$0xff]  }
 0x392   : > { %7098 = vmatprep.mubr.bf16.mxu0 %v4559_v33  ;;  %6822 = vmatprep.subr.bf16.mxu1 %v9503_v26  ;;  %v4490_v26 = vmul.f32 0.25, %v4488_v54  ;;  %v9579_v33 = vld [vmem:[%s11266_s3 + $0x7c0] ss:$16 sps:$4 sm:$0xff]   ;;  %v9648_v54 = vld [vmem:[%s11266_s3 + $0x928] ss:$16 sps:$4 sm:$0xff]  }
 0x393   : > { %7068 = vmatprep.subr.bf16.mxu0 %v9506_v38  ;;  %v4492_v38 = vld [vmem:[#allocation5 + $0x8] sm:$0x7] }
 0x394   : > { %6823 = vmatpush1.bf16.msra.mxu1 %v9501_v51  ;;  %v9582_v51 = vld [vmem:[%s11266_s3 + $0x7c8] ss:$16 sps:$4 sm:$0xff]  }
 0x395   : > { %7069 = vmatpush1.bf16.msra.mxu0 %v9504_v17  ;;  %6824 = vmatprep.subr.bf16.mxu1 %v9509_v18  ;;  %v9587_v17 = vld [vmem:[%s11266_s3 + $0x7e4] ss:$16 sps:$4 sm:$0xff]   ;;  %v4523_v18 = vsub.s32 6, %v10083_v3 }
 0x396   : > { %7070 = vmatprep.subr.bf16.mxu0 %v9512_v23  ;;  %v9590_v23 = vld [vmem:[%s11266_s3 + $0x7ec] ss:$16 sps:$4 sm:$0xff]  }
 0x398   : > { %6825 = vmatpush1.bf16.msra.mxu1 %v9507_v27  ;;  %v10938_v27 = vadd.f32 %v4492_v38, %v4490_v26  ;;  %v9654_v26 = vld [vmem:[%s11266_s3 + $0x948] ss:$16 sps:$4 sm:$0xff]   ;;  %v9662_v38 = vld [vmem:[%s11266_s3 + $0x96c] ss:$16 sps:$4 sm:$0xff]  }
 0x399   : > { %7071 = vmatpush1.bf16.msra.mxu0 %v9510_v28  ;;  %6826 = vmatprep.subr.bf16.mxu1 %v9515_v29  ;;  %v9585_v28 = vld [vmem:[%s11266_s3 + $0x7e0] ss:$16 sps:$4 sm:$0xff]   ;;  %v9588_v29 = vld [vmem:[%s11266_s3 + $0x7e8] ss:$16 sps:$4 sm:$0xff]  }
 0x39a   : > { %7072 = vmatprep.subr.bf16.mxu0 %v9518_v30  ;;  %v4524_v30 = vrot.slane %v10333_v37, %v4523_v18  ;;  %v9594_v37 = vld [vmem:[%s11266_s3 + $0x808] ss:$16 sps:$4 sm:$0xff]   ;;  %v9665_v18 = vld [vmem:[%s11266_s3 + $0x984] ss:$16 sps:$4 sm:$0xff]  }
 0x39c   : > { %6827 = vmatpush1.bf16.msra.mxu1 %v9513_v31  ;;  %v9593_v31 = vld [vmem:[%s11266_s3 + $0x804] ss:$16 sps:$4 sm:$0xff]  }
 0x39d   : > { %7073 = vmatpush1.bf16.msra.mxu0 %v9516_v32  ;;  %6828 = vmatprep.subr.bf16.mxu1 %v9521_v39  ;;  %v9596_v32 = vld [vmem:[%s11266_s3 + $0x80c] ss:$16 sps:$4 sm:$0xff]   ;;  %v4536_v39 = vrot.slane %v10938_v27, %v10327_v59 }
 0x39e   : > { %7074 = vmatprep.subr.bf16.mxu0 %v9524_v41  ;;  %v9591_v41 = vld [vmem:[%s11266_s3 + $0x800] ss:$16 sps:$4 sm:$0xff]  }
 0x3a0   : > { %6829 = vmatpush1.bf16.msra.mxu1 %v9519_v35  ;;  %v4558_v35 = vpack.c.bf16 %v4524_v30, %v4524_v30  ;;  %v9671_v30 = vld [vmem:[%s11266_s3 + $0x9a4] ss:$16 sps:$4 sm:$0xff]  }
 0x3a1   : > { %7075 = vmatpush1.bf16.msra.mxu0 %v9522_v42  ;;  %6830 = vmatprep.subr.bf16.mxu1 %v9527_v43  ;;  %v9599_v42 = vld [vmem:[%s11266_s3 + $0x824] ss:$16 sps:$4 sm:$0xff]   ;;  %v4561_v43 = vpack.c.bf16 %v4536_v39, %v4536_v39  ;;  %v9672_v39 = vld [vmem:[%s11266_s3 + $0x9a8] ss:$16 sps:$4 sm:$0xff]  }
 0x3a2   : > { %7076 = vmatprep.subr.bf16.mxu0 %v9530_v14  ;;  %v9602_v14 = vld [vmem:[%s11266_s3 + $0x82c] ss:$16 sps:$4 sm:$0xff]  }
 0x3a4   : > { %6831 = vmatpush1.bf16.msra.mxu1 %v9525_v44  ;;  %v9597_v44 = vld [vmem:[%s11266_s3 + $0x820] ss:$16 sps:$4 sm:$0xff]  }
 0x3a5   : > { %7077 = vmatpush1.bf16.msra.mxu0 %v9528_v45  ;;  %6832 = vmatprep.subr.bf16.mxu1 %v9533_v46  ;;  %v9600_v45 = vld [vmem:[%s11266_s3 + $0x828] ss:$16 sps:$4 sm:$0xff]   ;;  %v9605_v46 = vld [vmem:[%s11266_s3 + $0x844] ss:$16 sps:$4 sm:$0xff]  }
 0x3a6   : > { %7078 = vmatprep.subr.bf16.mxu0 %v9536_v48  ;;  %v9608_v48 = vld [vmem:[%s11266_s3 + $0x84c] ss:$16 sps:$4 sm:$0xff]  }
 0x3a8   : > { %6833 = vmatpush1.bf16.msra.mxu1 %v9531_v49  ;;  %v9603_v49 = vld [vmem:[%s11266_s3 + $0x840] ss:$16 sps:$4 sm:$0xff]  }
 0x3a9   : > { %7079 = vmatpush1.bf16.msra.mxu0 %v9534_v50  ;;  %6834 = vmatprep.subr.bf16.mxu1 %v9539_v52  ;;  %v9606_v50 = vld [vmem:[%s11266_s3 + $0x848] ss:$16 sps:$4 sm:$0xff]   ;;  %v9611_v52 = vld [vmem:[%s11266_s3 + $0x864] ss:$16 sps:$4 sm:$0xff]  }
 0x3aa   : > { %7080 = vmatprep.subr.bf16.mxu0 %v9542_v56  ;;  %v9614_v56 = vld [vmem:[%s11266_s3 + $0x86c] ss:$16 sps:$4 sm:$0xff]  }
 0x3ac   : > { %6835 = vmatpush1.bf16.msra.mxu1 %v9537_v57  ;;  %v9609_v57 = vld [vmem:[%s11266_s3 + $0x860] ss:$16 sps:$4 sm:$0xff]  }
 0x3ad   : > { %7081 = vmatpush1.bf16.msra.mxu0 %v9540_v58  ;;  %6836 = vmatprep.subr.bf16.mxu1 %v9545_v7  ;;  %v9612_v58 = vld [vmem:[%s11266_s3 + $0x868] ss:$16 sps:$4 sm:$0xff]   ;;  %v9617_v7 = vld [vmem:[%s11266_s3 + $0x884] ss:$16 sps:$4 sm:$0xff]  }
 0x3ae   : > { %7082 = vmatprep.subr.bf16.mxu0 %v9548_v34  ;;  %v9620_v34 = vld [vmem:[%s11266_s3 + $0x88c] ss:$16 sps:$4 sm:$0xff]  }
 0x3b0   : > { %6837 = vmatpush1.bf16.msra.mxu1 %v9543_v40  ;;  %v9615_v40 = vld [vmem:[%s11266_s3 + $0x880] ss:$16 sps:$4 sm:$0xff]  }
 0x3b1   : > { %7083 = vmatpush1.bf16.msra.mxu0 %v9546_v55  ;;  %6838 = vmatprep.subr.bf16.mxu1 %v9551_v21  ;;  %v9618_v55 = vld [vmem:[%s11266_s3 + $0x888] ss:$16 sps:$4 sm:$0xff]   ;;  %v9623_v21 = vld [vmem:[%s11266_s3 + $0x8a4] ss:$16 sps:$4 sm:$0xff]  }
 0x3b2   : > { %7084 = vmatprep.subr.bf16.mxu0 %v9554_v25  ;;  %v9626_v25 = vld [vmem:[%s11266_s3 + $0x8ac] ss:$16 sps:$4 sm:$0xff]  }
 0x3b4   : > { %6839 = vmatpush1.bf16.msra.mxu1 %v9549_v61  ;;  %v9621_v61 = vld [vmem:[%s11266_s3 + $0x8a0] ss:$16 sps:$4 sm:$0xff]  }
 0x3b5   : > { %7085 = vmatpush1.bf16.msra.mxu0 %v9552_v62  ;;  %6840 = vmatprep.subr.bf16.mxu1 %v9557_v63  ;;  %v9624_v62 = vld [vmem:[%s11266_s3 + $0x8a8] ss:$16 sps:$4 sm:$0xff]   ;;  %v9629_v63 = vld [vmem:[%s11266_s3 + $0x8c4] ss:$16 sps:$4 sm:$0xff]  }
 0x3b6   : > { %7086 = vmatprep.subr.bf16.mxu0 %v9560_v0  ;;  %v9632_v0 = vld [vmem:[%s11266_s3 + $0x8cc] ss:$16 sps:$4 sm:$0xff]  }
 0x3b8   : > { %6841 = vmatpush1.bf16.msra.mxu1 %v9555_v1  ;;  %v9627_v1 = vld [vmem:[%s11266_s3 + $0x8c0] ss:$16 sps:$4 sm:$0xff]  }
 0x3b9   : > { %7087 = vmatpush1.bf16.msra.mxu0 %v9558_v2  ;;  %6842 = vmatprep.subr.bf16.mxu1 %v9563_v4  ;;  %v9630_v2 = vld [vmem:[%s11266_s3 + $0x8c8] ss:$16 sps:$4 sm:$0xff]   ;;  %v9635_v4 = vld [vmem:[%s11266_s3 + $0x8e4] ss:$16 sps:$4 sm:$0xff]  }
 0x3ba   : > { %7088 = vmatprep.subr.bf16.mxu0 %v9566_v8  ;;  %v9638_v8 = vld [vmem:[%s11266_s3 + $0x8ec] ss:$16 sps:$4 sm:$0xff]  }
 0x3bc   : > { %6843 = vmatpush1.bf16.msra.mxu1 %v9561_v9  ;;  %v9633_v9 = vld [vmem:[%s11266_s3 + $0x8e0] ss:$16 sps:$4 sm:$0xff]  }
 0x3bd   : > { %7089 = vmatpush1.bf16.msra.mxu0 %v9564_v5  ;;  %6844 = vmatprep.subr.bf16.mxu1 %v9569_v10  ;;  %v9636_v5 = vld [vmem:[%s11266_s3 + $0x8e8] ss:$16 sps:$4 sm:$0xff]   ;;  %v9641_v10 = vld [vmem:[%s11266_s3 + $0x904] ss:$16 sps:$4 sm:$0xff]  }
 0x3be   : > { %7090 = vmatprep.subr.bf16.mxu0 %v9572_v11  ;;  %v9644_v11 = vld [vmem:[%s11266_s3 + $0x90c] ss:$16 sps:$4 sm:$0xff]  }
 0x3c0   : > { %6845 = vmatpush1.bf16.msra.mxu1 %v9567_v12  ;;  %v9639_v12 = vld [vmem:[%s11266_s3 + $0x900] ss:$16 sps:$4 sm:$0xff]  }
 0x3c1   : > { %7091 = vmatpush1.bf16.msra.mxu0 %v9570_v13  ;;  %6846 = vmatprep.subr.bf16.mxu1 %v9575_v16  ;;  %v9642_v13 = vld [vmem:[%s11266_s3 + $0x908] ss:$16 sps:$4 sm:$0xff]   ;;  %v9647_v16 = vld [vmem:[%s11266_s3 + $0x924] ss:$16 sps:$4 sm:$0xff]  }
 0x3c2   : > { %7092 = vmatprep.subr.bf16.mxu0 %v9578_v19  ;;  %v9650_v19 = vld [vmem:[%s11266_s3 + $0x92c] ss:$16 sps:$4 sm:$0xff]  }
 0x3c4   : > { %6847 = vmatpush1.bf16.msra.mxu1 %v9573_v20  ;;  %v9645_v20 = vld [vmem:[%s11266_s3 + $0x920] ss:$16 sps:$4 sm:$0xff]  }
 0x3c5   : > { %7093 = vmatpush1.bf16.msra.mxu0 %v9576_v22  ;;  %6848 = vmatprep.subr.bf16.mxu1 %v9581_v6  ;;  %v9653_v22 = vld [vmem:[%s11266_s3 + $0x944] ss:$16 sps:$4 sm:$0xff]   ;;  %v9656_v6 = vld [vmem:[%s11266_s3 + $0x94c] ss:$16 sps:$4 sm:$0xff]  }
 0x3c6   : > { %7094 = vmatprep.subr.bf16.mxu0 %v9584_v24  ;;  %v9651_v24 = vld [vmem:[%s11266_s3 + $0x940] ss:$16 sps:$4 sm:$0xff]  }
 0x3c8   : > { %6849 = vmatpush1.bf16.msra.mxu1 %v9579_v33  ;;  %v9659_v33 = vld [vmem:[%s11266_s3 + $0x964] ss:$16 sps:$4 sm:$0xff]  }
 0x3c9   : > { %7095 = vmatpush1.bf16.msra.mxu0 %v9582_v51  ;;  %6850 = vmatprep.subr.bf16.mxu1 %v9587_v17  ;;  %v9657_v51 = vld [vmem:[%s11266_s3 + $0x960] ss:$16 sps:$4 sm:$0xff]   ;;  %v9660_v17 = vld [vmem:[%s11266_s3 + $0x968] ss:$16 sps:$4 sm:$0xff]  }
 0x3ca   : > { %7096 = vmatprep.subr.bf16.mxu0 %v9590_v23  ;;  %v9668_v23 = vld [vmem:[%s11266_s3 + $0x98c] ss:$16 sps:$4 sm:$0xff]  }
 0x3cc   : > { %6851 = vmatpush1.bf16.msra.mxu1 %v9585_v28  ;;  %v9663_v28 = vld [vmem:[%s11266_s3 + $0x980] ss:$16 sps:$4 sm:$0xff]  }
 0x3cd   : > { %7097 = vmatpush1.bf16.msra.mxu0 %v9588_v29  ;;  %6861 = vmatprep.subr.bf16.mxu1 %v9593_v31  ;;  %v9666_v29 = vld [vmem:[%s11266_s3 + $0x988] ss:$16 sps:$4 sm:$0xff]   ;;  %v9674_v31 = vld [vmem:[%s11266_s3 + $0x9ac] ss:$16 sps:$4 sm:$0xff]  }
 0x3ce   : > { %7107 = vmatprep.subr.bf16.mxu0 %v9596_v32  ;;  %v9669_v32 = vld [vmem:[%s11266_s3 + $0x9a0] ss:$16 sps:$4 sm:$0xff]  }
 0x3cf   : > { %6853 = vmatmul.mubr.bf16.vlgmr.msra.gmra.mrb[24].mxu1 %v4558_v35 }
 0x3d0   : > { %7099 = vmatmul.mubr.bf16.vlgmr.msra.gmra.mrb[12].mxu0 %v4558_v35  ;;  %6862 = vmatpush1.bf16.msra.mxu1 %v9591_v41  ;;  %v9677_v41 = vld [vmem:[%s11266_s3 + $0x9c4] ss:$16 sps:$4 sm:$0xff]   ;;  %v9680_v35 = vld [vmem:[%s11266_s3 + $0x9cc] ss:$16 sps:$4 sm:$0xff]  }
 0x3d1   : > { %6893 = vmatprep.mubr.bf16.mxu1 %v4561_v43  ;;  %7108 = vmatpush1.bf16.msra.mxu0 %v9594_v37  ;;  %v9675_v37 = vld [vmem:[%s11266_s3 + $0x9c0] ss:$16 sps:$4 sm:$0xff]  }
 0x3d2   : > { %7139 = vmatprep.mubr.bf16.mxu0 %v4561_v43  ;;  %6863 = vmatprep.subr.bf16.mxu1 %v9599_v42  ;;  %v9678_v42 = vld [vmem:[%s11266_s3 + $0x9c8] ss:$16 sps:$4 sm:$0xff]   ;;  %v9683_v43 = vld [vmem:[%s11266_s3 + $0x9e4] ss:$16 sps:$4 sm:$0xff]  }
 0x3d3   : > { %7109 = vmatprep.subr.bf16.mxu0 %v9602_v14  ;;  %v9686_v14 = vld [vmem:[%s11266_s3 + $0x9ec] ss:$16 sps:$4 sm:$0xff]  }
 0x3d4   : > { %6864 = vmatpush1.bf16.msra.mxu1 %v9597_v44  ;;  %v9681_v44 = vld [vmem:[%s11266_s3 + $0x9e0] ss:$16 sps:$4 sm:$0xff]  }
 0x3d5   : > { %7110 = vmatpush1.bf16.msra.mxu0 %v9600_v45  ;;  %6865 = vmatprep.subr.bf16.mxu1 %v9605_v46  ;;  %v9684_v45 = vld [vmem:[%s11266_s3 + $0x9e8] ss:$16 sps:$4 sm:$0xff]   ;;  %v4532_v46 = vrot.slane %v10938_v27, %v10330_v60 }
 0x3d6   : > { %7111 = vmatprep.subr.bf16.mxu0 %v9608_v48  ;;  %v9689_v48 = vld [vmem:[%s11266_s3 + $0xa04] ss:$16 sps:$4 sm:$0xff]  }
 0x3d8   : > { %6866 = vmatpush1.bf16.msra.mxu1 %v9603_v49  ;;  %v9692_v49 = vld [vmem:[%s11266_s3 + $0xa0c] ss:$16 sps:$4 sm:$0xff]  }
 0x3d9   : > { %7112 = vmatpush1.bf16.msra.mxu0 %v9606_v50  ;;  %6867 = vmatprep.subr.bf16.mxu1 %v9611_v52  ;;  %v9687_v50 = vld [vmem:[%s11266_s3 + $0xa00] ss:$16 sps:$4 sm:$0xff]   ;;  %v4560_v52 = vpack.c.bf16 %v4532_v46, %v4532_v46 }
 0x3da   : > { %7113 = vmatprep.subr.bf16.mxu0 %v9614_v56  ;;  %v9690_v56 = vld [vmem:[%s11266_s3 + $0xa08] ss:$16 sps:$4 sm:$0xff]  }
 0x3dc   : > { %6868 = vmatpush1.bf16.msra.mxu1 %v9609_v57  ;;  %v9695_v57 = vld [vmem:[%s11266_s3 + $0xa24] ss:$16 sps:$4 sm:$0xff]  }
 0x3dd   : > { %7114 = vmatpush1.bf16.msra.mxu0 %v9612_v58  ;;  %6869 = vmatprep.subr.bf16.mxu1 %v9617_v7  ;;  %v9698_v58 = vld [vmem:[%s11266_s3 + $0xa2c] ss:$16 sps:$4 sm:$0xff]   ;;  %v9693_v7 = vld [vmem:[%s11266_s3 + $0xa20] ss:$16 sps:$4 sm:$0xff]  }
 0x3de   : > { %7115 = vmatprep.subr.bf16.mxu0 %v9620_v34  ;;  %v9696_v34 = vld [vmem:[%s11266_s3 + $0xa28] ss:$16 sps:$4 sm:$0xff]  }
 0x3e0   : > { %6870 = vmatpush1.bf16.msra.mxu1 %v9615_v40  ;;  %v9701_v40 = vld [vmem:[%s11266_s3 + $0xa44] ss:$16 sps:$4 sm:$0xff]  }
 0x3e1   : > { %7116 = vmatpush1.bf16.msra.mxu0 %v9618_v55  ;;  %6871 = vmatprep.subr.bf16.mxu1 %v9623_v21  ;;  %v9704_v55 = vld [vmem:[%s11266_s3 + $0xa4c] ss:$16 sps:$4 sm:$0xff]   ;;  %v9858_v21 = vmov 0  }
 0x3e2   : > { %7117 = vmatprep.subr.bf16.mxu0 %v9626_v25  ;;  %v9699_v25 = vld [vmem:[%s11266_s3 + $0xa40] ss:$16 sps:$4 sm:$0xff]  }
 0x3e4   : > { %6872 = vmatpush1.bf16.msra.mxu1 %v9621_v61  ;;  %v9702_v61 = vld [vmem:[%s11266_s3 + $0xa48] ss:$16 sps:$4 sm:$0xff]  }
 0x3e5   : > { %7118 = vmatpush1.bf16.msra.mxu0 %v9624_v62  ;;  %6873 = vmatprep.subr.bf16.mxu1 %v9629_v63  ;;  %v9707_v62 = vld [vmem:[%s11266_s3 + $0xa64] ss:$16 sps:$4 sm:$0xff]   ;;  %v9710_v63 = vld [vmem:[%s11266_s3 + $0xa6c] ss:$16 sps:$4 sm:$0xff]  }
 0x3e6   : > { %7119 = vmatprep.subr.bf16.mxu0 %v9632_v0  ;;  %v9705_v0 = vld [vmem:[%s11266_s3 + $0xa60] ss:$16 sps:$4 sm:$0xff]  }
 0x3e8   : > { %6874 = vmatpush1.bf16.msra.mxu1 %v9627_v1  ;;  %v9708_v1 = vld [vmem:[%s11266_s3 + $0xa68] ss:$16 sps:$4 sm:$0xff]  }
 0x3e9   : > { %7120 = vmatpush1.bf16.msra.mxu0 %v9630_v2  ;;  %6875 = vmatprep.subr.bf16.mxu1 %v9635_v4  ;;  %v9713_v2 = vld [vmem:[%s11266_s3 + $0xa84] ss:$16 sps:$4 sm:$0xff]   ;;  %v9716_v4 = vld [vmem:[%s11266_s3 + $0xa8c] ss:$16 sps:$4 sm:$0xff]  }
 0x3ea   : > { %7121 = vmatprep.subr.bf16.mxu0 %v9638_v8  ;;  %v9711_v8 = vld [vmem:[%s11266_s3 + $0xa80] ss:$16 sps:$4 sm:$0xff]  }
 0x3ec   : > { %6876 = vmatpush1.bf16.msra.mxu1 %v9633_v9  ;;  %v9714_v9 = vld [vmem:[%s11266_s3 + $0xa88] ss:$16 sps:$4 sm:$0xff]  }
 0x3ed   : > { %7122 = vmatpush1.bf16.msra.mxu0 %v9636_v5  ;;  %6877 = vmatprep.subr.bf16.mxu1 %v9641_v10  ;;  %v9719_v5 = vld [vmem:[%s11266_s3 + $0xaa4] ss:$16 sps:$4 sm:$0xff]   ;;  %v9722_v10 = vld [vmem:[%s11266_s3 + $0xaac] ss:$16 sps:$4 sm:$0xff]  }
 0x3ee   : > { %7123 = vmatprep.subr.bf16.mxu0 %v9644_v11  ;;  %v9717_v11 = vld [vmem:[%s11266_s3 + $0xaa0] ss:$16 sps:$4 sm:$0xff]  }
 0x3f0   : > { %6878 = vmatpush1.bf16.msra.mxu1 %v9639_v12  ;;  %v9720_v12 = vld [vmem:[%s11266_s3 + $0xaa8] ss:$16 sps:$4 sm:$0xff]  }
 0x3f1   : > { %7124 = vmatpush1.bf16.msra.mxu0 %v9642_v13  ;;  %6879 = vmatprep.subr.bf16.mxu1 %v9647_v16  ;;  %v9725_v13 = vld [vmem:[%s11266_s3 + $0xac4] ss:$16 sps:$4 sm:$0xff]   ;;  %v9728_v16 = vld [vmem:[%s11266_s3 + $0xacc] ss:$16 sps:$4 sm:$0xff]  }
 0x3f2   : > { %7125 = vmatprep.subr.bf16.mxu0 %v9650_v19  ;;  %v9723_v19 = vld [vmem:[%s11266_s3 + $0xac0] ss:$16 sps:$4 sm:$0xff]  }
 0x3f4   : > { %6880 = vmatpush1.bf16.msra.mxu1 %v9645_v20  ;;  %v9726_v20 = vld [vmem:[%s11266_s3 + $0xac8] ss:$16 sps:$4 sm:$0xff]  }
 0x3f5   : > { %7126 = vmatpush1.bf16.msra.mxu0 %v9648_v54  ;;  %6881 = vmatprep.subr.bf16.mxu1 %v9653_v22  ;;  %v9731_v54 = vld [vmem:[%s11266_s3 + $0xae4] ss:$16 sps:$4 sm:$0xff]   ;;  %v9734_v22 = vld [vmem:[%s11266_s3 + $0xaec] ss:$16 sps:$4 sm:$0xff]  }
 0x3f6   : > { %7127 = vmatprep.subr.bf16.mxu0 %v9656_v6  ;;  %v9729_v6 = vld [vmem:[%s11266_s3 + $0xae0] ss:$16 sps:$4 sm:$0xff]  }
 0x3f8   : > { %6882 = vmatpush1.bf16.msra.mxu1 %v9651_v24  ;;  %v9732_v24 = vld [vmem:[%s11266_s3 + $0xae8] ss:$16 sps:$4 sm:$0xff]  }
 0x3f9   : > { %7128 = vmatpush1.bf16.msra.mxu0 %v9654_v26  ;;  %6883 = vmatprep.subr.bf16.mxu1 %v9659_v33  ;;  %v4540_v26 = vrot.slane %v10938_v27, %v10534_v36 }
 0x3fa   : > { %7129 = vmatprep.subr.bf16.mxu0 %v9662_v38  ;;  %v4915_v38 = vld [vmem:[#allocation7] sm:$0xf] }
 0x3fb   : > { %v4562_v33 = vpack.c.bf16 %v4540_v26, %v4540_v26 }
 0x3fc   : > { %6884 = vmatpush1.bf16.msra.mxu1 %v9657_v51  ;;  %v6680_v51 = vrot.slane %v4915_v38, %v10330_v60 }
 0x3fd   : > { %7130 = vmatpush1.bf16.msra.mxu0 %v9660_v17  ;;  %6885 = vmatprep.subr.bf16.mxu1 %v9665_v18  ;;  %v6688_v17 = vrot.slane %v4915_v38, %v10534_v36  ;;  %v6684_v18 = vrot.slane %v4915_v38, %v10327_v59 }
 0x3fe   : > { %7131 = vmatprep.subr.bf16.mxu0 %v9668_v23  ;;  %v6692_v23 = vrot.slane %v4915_v38, %v4511_v47 }
 0x400   : > { %6886 = vmatpush1.bf16.msra.mxu1 %v9663_v28 }
 0x401   : > { %7132 = vmatpush1.bf16.msra.mxu0 %v9666_v29  ;;  %6887 = vmatprep.subr.bf16.mxu1 %v9671_v30 }
 0x402   : > { %7133 = vmatprep.subr.bf16.mxu0 %v9674_v31 }
 0x404   : > { %6888 = vmatpush1.bf16.msra.mxu1 %v9669_v32 }
 0x405   : > { %7134 = vmatpush1.bf16.msra.mxu0 %v9672_v39  ;;  %6889 = vmatprep.subr.bf16.mxu1 %v9677_v41 }
 0x406   : > { %7135 = vmatprep.subr.bf16.mxu0 %v9680_v35 }
 0x408   : > { %6890 = vmatpush1.bf16.msra.mxu1 %v9675_v37 }
 0x409   : > { %7136 = vmatpush1.bf16.msra.mxu0 %v9678_v42  ;;  %6891 = vmatprep.subr.bf16.mxu1 %v9683_v43 }
 0x40a   : > { %7137 = vmatprep.subr.bf16.mxu0 %v9686_v14 }
 0x40c   : > { %6892 = vmatpush1.bf16.msra.mxu1 %v9681_v44 }
 0x40d   : > { %7138 = vmatpush1.bf16.msra.mxu0 %v9684_v45  ;;  %6902 = vmatprep.subr.bf16.mxu1 %v9689_v48 }
 0x40e   : > { %7148 = vmatprep.subr.bf16.mxu0 %v9692_v49 }
 0x40f   : > { %6894 = vmatmul.mubr.bf16.vlgmr.msra.gmra.mrb[24].mxu1 %v4560_v52 }
 0x410   : > { %7140 = vmatmul.mubr.bf16.vlgmr.msra.gmra.mrb[12].mxu0 %v4560_v52  ;;  %6903 = vmatpush1.bf16.msra.mxu1 %v9687_v50 }
 0x411   : > { %7149 = vmatpush1.bf16.msra.mxu0 %v9690_v56  ;;  %6904 = vmatprep.subr.bf16.mxu1 %v9695_v57 }
 0x412   : > { %7150 = vmatprep.subr.bf16.mxu0 %v9698_v58  ;;  %6934 = vmatprep.mubr.bf16.mxu1 %v9858_v21 }
 0x413   : > { %7180 = vmatprep.mubr.bf16.mxu0 %v9858_v21 }
 0x414   : > { %6905 = vmatpush1.bf16.msra.mxu1 %v9693_v7 }
 0x415   : > { %7151 = vmatpush1.bf16.msra.mxu0 %v9696_v34  ;;  %6906 = vmatprep.subr.bf16.mxu1 %v9701_v40 }
 0x416   : > { %7152 = vmatprep.subr.bf16.mxu0 %v9704_v55 }
 0x418   : > { %6907 = vmatpush1.bf16.msra.mxu1 %v9699_v25 }
 0x419   : > { %7153 = vmatpush1.bf16.msra.mxu0 %v9702_v61  ;;  %6908 = vmatprep.subr.bf16.mxu1 %v9707_v62 }
 0x41a   : > { %7154 = vmatprep.subr.bf16.mxu0 %v9710_v63 }
 0x41c   : > { %6909 = vmatpush1.bf16.msra.mxu1 %v9705_v0 }
 0x41d   : > { %7155 = vmatpush1.bf16.msra.mxu0 %v9708_v1  ;;  %6910 = vmatprep.subr.bf16.mxu1 %v9713_v2 }
 0x41e   : > { %7156 = vmatprep.subr.bf16.mxu0 %v9716_v4 }
 0x420   : > { %6911 = vmatpush1.bf16.msra.mxu1 %v9711_v8 }
 0x421   : > { %7157 = vmatpush1.bf16.msra.mxu0 %v9714_v9  ;;  %6912 = vmatprep.subr.bf16.mxu1 %v9719_v5 }
 0x422   : > { %7158 = vmatprep.subr.bf16.mxu0 %v9722_v10 }
 0x424   : > { %6913 = vmatpush1.bf16.msra.mxu1 %v9717_v11 }
 0x425   : > { %7159 = vmatpush1.bf16.msra.mxu0 %v9720_v12  ;;  %6914 = vmatprep.subr.bf16.mxu1 %v9725_v13 }
 0x426   : > { %7160 = vmatprep.subr.bf16.mxu0 %v9728_v16 }
 0x428   : > { %6915 = vmatpush1.bf16.msra.mxu1 %v9723_v19 }
 0x429   : > { %7161 = vmatpush1.bf16.msra.mxu0 %v9726_v20  ;;  %6916 = vmatprep.subr.bf16.mxu1 %v9731_v54 }
 0x42a   : > { %7162 = vmatprep.subr.bf16.mxu0 %v9734_v22 }
 0x42c   : > { %6917 = vmatpush1.bf16.msra.mxu1 %v9729_v6 }
 0x42d   : > { %7163 = vmatpush1.bf16.msra.mxu0 %v9732_v24 }
 0x42f   : > { %6935 = vmatmul.mubr.bf16.vlgmr.msra.gmra.mrb[24].mxu1 %v4562_v33 }
 0x430   : > { %7181 = vmatmul.mubr.bf16.vlgmr.msra.gmra.mrb[12].mxu0 %v4562_v33 }
 0x502   : > { %v6936_v28 = vpop.f32.mrb[24].mxu1 }
 0x503   : > { %v8292_v29 = vadd.f32 %v6936_v28, %v6680_v51  ;;  %v7182_v27 = vpop.f32.mrb[12].mxu0  ;;  %v6938_v30 = vpop.f32.mrb[25].mxu1 }
 0x504   : > { %v8294_v31 = vadd.f32 %v7182_v27, %v6688_v17  ;;  %v8293_v32 = vadd.f32 %v6938_v30, %v6684_v18  ;;  %v7184_v39 = vpop.f32.mrb[13].mxu0  ;;  %v6940_v41 = vpop.f32.mrb[26].mxu1 }
 0x505   : > { %v8295_v35 = vadd.f32 %v7184_v39, %v6692_v23  ;;  %v7186_v37 = vpop.f32.mrb[14].mxu0  ;;  %v6941_v42 = vpop.f32.mrb[27].mxu1 }
 0x506   : > { %v7193_v60 = vcombine.low %v8292_v29, %v8293_v32  ;;  %v7187_v43 = vpop.f32.mrb[15].mxu0 }
 0x507   : > { %v7194_v36 = vcombine.low %v8294_v31, %v8295_v35 }
 0x508   : > { %v7201_v59 = vrot.slane %v7193_v60, %v10086_v15 }
 0x509   : > { %v7208_v3 = vrot.slane %v7194_v36, %v10086_v15 }
 0x50b   : > { %v7209_v47 = vcombine.low %v7201_v59, %v7208_v3 }
 0x50d   : > { %v7216_v14 = vrot.slane %v7209_v47, %v10086_v15 }
 0x50f   : > { %7220 = vst.msk [vmem:[%s288_s30] sm:$0xf] %vm7218_vm1, %v7216_v14 }
 0x510 PF: > { %s17_s20 = sadd.s32 1, %s9849_s20   ;;  %s11282_s18 = smov %s9845_s19 }
 0x511   : > { %p14_p8 = scmp.ge.s32.totalorder %s17_s20, 6   ;;  %s11283_s19 = smov %s11285_s26 }
 0x513   :  { %16 = sbr.rel (!%p14_p8) target bundleno = 3 (0x3), region = 91 }
 0x51a   :  { %7240 = vsyncpa [#allocation4], 1 }
 0x51b   :  { %7242 = vsyncpa [#allocation4 + $0x1], 1 }
 0x51c   :  { %7243 = vsyncpa [#allocation6], 1 }

</bundles_post_ra>
